<compile_context>
chip_gen: v6e
topology: v6e:2x2x1
jax: 0.10.0
libtpu: 0.0.40
codegen_flags: <defaults>
</compile_context>

<pallas_src>
import jax
import jax.numpy as jnp
from jax.experimental import pallas as pl
from jax.experimental.pallas import tpu as pltpu


def _round_up(a, b):
    return (a + b - 1) // b * b


def _build_fc_operands(fc_w, fc_b, cout):
    """Split the PyTorch-ordered fc weight into 7 per-position (Cout, Kpad) blocks.

    PyTorch TPP concat order is level-major with (channel, position) C-order
    inside each level; block order here matches the in-kernel position order
    [L0 | L1.h0 | L1.h1 | L2.q0..q3].
    """
    k = fc_w.shape[0]
    kpad = _round_up(k, 128)
    w0 = jnp.transpose(fc_w[:, :cout], (1, 0))                      # (C, K)
    w1 = fc_w[:, cout:3 * cout].reshape(k, cout, 2)
    w2 = fc_w[:, 3 * cout:7 * cout].reshape(k, cout, 4)
    blocks = [w0]
    blocks += [jnp.transpose(w1[:, :, h], (1, 0)) for h in range(2)]
    blocks += [jnp.transpose(w2[:, :, q], (1, 0)) for q in range(4)]
    stack = jnp.stack(blocks, axis=0).astype(jnp.float32)           # (7, C, K)
    fcw = jnp.zeros((7, cout, kpad), jnp.float32).at[:, :, :k].set(stack)
    fcb = jnp.zeros((1, kpad), jnp.float32).at[0, :k].set(fc_b.astype(jnp.float32))
    return fcw, fcb, kpad


# -----------------------------------------------------------------------------
# Fused forward: relation + person/joint mean + TPP + FC in one pallas_call
# -----------------------------------------------------------------------------
def model_forward(x5, A, rel_w, rel_b, fc_w, fc_b, T_dim):
    # x5: (N, C, T, V, M) like the PyTorch module input.
    N, C, T, V, M = x5.shape
    assert T % T_dim == 0
    cin = C * T_dim
    tp = T // T_dim
    cout = rel_w.shape[0]
    k = fc_w.shape[0]
    assert tp % 4 == 0 and tp >= 4, "TPP(3 levels) needs Tp divisible by 4"

    # --- glue: SINGLE transpose to (N, Tp*M, V*Cin); lanes = (joint, ci) with
    # ci = c*T_dim + td and original t = td*Tp + tpi (reproduces the PyTorch
    # permute/view chain).  Lane width V*Cin keeps the streamed tile lane-dense.
    xk = x5.reshape(N, C, T_dim, tp, V, M)
    xk = jnp.transpose(xk, (0, 3, 5, 4, 1, 2)).reshape(N, tp * M, V * cin)
    xk = xk.astype(jnp.bfloat16)

    # --- sample block: large enough to fill the MXU and amortize per-step
    # overhead, capped so the pre-mean (G, V*Cout) f32 activation stays within
    # ~32 MiB (v7x: 64 MiB VMEM/TC; v5e/v6e: 128 MiB).
    act_bytes_per_sample = tp * M * V * cout * 4
    bn_cap = max(8, ((32 << 20) // max(act_bytes_per_sample, 1)) // 8 * 8)
    if N <= 8:
        bn = 8
    else:
        bn = min(64, _round_up((N + 1) // 2, 8))     # >= 2 grid steps -> megacore
    bn = max(8, min(bn, bn_cap))
    n_pad = _round_up(max(N, bn), bn)
    if n_pad != N:
        xk = jnp.zeros((n_pad, tp * M, V * cin), jnp.bfloat16).at[:N].set(xk)

    # --- invariant operands (constant index_maps -> fetched once, not per step)
    # Fused relation operator: R[(w,ci),(v,o)] = A[w,v] * rel_w[o,ci].
    rop = jnp.kron(A.astype(jnp.float32),
                   jnp.transpose(rel_w, (1, 0)).astype(jnp.float32))
    rop = rop.astype(jnp.bfloat16)                                   # (V*Cin, V*Cout)
    b_row = jnp.tile(rel_b.astype(jnp.float32), (V,)).reshape(1, V * cout)
    fcw, fcb, kpad = _build_fc_operands(fc_w, fc_b, cout)

    g_rows = bn * tp * M            # rows of the per-step relation working set
    inv_vm = 1.0 / float(V * M)
    tp4 = tp // 4

    def kernel(x_ref, rop_ref, b_ref, fcw_ref, fcb_ref, o_ref):
        # --- relation: one lane-dense bf16 MXU matmul does adjacency+channel mix
        x2 = x_ref[...].reshape(g_rows, V * cin)                     # (G, V*Cin)
        y = jnp.dot(x2, rop_ref[...], preferred_element_type=jnp.float32)
        y = jnp.maximum(y + b_ref[...], 0.0)                         # (G, V*Cout)

        # --- mean over joints: sum of tile-aligned (Cout-wide) lane slices
        s = y[:, 0:cout]
        for v in range(1, V):
            s = s + y[:, v * cout:(v + 1) * cout]                    # (G, Cout)

        # --- mean over persons (sublane-group reduce) + 1/(V*M) normalization
        feat = jnp.sum(s.reshape(bn * tp, M, cout), axis=1) * inv_vm  # (BN*Tp, C)

        # --- TPP(3): quarter maxes from contiguous time slices; halves/global
        # via pairwise maximum (exact since tp % 4 == 0).
        f3 = feat.reshape(bn, tp, cout)
        q = [jnp.max(f3[:, i * tp4:(i + 1) * tp4, :], axis=1) for i in range(4)]
        h0 = jnp.maximum(q[0], q[1])
        h1 = jnp.maximum(q[2], q[3])
        p0 = jnp.maximum(h0, h1)

        # --- classifier: sum of 7 per-position matmuls (no 7-way lane concat)
        pos = (p0, h0, h1, q[0], q[1], q[2], q[3])
        acc = jnp.dot(pos[0], fcw_ref[0], preferred_element_type=jnp.float32)
        for i in range(1, 7):
            acc = acc + jnp.dot(pos[i], fcw_ref[i],
                                preferred_element_type=jnp.float32)
        o_ref[...] = (acc + fcb_ref[...]).astype(o_ref.dtype)

    out = pl.pallas_call(
        kernel,
        out_shape=jax.ShapeDtypeStruct((n_pad, kpad), jnp.float32),
        grid=(n_pad // bn,),
        in_specs=[
            pl.BlockSpec((bn, tp * M, V * cin), lambda i: (i, 0, 0)),
            # invariant operands: constant index_maps, so no per-step re-fetch
            # (default double-buffering kept for lowering safety).
            pl.BlockSpec((V * cin, V * cout), lambda i: (0, 0)),
            pl.BlockSpec((1, V * cout), lambda i: (0, 0)),
            pl.BlockSpec((7, cout, kpad), lambda i: (0, 0, 0)),
            pl.BlockSpec((1, kpad), lambda i: (0, 0)),
        ],
        out_specs=pl.BlockSpec((bn, kpad), lambda i: (i, 0)),
        compiler_params=pltpu.CompilerParams(
            dimension_semantics=("parallel",),
            vmem_limit_bytes=64 * 1024 * 1024),
    )(xk, rop, b_row, fcw, fcb)
    return out[:N, :k]


# -----------------------------------------------------------------------------
# Pure-JAX reference matching the PyTorch forward semantics
# -----------------------------------------------------------------------------
def reference(x5, A, rel_w, rel_b, fc_w, fc_b, T_dim):
    N, C, T, V, M = x5.shape
    cin = C * T_dim
    tp = T // T_dim
    cout = rel_w.shape[0]
    x = jnp.transpose(x5, (0, 4, 1, 2, 3)).reshape(N * M, C, T, V)
    x = jnp.transpose(x, (0, 3, 1, 2)).reshape(N * M, V, cin, tp)
    x = jnp.transpose(x, (0, 2, 3, 1))                      # (NM, Cin, Tp, V)
    y = jnp.einsum('nctw,wv,oc->notv', x, A, rel_w) + rel_b[None, :, None, None]
    y = jnp.maximum(y, 0.0).mean(axis=3)                    # (NM, Cout, Tp)
    y = y.reshape(N, M, cout, tp).mean(axis=1)              # (N, Cout, Tp)
    p0 = y.max(axis=2)                                      # (N, C)
    p1 = y.reshape(N, cout, 2, tp // 2).max(axis=3)         # (N, C, 2)
    p2 = y.reshape(N, cout, 4, tp // 4).max(axis=3)         # (N, C, 4)
    tpp = jnp.concatenate(
        [p0.reshape(N, -1), p1.reshape(N, -1), p2.reshape(N, -1)], axis=1)
    return tpp @ fc_w.T + fc_b


if __name__ == "__main__":
    # Small, module-consistent shapes: input (N, C, T, V, M)
    N, C, T, V, M = 6, 4, 8, 8, 2
    T_dim = 2                 # -> Tp = 4, Cin = 8
    num_class = 10
    cout = 256                # backbone_in_c / backbone_out_c in default_backbone
    cin = C * T_dim

    key = jax.random.PRNGKey(0)
    k1, k2, k3, k4, k5 = jax.random.split(key, 5)
    x = jax.random.normal(k1, (N, C, T, V, M), jnp.float32)

    # Deterministic parameters (synthetic init; shapes follow the module)
    rel_w = jax.random.normal(k2, (cout, cin), jnp.float32) * 0.1
    rel_b = jax.random.normal(k3, (cout,), jnp.float32) * 0.01
    fc_w = jax.random.normal(k4, (num_class, cout * 7), jnp.float32) * 0.001
    fc_b = jax.random.normal(k5, (num_class,), jnp.float32) * 0.01

    # Deterministic normalized ring adjacency standing in for graph.A
    idx = jnp.arange(V)
    adj = (jnp.abs(idx[:, None] - idx[None, :]) <= 1).astype(jnp.float32)
    A = adj / adj.sum(axis=0, keepdims=True)

    fwd = jax.jit(model_forward, static_argnums=(6,))
    out = jax.block_until_ready(fwd(x, A, rel_w, rel_b, fc_w, fc_b, T_dim))
    ref = jax.block_until_ready(reference(x, A, rel_w, rel_b, fc_w, fc_b, T_dim))

    assert out.shape == (N, num_class), out.shape
    # bf16 relation operands -> small relative error vs. the f32 reference.
    assert jnp.allclose(out, ref, rtol=2e-2, atol=1e-3), (
        "mismatch vs reference", out, ref)
    print("KERNEL_OK")
</pallas_src>

<mosaic_0001>
module attributes {stable_mosaic.version = 11 : i64} {
  func.func @kernel(%arg0: i32, %arg1: memref<8x8x64xbf16, #tpu.memory_space<vmem>>, %arg2: memref<64x2048xbf16, #tpu.memory_space<vmem>>, %arg3: memref<1x2048xf32, #tpu.memory_space<vmem>>, %arg4: memref<7x256x128xf32, #tpu.memory_space<vmem>>, %arg5: memref<1x128xf32, #tpu.memory_space<vmem>>, %arg6: memref<8x128xf32, #tpu.memory_space<vmem>>) attributes {dimension_semantics = [#tpu.dimension_semantics<parallel>], iteration_bounds = array<i64: 1>, scalar_prefetch = 0 : i64, scratch_operands = 0 : i64, tpu.core_type = #tpu.core_type<tc>, window_params = [{transform_indices = @transform_0, window_bounds = array<i64: 8, 8, 64>}, {pipeline_mode = #tpu.pipeline_mode<synchronous>, transform_indices = @transform_1, window_bounds = array<i64: 64, 2048>}, {pipeline_mode = #tpu.pipeline_mode<synchronous>, transform_indices = @transform_2, window_bounds = array<i64: 1, 2048>}, {pipeline_mode = #tpu.pipeline_mode<synchronous>, transform_indices = @transform_3, window_bounds = array<i64: 7, 256, 128>}, {pipeline_mode = #tpu.pipeline_mode<synchronous>, transform_indices = @transform_4, window_bounds = array<i64: 1, 128>}, {transform_indices = @transform_5, window_bounds = array<i64: 8, 128>}]} {
    %c0 = arith.constant 0 : index
    %c0_0 = arith.constant 0 : index
    %c0_1 = arith.constant 0 : index
    %0 = vector.load %arg1[%c0, %c0_0, %c0_1] : memref<8x8x64xbf16, #tpu.memory_space<vmem>>, vector<8x8x64xbf16>
    %1 = vector.shape_cast %0 : vector<8x8x64xbf16> to vector<64x64xbf16>
    %c0_2 = arith.constant 0 : index
    %c0_3 = arith.constant 0 : index
    %2 = vector.load %arg2[%c0_2, %c0_3] : memref<64x2048xbf16, #tpu.memory_space<vmem>>, vector<64x2048xbf16>
    %cst = arith.constant dense<0.000000e+00> : vector<64x2048xf32>
    %3 = tpu.matmul %1, %2, %cst {dimension_numbers = #tpu.dot_dimension_numbers<[1], [0], [0], [1], [0, 0, 1, 1], [], []>} : vector<64x64xbf16>, vector<64x2048xbf16>, vector<64x2048xf32> -> vector<64x2048xf32>
    %c0_4 = arith.constant 0 : index
    %c0_5 = arith.constant 0 : index
    %4 = vector.load %arg3[%c0_4, %c0_5] : memref<1x2048xf32, #tpu.memory_space<vmem>>, vector<1x2048xf32>
    %5 = vector.broadcast %4 : vector<1x2048xf32> to vector<64x2048xf32>
    %6 = arith.addf %3, %5 : vector<64x2048xf32>
    %cst_6 = arith.constant 0.000000e+00 : f32
    %7 = vector.broadcast %cst_6 : f32 to vector<64x2048xf32>
    %8 = arith.maximumf %6, %7 : vector<64x2048xf32>
    %9 = vector.extract_strided_slice %8 {offsets = [0, 0], sizes = [64, 256], strides = [1, 1]} : vector<64x2048xf32> to vector<64x256xf32>
    %10 = vector.extract_strided_slice %8 {offsets = [0, 256], sizes = [64, 256], strides = [1, 1]} : vector<64x2048xf32> to vector<64x256xf32>
    %11 = arith.addf %9, %10 : vector<64x256xf32>
    %12 = vector.extract_strided_slice %8 {offsets = [0, 512], sizes = [64, 256], strides = [1, 1]} : vector<64x2048xf32> to vector<64x256xf32>
    %13 = arith.addf %11, %12 : vector<64x256xf32>
    %14 = vector.extract_strided_slice %8 {offsets = [0, 768], sizes = [64, 256], strides = [1, 1]} : vector<64x2048xf32> to vector<64x256xf32>
    %15 = arith.addf %13, %14 : vector<64x256xf32>
    %16 = vector.extract_strided_slice %8 {offsets = [0, 1024], sizes = [64, 256], strides = [1, 1]} : vector<64x2048xf32> to vector<64x256xf32>
    %17 = arith.addf %15, %16 : vector<64x256xf32>
    %18 = vector.extract_strided_slice %8 {offsets = [0, 1280], sizes = [64, 256], strides = [1, 1]} : vector<64x2048xf32> to vector<64x256xf32>
    %19 = arith.addf %17, %18 : vector<64x256xf32>
    %20 = vector.extract_strided_slice %8 {offsets = [0, 1536], sizes = [64, 256], strides = [1, 1]} : vector<64x2048xf32> to vector<64x256xf32>
    %21 = arith.addf %19, %20 : vector<64x256xf32>
    %22 = vector.extract_strided_slice %8 {offsets = [0, 1792], sizes = [64, 256], strides = [1, 1]} : vector<64x2048xf32> to vector<64x256xf32>
    %23 = arith.addf %21, %22 : vector<64x256xf32>
    %24 = vector.shape_cast %23 : vector<64x256xf32> to vector<32x2x256xf32>
    %cst_7 = arith.constant dense<0.000000e+00> : vector<32x256xf32>
    %25 = vector.multi_reduction <add>, %24, %cst_7 [1] : vector<32x2x256xf32> to vector<32x256xf32>
    %cst_8 = arith.constant 6.250000e-02 : f32
    %26 = vector.broadcast %cst_8 : f32 to vector<32x256xf32>
    %27 = arith.mulf %25, %26 : vector<32x256xf32>
    %28 = vector.shape_cast %27 : vector<32x256xf32> to vector<8x4x256xf32>
    %29 = vector.extract_strided_slice %28 {offsets = [0, 0, 0], sizes = [8, 1, 256], strides = [1, 1, 1]} : vector<8x4x256xf32> to vector<8x1x256xf32>
    %cst_9 = arith.constant dense<0xFF800000> : vector<8x256xf32>
    %30 = vector.multi_reduction <maximumf>, %29, %cst_9 [1] : vector<8x1x256xf32> to vector<8x256xf32>
    %31 = vector.extract_strided_slice %28 {offsets = [0, 1, 0], sizes = [8, 1, 256], strides = [1, 1, 1]} : vector<8x4x256xf32> to vector<8x1x256xf32>
    %cst_10 = arith.constant dense<0xFF800000> : vector<8x256xf32>
    %32 = vector.multi_reduction <maximumf>, %31, %cst_10 [1] : vector<8x1x256xf32> to vector<8x256xf32>
    %33 = vector.extract_strided_slice %28 {offsets = [0, 2, 0], sizes = [8, 1, 256], strides = [1, 1, 1]} : vector<8x4x256xf32> to vector<8x1x256xf32>
    %cst_11 = arith.constant dense<0xFF800000> : vector<8x256xf32>
    %34 = vector.multi_reduction <maximumf>, %33, %cst_11 [1] : vector<8x1x256xf32> to vector<8x256xf32>
    %35 = vector.extract_strided_slice %28 {offsets = [0, 3, 0], sizes = [8, 1, 256], strides = [1, 1, 1]} : vector<8x4x256xf32> to vector<8x1x256xf32>
    %cst_12 = arith.constant dense<0xFF800000> : vector<8x256xf32>
    %36 = vector.multi_reduction <maximumf>, %35, %cst_12 [1] : vector<8x1x256xf32> to vector<8x256xf32>
    %37 = arith.maximumf %30, %32 : vector<8x256xf32>
    %38 = arith.maximumf %34, %36 : vector<8x256xf32>
    %39 = arith.maximumf %37, %38 : vector<8x256xf32>
    %c0_13 = arith.constant 0 : index
    %c0_14 = arith.constant 0 : index
    %c0_15 = arith.constant 0 : index
    %40 = vector.load %arg4[%c0_13, %c0_14, %c0_15] : memref<7x256x128xf32, #tpu.memory_space<vmem>>, vector<1x256x128xf32>
    %41 = vector.shape_cast %40 : vector<1x256x128xf32> to vector<256x128xf32>
    %cst_16 = arith.constant dense<0.000000e+00> : vector<8x128xf32>
    %42 = tpu.matmul %39, %41, %cst_16 {dimension_numbers = #tpu.dot_dimension_numbers<[1], [0], [0], [1], [0, 0, 1, 1], [], []>} : vector<8x256xf32>, vector<256x128xf32>, vector<8x128xf32> -> vector<8x128xf32>
    %c1 = arith.constant 1 : index
    %c0_17 = arith.constant 0 : index
    %c0_18 = arith.constant 0 : index
    %43 = vector.load %arg4[%c1, %c0_17, %c0_18] : memref<7x256x128xf32, #tpu.memory_space<vmem>>, vector<1x256x128xf32>
    %44 = vector.shape_cast %43 : vector<1x256x128xf32> to vector<256x128xf32>
    %cst_19 = arith.constant dense<0.000000e+00> : vector<8x128xf32>
    %45 = tpu.matmul %37, %44, %cst_19 {dimension_numbers = #tpu.dot_dimension_numbers<[1], [0], [0], [1], [0, 0, 1, 1], [], []>} : vector<8x256xf32>, vector<256x128xf32>, vector<8x128xf32> -> vector<8x128xf32>
    %46 = arith.addf %42, %45 : vector<8x128xf32>
    %c2 = arith.constant 2 : index
    %c0_20 = arith.constant 0 : index
    %c0_21 = arith.constant 0 : index
    %47 = vector.load %arg4[%c2, %c0_20, %c0_21] : memref<7x256x128xf32, #tpu.memory_space<vmem>>, vector<1x256x128xf32>
    %48 = vector.shape_cast %47 : vector<1x256x128xf32> to vector<256x128xf32>
    %cst_22 = arith.constant dense<0.000000e+00> : vector<8x128xf32>
    %49 = tpu.matmul %38, %48, %cst_22 {dimension_numbers = #tpu.dot_dimension_numbers<[1], [0], [0], [1], [0, 0, 1, 1], [], []>} : vector<8x256xf32>, vector<256x128xf32>, vector<8x128xf32> -> vector<8x128xf32>
    %50 = arith.addf %46, %49 : vector<8x128xf32>
    %c3 = arith.constant 3 : index
    %c0_23 = arith.constant 0 : index
    %c0_24 = arith.constant 0 : index
    %51 = vector.load %arg4[%c3, %c0_23, %c0_24] : memref<7x256x128xf32, #tpu.memory_space<vmem>>, vector<1x256x128xf32>
    %52 = vector.shape_cast %51 : vector<1x256x128xf32> to vector<256x128xf32>
    %cst_25 = arith.constant dense<0.000000e+00> : vector<8x128xf32>
    %53 = tpu.matmul %30, %52, %cst_25 {dimension_numbers = #tpu.dot_dimension_numbers<[1], [0], [0], [1], [0, 0, 1, 1], [], []>} : vector<8x256xf32>, vector<256x128xf32>, vector<8x128xf32> -> vector<8x128xf32>
    %54 = arith.addf %50, %53 : vector<8x128xf32>
    %c4 = arith.constant 4 : index
    %c0_26 = arith.constant 0 : index
    %c0_27 = arith.constant 0 : index
    %55 = vector.load %arg4[%c4, %c0_26, %c0_27] : memref<7x256x128xf32, #tpu.memory_space<vmem>>, vector<1x256x128xf32>
    %56 = vector.shape_cast %55 : vector<1x256x128xf32> to vector<256x128xf32>
    %cst_28 = arith.constant dense<0.000000e+00> : vector<8x128xf32>
    %57 = tpu.matmul %32, %56, %cst_28 {dimension_numbers = #tpu.dot_dimension_numbers<[1], [0], [0], [1], [0, 0, 1, 1], [], []>} : vector<8x256xf32>, vector<256x128xf32>, vector<8x128xf32> -> vector<8x128xf32>
    %58 = arith.addf %54, %57 : vector<8x128xf32>
    %c5 = arith.constant 5 : index
    %c0_29 = arith.constant 0 : index
    %c0_30 = arith.constant 0 : index
    %59 = vector.load %arg4[%c5, %c0_29, %c0_30] : memref<7x256x128xf32, #tpu.memory_space<vmem>>, vector<1x256x128xf32>
    %60 = vector.shape_cast %59 : vector<1x256x128xf32> to vector<256x128xf32>
    %cst_31 = arith.constant dense<0.000000e+00> : vector<8x128xf32>
    %61 = tpu.matmul %34, %60, %cst_31 {dimension_numbers = #tpu.dot_dimension_numbers<[1], [0], [0], [1], [0, 0, 1, 1], [], []>} : vector<8x256xf32>, vector<256x128xf32>, vector<8x128xf32> -> vector<8x128xf32>
    %62 = arith.addf %58, %61 : vector<8x128xf32>
    %c6 = arith.constant 6 : index
    %c0_32 = arith.constant 0 : index
    %c0_33 = arith.constant 0 : index
    %63 = vector.load %arg4[%c6, %c0_32, %c0_33] : memref<7x256x128xf32, #tpu.memory_space<vmem>>, vector<1x256x128xf32>
    %64 = vector.shape_cast %63 : vector<1x256x128xf32> to vector<256x128xf32>
    %cst_34 = arith.constant dense<0.000000e+00> : vector<8x128xf32>
    %65 = tpu.matmul %36, %64, %cst_34 {dimension_numbers = #tpu.dot_dimension_numbers<[1], [0], [0], [1], [0, 0, 1, 1], [], []>} : vector<8x256xf32>, vector<256x128xf32>, vector<8x128xf32> -> vector<8x128xf32>
    %66 = arith.addf %62, %65 : vector<8x128xf32>
    %c0_35 = arith.constant 0 : index
    %c0_36 = arith.constant 0 : index
    %67 = vector.load %arg5[%c0_35, %c0_36] : memref<1x128xf32, #tpu.memory_space<vmem>>, vector<1x128xf32>
    %68 = vector.broadcast %67 : vector<1x128xf32> to vector<8x128xf32>
    %69 = arith.addf %66, %68 : vector<8x128xf32>
    %c0_37 = arith.constant 0 : index
    %c0_38 = arith.constant 0 : index
    %70 = vector.load %arg6[%c0_37, %c0_38] : memref<8x128xf32, #tpu.memory_space<vmem>>, vector<8x128xf32>
    tpu.vector_store %arg6[%c0_37, %c0_38], %69 {strides = array<i32>} : memref<8x128xf32, #tpu.memory_space<vmem>>, vector<8x128xf32>,
    return
  }
  func.func @transform_0(%arg0: i32) -> (i32, i32, i32) {
    %c0_i32 = arith.constant 0 : i32
    %c0_i32_0 = arith.constant 0 : i32
    %c0_i32_1 = arith.constant 0 : i32
    return %arg0, %c0_i32, %c0_i32_0 : i32, i32, i32
  }
  func.func @transform_1(%arg0: i32) -> (i32, i32) {
    %c0_i32 = arith.constant 0 : i32
    %c0_i32_0 = arith.constant 0 : i32
    %c0_i32_1 = arith.constant 0 : i32
    return %c0_i32, %c0_i32_0 : i32, i32
  }
  func.func @transform_2(%arg0: i32) -> (i32, i32) {
    %c0_i32 = arith.constant 0 : i32
    %c0_i32_0 = arith.constant 0 : i32
    %c0_i32_1 = arith.constant 0 : i32
    return %c0_i32, %c0_i32_0 : i32, i32
  }
  func.func @transform_3(%arg0: i32) -> (i32, i32, i32) {
    %c0_i32 = arith.constant 0 : i32
    %c0_i32_0 = arith.constant 0 : i32
    %c0_i32_1 = arith.constant 0 : i32
    %c0_i32_2 = arith.constant 0 : i32
    return %c0_i32, %c0_i32_0, %c0_i32_1 : i32, i32, i32
  }
  func.func @transform_4(%arg0: i32) -> (i32, i32) {
    %c0_i32 = arith.constant 0 : i32
    %c0_i32_0 = arith.constant 0 : i32
    %c0_i32_1 = arith.constant 0 : i32
    return %c0_i32, %c0_i32_0 : i32, i32
  }
  func.func @transform_5(%arg0: i32) -> (i32, i32) {
    %c0_i32 = arith.constant 0 : i32
    %c0_i32_0 = arith.constant 0 : i32
    return %arg0, %c0_i32 : i32, i32
  }
}

</mosaic_0001>

<bundles_post_ra>
// kernel: model_forward.1
= control target key start
LH: loop header
LB: loop body
LE: loop exit
PB: predicated region body
PF: predicated region fallthrough
CT: control target
= control target key end

     0   :  { %v3950_v6 = vmov 0   ;;  %vm518_vm0 = vcmask 523264   ;;  %s6265_s0 = inlined_call_operand.vmem [shape: bf16[8,8,64], index: 0, kind: input, shape index: {}]   ;;  %s6266_s1 = inlined_call_operand.vmem [shape: bf16[64,2048], index: 1, kind: input, shape index: {}]   ;;  %s6267_s2 = inlined_call_operand.vmem [shape: f32[1,2048], index: 2, kind: input, shape index: {}]   ;;  %s6268_s3 = inlined_call_operand.vmem [shape: f32[7,256,128], index: 3, kind: input, shape index: {}]   ;;  %s6269_s4 = inlined_call_operand.vmem [shape: f32[1,128], index: 4, kind: input, shape index: {}]   ;;  %s6270_s5 = inlined_call_operand.hbm [shape: f32[8,128], index: 5, kind: output, shape index: {}]  }
   0x1   :  { %v78_v0 = vld [vmem:[%s6266_s1 + $0x180] sm:$0xff]  ;;  %583 = vmatprep.mubr.bf16.mxu1 %v3950_v6  ;;  %563 = vmatprep.mubr.bf16.mxu0 %v3950_v6  ;;  %v79_v16 = vld [vmem:[%s6266_s1 + $0x188] sm:$0xff]  ;;  %v80_v18 = vld [vmem:[%s6266_s1 + $0x190] sm:$0xff] }
   0x2   :  { %v86_v1 = vld [vmem:[%s6266_s1 + $0x1c0] sm:$0xff]  ;;  %v87_v17 = vld [vmem:[%s6266_s1 + $0x1c8] sm:$0xff]  ;;  %v88_v19 = vld [vmem:[%s6266_s1 + $0x1d0] sm:$0xff] }
   0x3   :  { %v62_v2 = vld [vmem:[%s6266_s1 + $0x100] sm:$0xff]  ;;  %v3428_v3 = vcombine.high %v78_v0, %v86_v1  ;;  %v3427_v4 = vcombine.low %v78_v0, %v86_v1  ;;  %v3430_v21 = vcombine.high %v79_v16, %v87_v17  ;;  %v3432_v22 = vcombine.high %v80_v18, %v88_v19  ;;  %v63_v23 = vld [vmem:[%s6266_s1 + $0x108] sm:$0xff]  ;;  %v64_v25 = vld [vmem:[%s6266_s1 + $0x110] sm:$0xff] }
   0x4   :  { %v70_v5 = vld [vmem:[%s6266_s1 + $0x140] sm:$0xff]  ;;  %v71_v24 = vld [vmem:[%s6266_s1 + $0x148] sm:$0xff]  ;;  %v72_v26 = vld [vmem:[%s6266_s1 + $0x150] sm:$0xff]  ;;  %v3429_v29 = vcombine.low %v79_v16, %v87_v17  ;;  %v3431_v30 = vcombine.low %v80_v18, %v88_v19 }
   0x5   :  { %v3412_v7 = vcombine.high %v62_v2, %v70_v5  ;;  %v46_v8 = vld [vmem:[%s6266_s1 + $0x80] sm:$0xff]  ;;  %3913 = vmatprep.subr.bf16.mxu1 %v3428_v3  ;;  %539 = vmatprep.subr.bf16.mxu0 %v3428_v3  ;;  %v3411_v10 = vcombine.low %v62_v2, %v70_v5  ;;  %v4036_v27 = vld [vmem:[%s6265_s0 + $0x10] sm:$0xff]   ;;  %v3414_v31 = vcombine.high %v63_v23, %v71_v24  ;;  %v47_v33 = vld [vmem:[%s6266_s1 + $0x88] sm:$0xff] }
   0x6   :  { %v54_v9 = vld [vmem:[%s6266_s1 + $0xc0] sm:$0xff]  ;;  %3917 = vmatpush1.bf16.msra.mxu1 %v3427_v4  ;;  %540 = vmatpush1.bf16.msra.mxu0 %v3427_v4  ;;  %v3416_v32 = vcombine.high %v64_v25, %v72_v26  ;;  %v55_v34 = vld [vmem:[%s6266_s1 + $0xc8] sm:$0xff]  ;;  %v48_v35 = vld [vmem:[%s6266_s1 + $0x90] sm:$0xff]  ;;  %v3413_v37 = vcombine.low %v63_v23, %v71_v24  ;;  %v3415_v38 = vcombine.low %v64_v25, %v72_v26 }
   0x7   :  { %3914 = vmatprep.subr.bf16.mxu1 %v3412_v7  ;;  %541 = vmatprep.subr.bf16.mxu0 %v3412_v7  ;;  %v3396_v11 = vcombine.high %v46_v8, %v54_v9  ;;  %v30_v12 = vld [vmem:[%s6266_s1] sm:$0xff]  ;;  %v3395_v14 = vcombine.low %v46_v8, %v54_v9  ;;  %v56_v36 = vld [vmem:[%s6266_s1 + $0xd0] sm:$0xff]  ;;  %v3398_v39 = vcombine.high %v47_v33, %v55_v34  ;;  %v31_v41 = vld [vmem:[%s6266_s1 + $0x8] sm:$0xff] }
   0x8   :  { %v38_v13 = vld [vmem:[%s6266_s1 + $0x40] sm:$0xff]  ;;  %v3400_v40 = vcombine.high %v48_v35, %v56_v36  ;;  %v39_v42 = vld [vmem:[%s6266_s1 + $0x48] sm:$0xff]  ;;  %v32_v43 = vld [vmem:[%s6266_s1 + $0x10] sm:$0xff]  ;;  %v3397_v47 = vcombine.low %v47_v33, %v55_v34  ;;  %v3399_v48 = vcombine.low %v48_v35, %v56_v36 }
   0x9   :  { %v3380_v15 = vcombine.high %v30_v12, %v38_v13  ;;  %v3379_v20 = vcombine.low %v30_v12, %v38_v13  ;;  %v4041_v28 = vld [vmem:[%s6265_s0] sm:$0xff]   ;;  %v40_v44 = vld [vmem:[%s6266_s1 + $0x50] sm:$0xff]  ;;  %v4076_v45 = vld [vmem:[%s6265_s0 + $0x18] sm:$0xff]   ;;  %v3382_v49 = vcombine.high %v31_v41, %v39_v42 }
   0xa   :  { %3918 = vmatpush1.bf16.msra.mxu1 %v3411_v10  ;;  %542 = vmatpush1.bf16.msra.mxu0 %v3411_v10  ;;  %v4081_v46 = vld [vmem:[%s6265_s0 + $0x8] sm:$0xff]   ;;  %v3384_v50 = vcombine.high %v32_v43, %v40_v44  ;;  %v81_v51 = vld [vmem:[%s6266_s1 + $0x198] sm:$0xff] }
   0xb   :  { %3915 = vmatprep.subr.bf16.mxu1 %v3396_v11  ;;  %543 = vmatprep.subr.bf16.mxu0 %v3396_v11 }
   0xe   :  { %3919 = vmatpush1.bf16.msra.mxu1 %v3395_v14  ;;  %544 = vmatpush1.bf16.msra.mxu0 %v3395_v14 }
   0xf   :  { %3916 = vmatprep.subr.bf16.mxu1 %v3380_v15  ;;  %545 = vmatprep.subr.bf16.mxu0 %v3380_v15 }
  0x12   :  { %3920 = vmatpush1.bf16.msra.mxu1 %v3379_v20  ;;  %546 = vmatpush1.bf16.msra.mxu0 %v3379_v20 }
  0x13   :  { %612 = vmatprep.subr.bf16.mxu1 %v3430_v21  ;;  %685 = vmatprep.subr.bf16.mxu0 %v3432_v22 }
  0x15   :  { %3445 = vmatmul.mubr.msk.bf16.vlgmr.msra.gmra.mxu1 %vm518_vm0, %v4036_v27  ;;  %3443 = vmatmul.mubr.msk.bf16.vlgmr.msra.gmra.mxu0 %vm518_vm0, %v4041_v28 }
  0x16   :  { %613 = vmatpush1.bf16.msra.mxu1 %v3429_v29  ;;  %686 = vmatpush1.bf16.msra.mxu0 %v3431_v30 }
  0x17   :  { %614 = vmatprep.subr.bf16.mxu1 %v3414_v31  ;;  %687 = vmatprep.subr.bf16.mxu0 %v3416_v32 }
  0x18   :  { %593 = vmatprep.mubr.bf16.mxu1 %v3950_v6  ;;  %573 = vmatprep.mubr.bf16.mxu0 %v3950_v6 }
  0x1a   :  { %615 = vmatpush1.bf16.msra.mxu1 %v3413_v37  ;;  %688 = vmatpush1.bf16.msra.mxu0 %v3415_v38 }
  0x1b   :  { %616 = vmatprep.subr.bf16.mxu1 %v3398_v39  ;;  %689 = vmatprep.subr.bf16.mxu0 %v3400_v40 }
  0x1c   :  { %10 = vsyncpa [#allocation3], 0  ;;  %v89_v52 = vld [vmem:[%s6266_s1 + $0x1d8] sm:$0xff]  ;;  %v82_v53 = vld [vmem:[%s6266_s1 + $0x1a0] sm:$0xff]  ;;  %v3381_v55 = vcombine.low %v31_v41, %v39_v42  ;;  %v3383_v56 = vcombine.low %v32_v43, %v40_v44  ;;  %vm1835_vm1 = vcmask 1041408   ;;  %vm2477_vm2 = vcmask 1041409  }
  0x1d   :  { %v90_v54 = vld [vmem:[%s6266_s1 + $0x1e0] sm:$0xff]  ;;  %3446 = vmatmul.mubr.msk.bf16.gmra.mxu1 %vm518_vm0, %v4076_v45  ;;  %3444 = vmatmul.mubr.msk.bf16.gmra.mxu0 %vm518_vm0, %v4081_v46  ;;  %v3434_v57 = vcombine.high %v81_v51, %v89_v52  ;;  %v65_v59 = vld [vmem:[%s6266_s1 + $0x118] sm:$0xff]  ;;  %v3433_v61 = vcombine.low %v81_v51, %v89_v52  ;;  %v83_v20 = vld [vmem:[%s6266_s1 + $0x1a8] sm:$0xff]  ;;  %vm2479_vm3 = vcmask 1042434   ;;  %vm2481_vm4 = vcmask 1043459   ;;  %s3952_s0 = smov [#allocation2]  }
  0x1e   :  { %617 = vmatpush1.bf16.msra.mxu1 %v3397_v47  ;;  %690 = vmatpush1.bf16.msra.mxu0 %v3399_v48  ;;  %v3436_v58 = vcombine.high %v82_v53, %v90_v54  ;;  %v73_v60 = vld [vmem:[%s6266_s1 + $0x158] sm:$0xff]  ;;  %v66_v62 = vld [vmem:[%s6266_s1 + $0x120] sm:$0xff]  ;;  %v3435_v3 = vcombine.low %v82_v53, %v90_v54  ;;  %v91_v21 = vld [vmem:[%s6266_s1 + $0x1e8] sm:$0xff]  ;;  %vm2483_vm5 = vcmask 1044484   ;;  %vm2485_vm6 = vcmask 1045509   ;;  %s3367_s29 = sshll.u32 %s3952_s0, 4  ;;  %s3368_s29 = int_to_ptr.vmem [resolvable:$true] %s3367_s29 }
  0x1f   :  { %618 = vmatprep.subr.bf16.mxu1 %v3382_v49  ;;  %691 = vmatprep.subr.bf16.mxu0 %v3384_v50  ;;  %v74_v63 = vld [vmem:[%s6266_s1 + $0x160] sm:$0xff]  ;;  %v3418_v0 = vcombine.high %v65_v59, %v73_v60  ;;  %v49_v1 = vld [vmem:[%s6266_s1 + $0x98] sm:$0xff]  ;;  %v3417_v5 = vcombine.low %v65_v59, %v73_v60  ;;  %v3438_v24 = vcombine.high %v83_v20, %v91_v21  ;;  %v84_v25 = vld [vmem:[%s6266_s1 + $0x1b0] sm:$0xff]  ;;  %vm2487_vm7 = vcmask 1046534   ;;  %s3928_s30 = scalar_lea.vmem %s3368_s29, 128  ;;  %p3933_p1 = scmp.lt.s32.totalorder %s3368_s29, %s3368_s29 }
  0x20   :  { %636 = vmatprep.mubr.bf16.mxu1 %v3950_v6  ;;  %709 = vmatprep.mubr.bf16.mxu0 %v3950_v6  ;;  %v57_v2 = vld [vmem:[%s6266_s1 + $0xd8] sm:$0xff]  ;;  %v3420_v4 = vcombine.high %v66_v62, %v74_v63  ;;  %v3419_v8 = vcombine.low %v66_v62, %v74_v63  ;;  %v50_v9 = vld [vmem:[%s6266_s1 + $0xa0] sm:$0xff]  ;;  %v92_v26 = vld [vmem:[%s6266_s1 + $0x1f0] sm:$0xff]  ;;  %v3437_v32 = vcombine.low %v83_v20, %v91_v21  ;;  %vm2489_vm8 = vcmask 1047559   ;;  %p3929_p0 = scmp.ne.s32.totalorder %s3368_s29, %s3928_s30  ;;  %p3934_p2 = scmp.lt.s32.totalorder %s3928_s30, %s3928_s30 }
  0x21   :  { %v3402_v7 = vcombine.high %v49_v1, %v57_v2  ;;  %v58_v10 = vld [vmem:[%s6266_s1 + $0xe0] sm:$0xff]  ;;  %v33_v11 = vld [vmem:[%s6266_s1 + $0x18] sm:$0xff]  ;;  %v3401_v15 = vcombine.low %v49_v1, %v57_v2  ;;  %v3440_v29 = vcombine.high %v84_v25, %v92_v26  ;;  %v67_v30 = vld [vmem:[%s6266_s1 + $0x128] sm:$0xff]  ;;  %v3439_v38 = vcombine.low %v84_v25, %v92_v26 }
  0x22   :  { %619 = vmatpush1.bf16.msra.mxu1 %v3381_v55  ;;  %692 = vmatpush1.bf16.msra.mxu0 %v3383_v56  ;;  %v41_v12 = vld [vmem:[%s6266_s1 + $0x58] sm:$0xff]  ;;  %v34_v13 = vld [vmem:[%s6266_s1 + $0x20] sm:$0xff]  ;;  %v3404_v16 = vcombine.high %v50_v9, %v58_v10  ;;  %v3403_v18 = vcombine.low %v50_v9, %v58_v10  ;;  %v75_v31 = vld [vmem:[%s6266_s1 + $0x168] sm:$0xff]  ;;  %p3935_p3 = por %p3934_p2, %p3933_p1 }
  0x23   :  { %758 = vmatprep.subr.bf16.mxu1 %v3434_v57  ;;  %831 = vmatprep.subr.bf16.mxu0 %v3436_v58  ;;  %v42_v14 = vld [vmem:[%s6266_s1 + $0x60] sm:$0xff]  ;;  %v3386_v17 = vcombine.high %v33_v11, %v41_v12  ;;  %v3385_v22 = vcombine.low %v33_v11, %v41_v12  ;;  %v68_v33 = vld [vmem:[%s6266_s1 + $0x130] sm:$0xff]  ;;  %v3422_v35 = vcombine.high %v67_v30, %v75_v31  ;;  %v51_v36 = vld [vmem:[%s6266_s1 + $0xa8] sm:$0xff]  ;;  %v98_v11 = vlaneseq }
  0x24   :  { %v3388_v19 = vcombine.high %v34_v13, %v42_v14  ;;  %v3387_v23 = vcombine.low %v34_v13, %v42_v14  ;;  %v76_v34 = vld [vmem:[%s6266_s1 + $0x170] sm:$0xff]  ;;  %v59_v37 = vld [vmem:[%s6266_s1 + $0xe8] sm:$0xff]  ;;  %v3421_v40 = vcombine.low %v67_v30, %v75_v31  ;;  %v85_v56 = vld [vmem:[%s6266_s1 + $0x1b8] sm:$0xff]  ;;  %p3936_p4 = pnand %p3935_p3, %p3929_p0 }
  0x25   :  { %3447 = vmatmul.mubr.msk.bf16.vlgmr.msra.gmra.mxu1 %vm518_vm0, %v4041_v28  ;;  %3451 = vmatmul.mubr.msk.bf16.vlgmr.msra.gmra.mxu0 %vm518_vm0, %v4041_v28  ;;  %v3424_v39 = vcombine.high %v68_v33, %v76_v34  ;;  %v3406_v41 = vcombine.high %v51_v36, %v59_v37  ;;  %v3423_v42 = vcombine.low %v68_v33, %v76_v34  ;;  %v52_v43 = vld [vmem:[%s6266_s1 + $0xb0] sm:$0xff]  ;;  %v35_v47 = vld [vmem:[%s6266_s1 + $0x28] sm:$0xff]  ;;  %v93_v57 = vld [vmem:[%s6266_s1 + $0x1f8] sm:$0xff] }
  0x26   :  { %759 = vmatpush1.bf16.msra.mxu1 %v3433_v61  ;;  %646 = vmatprep.mubr.bf16.mxu1 %v3950_v6  ;;  %v60_v44 = vld [vmem:[%s6266_s1 + $0xf0] sm:$0xff]  ;;  %v43_v48 = vld [vmem:[%s6266_s1 + $0x68] sm:$0xff]  ;;  %v3405_v51 = vcombine.low %v51_v36, %v59_v37  ;;  %v3442_v60 = vcombine.high %v85_v56, %v93_v57  ;;  %v69_v61 = vld [vmem:[%s6266_s1 + $0x138] sm:$0xff]  ;;  %v3441_v63 = vcombine.low %v85_v56, %v93_v57 }
  0x27   :  { %760 = vmatprep.subr.bf16.mxu1 %v3418_v0  ;;  %719 = vmatprep.mubr.bf16.mxu0 %v3950_v6  ;;  %v36_v49 = vld [vmem:[%s6266_s1 + $0x30] sm:$0xff]  ;;  %v3408_v52 = vcombine.high %v52_v43, %v60_v44  ;;  %v3390_v53 = vcombine.high %v35_v47, %v43_v48  ;;  %v3407_v54 = vcombine.low %v52_v43, %v60_v44  ;;  %v77_v62 = vld [vmem:[%s6266_s1 + $0x178] sm:$0xff] }
  0x28   :  { %832 = vmatpush1.bf16.msra.mxu0 %v3435_v3  ;;  %v44_v50 = vld [vmem:[%s6266_s1 + $0x70] sm:$0xff]  ;;  %v3389_v58 = vcombine.low %v35_v47, %v43_v48  ;;  %v3426_v0 = vcombine.high %v69_v61, %v77_v62  ;;  %v53_v1 = vld [vmem:[%s6266_s1 + $0xb8] sm:$0xff]  ;;  %v3425_v3 = vcombine.low %v69_v61, %v77_v62 }
  0x29   :  { %833 = vmatprep.subr.bf16.mxu0 %v3420_v4  ;;  %v3392_v55 = vcombine.high %v36_v49, %v44_v50  ;;  %v3391_v59 = vcombine.low %v36_v49, %v44_v50  ;;  %v61_v2 = vld [vmem:[%s6266_s1 + $0xf8] sm:$0xff] }
  0x2a   :  { %761 = vmatpush1.bf16.msra.mxu1 %v3417_v5  ;;  %v3410_v4 = vcombine.high %v53_v1, %v61_v2  ;;  %v37_v5 = vld [vmem:[%s6266_s1 + $0x38] sm:$0xff] }
  0x2b   :  { %762 = vmatprep.subr.bf16.mxu1 %v3402_v7  ;;  %v45_v7 = vld [vmem:[%s6266_s1 + $0x78] sm:$0xff] }
  0x2c   :  { %834 = vmatpush1.bf16.msra.mxu0 %v3419_v8  ;;  %v3409_v8 = vcombine.low %v53_v1, %v61_v2  ;;  %v3394_v9 = vcombine.high %v37_v5, %v45_v7  ;;  %v3393_v10 = vcombine.low %v37_v5, %v45_v7 }
  0x2d   :  { %3448 = vmatmul.mubr.msk.bf16.gmra.mxu1 %vm518_vm0, %v4081_v46  ;;  %3452 = vmatmul.mubr.msk.bf16.gmra.mxu0 %vm518_vm0, %v4081_v46 }
  0x2e   :  { %656 = vmatprep.mubr.bf16.mxu1 %v3950_v6  ;;  %729 = vmatprep.mubr.bf16.mxu0 %v3950_v6 }
  0x2f   :  { %763 = vmatpush1.bf16.msra.mxu1 %v3401_v15  ;;  %835 = vmatprep.subr.bf16.mxu0 %v3404_v16  ;;  %v4295_v15 = vshrl.u32 %v98_v11, 7 }
  0x30   :  { %764 = vmatprep.subr.bf16.mxu1 %v3386_v17  ;;  %836 = vmatpush1.bf16.msra.mxu0 %v3403_v18 }
  0x31   :  { %837 = vmatprep.subr.bf16.mxu0 %v3388_v19  ;;  %v104_v18 = vsub.s32 1, %v4295_v15  ;;  %v108_v21 = vsub.s32 2, %v4295_v15  ;;  %v112_v26 = vsub.s32 3, %v4295_v15 }
  0x33   :  { %765 = vmatpush1.bf16.msra.mxu1 %v3385_v22  ;;  %v116_v22 = vsub.s32 4, %v4295_v15 }
  0x34   :  { %838 = vmatpush1.bf16.msra.mxu0 %v3387_v23  ;;  %904 = vmatprep.subr.bf16.mxu1 %v3438_v24 }
  0x35   :  { %3449 = vmatmul.mubr.msk.bf16.gmra.mxu1 %vm518_vm0, %v4036_v27  ;;  %3453 = vmatmul.mubr.msk.bf16.gmra.mxu0 %vm518_vm0, %v4036_v27 }
  0x36   :  { %666 = vmatprep.mubr.bf16.mxu1 %v3950_v6  ;;  %739 = vmatprep.mubr.bf16.mxu0 %v3950_v6 }
  0x37   :  { %977 = vmatprep.subr.bf16.mxu0 %v3440_v29  ;;  %v120_v29 = vsub.s32 5, %v4295_v15 }
  0x3d   :  { %3450 = vmatmul.mubr.msk.bf16.gmra.mxu1 %vm518_vm0, %v4076_v45  ;;  %3454 = vmatmul.mubr.msk.bf16.gmra.mxu0 %vm518_vm0, %v4076_v45 }
  0x3e   :  { %782 = vmatprep.mubr.bf16.mxu1 %v3950_v6  ;;  %855 = vmatprep.mubr.bf16.mxu0 %v3950_v6 }
  0x45   :  { %3455 = vmatmul.mubr.msk.bf16.vlgmr.msra.gmra.mxu1 %vm518_vm0, %v4041_v28  ;;  %3459 = vmatmul.mubr.msk.bf16.vlgmr.msra.gmra.mxu0 %vm518_vm0, %v4041_v28 }
  0x46   :  { %905 = vmatpush1.bf16.msra.mxu1 %v3437_v32  ;;  %792 = vmatprep.mubr.bf16.mxu1 %v3950_v6 }
  0x47   :  { %906 = vmatprep.subr.bf16.mxu1 %v3422_v35  ;;  %865 = vmatprep.mubr.bf16.mxu0 %v3950_v6 }
  0x48   :  { %978 = vmatpush1.bf16.msra.mxu0 %v3439_v38 }
  0x49   :  { %979 = vmatprep.subr.bf16.mxu0 %v3424_v39 }
  0x4a   :  { %907 = vmatpush1.bf16.msra.mxu1 %v3421_v40 }
  0x4b   :  { %908 = vmatprep.subr.bf16.mxu1 %v3406_v41 }
  0x4c   :  { %980 = vmatpush1.bf16.msra.mxu0 %v3423_v42 }
  0x4d   :  { %3456 = vmatmul.mubr.msk.bf16.gmra.mxu1 %vm518_vm0, %v4081_v46  ;;  %3460 = vmatmul.mubr.msk.bf16.gmra.mxu0 %vm518_vm0, %v4081_v46 }
  0x4e   :  { %802 = vmatprep.mubr.bf16.mxu1 %v3950_v6  ;;  %875 = vmatprep.mubr.bf16.mxu0 %v3950_v6 }
  0x4f   :  { %909 = vmatpush1.bf16.msra.mxu1 %v3405_v51  ;;  %981 = vmatprep.subr.bf16.mxu0 %v3408_v52 }
  0x50   :  { %910 = vmatprep.subr.bf16.mxu1 %v3390_v53  ;;  %982 = vmatpush1.bf16.msra.mxu0 %v3407_v54 }
  0x51   :  { %983 = vmatprep.subr.bf16.mxu0 %v3392_v55 }
  0x53   :  { %911 = vmatpush1.bf16.msra.mxu1 %v3389_v58 }
  0x54   :  { %984 = vmatpush1.bf16.msra.mxu0 %v3391_v59  ;;  %1050 = vmatprep.subr.bf16.mxu1 %v3442_v60 }
  0x55   :  { %3457 = vmatmul.mubr.msk.bf16.gmra.mxu1 %vm518_vm0, %v4036_v27  ;;  %3461 = vmatmul.mubr.msk.bf16.gmra.mxu0 %vm518_vm0, %v4036_v27 }
  0x56   :  { %812 = vmatprep.mubr.bf16.mxu1 %v3950_v6  ;;  %885 = vmatprep.mubr.bf16.mxu0 %v3950_v6 }
  0x5d   :  { %3458 = vmatmul.mubr.msk.bf16.gmra.mxu1 %vm518_vm0, %v4076_v45  ;;  %3462 = vmatmul.mubr.msk.bf16.gmra.mxu0 %vm518_vm0, %v4076_v45 }
  0x5e   :  { %928 = vmatprep.mubr.bf16.mxu1 %v3950_v6  ;;  %1001 = vmatprep.mubr.bf16.mxu0 %v3950_v6 }
  0x65   :  { %3463 = vmatmul.mubr.msk.bf16.vlgmr.msra.gmra.mxu1 %vm518_vm0, %v4041_v28  ;;  %3467 = vmatmul.mubr.msk.bf16.vlgmr.msra.gmra.mxu0 %vm518_vm0, %v4041_v28 }
  0x66   :  { %1051 = vmatpush1.bf16.msra.mxu1 %v3441_v63  ;;  %938 = vmatprep.mubr.bf16.mxu1 %v3950_v6 }
  0x67   :  { %1052 = vmatprep.subr.bf16.mxu1 %v3426_v0  ;;  %1011 = vmatprep.mubr.bf16.mxu0 %v3950_v6 }
  0x6a   :  { %1053 = vmatpush1.bf16.msra.mxu1 %v3425_v3 }
  0x6b   :  { %1054 = vmatprep.subr.bf16.mxu1 %v3410_v4 }
  0x6d   :  { %3464 = vmatmul.mubr.msk.bf16.gmra.mxu1 %vm518_vm0, %v4081_v46  ;;  %3468 = vmatmul.mubr.msk.bf16.gmra.mxu0 %vm518_vm0, %v4081_v46 }
  0x6e   :  { %948 = vmatprep.mubr.bf16.mxu1 %v3950_v6  ;;  %1021 = vmatprep.mubr.bf16.mxu0 %v3950_v6 }
  0x6f   :  { %1055 = vmatpush1.bf16.msra.mxu1 %v3409_v8 }
  0x70   :  { %1056 = vmatprep.subr.bf16.mxu1 %v3394_v9 }
  0x73   :  { %1057 = vmatpush1.bf16.msra.mxu1 %v3393_v10 }
  0x75   :  { %3465 = vmatmul.mubr.msk.bf16.gmra.mxu1 %vm518_vm0, %v4036_v27  ;;  %3469 = vmatmul.mubr.msk.bf16.gmra.mxu0 %vm518_vm0, %v4036_v27 }
  0x76   :  { %958 = vmatprep.mubr.bf16.mxu1 %v3950_v6  ;;  %1031 = vmatprep.mubr.bf16.mxu0 %v3950_v6 }
  0x7d   :  { %3466 = vmatmul.mubr.msk.bf16.gmra.mxu1 %vm518_vm0, %v4076_v45  ;;  %3470 = vmatmul.mubr.msk.bf16.gmra.mxu0 %vm518_vm0, %v4076_v45 }
  0x7e   :  { %1074 = vmatprep.mubr.bf16.mxu1 %v3950_v6 }
  0x85   :  { %3471 = vmatmul.mubr.msk.bf16.vlgmr.msra.gmra.mxu1 %vm518_vm0, %v4041_v28 }
  0x86   :  { %1084 = vmatprep.mubr.bf16.mxu1 %v3950_v6 }
  0x8d   :  { %3472 = vmatmul.mubr.msk.bf16.gmra.mxu1 %vm518_vm0, %v4081_v46 }
  0x8e   :  { %1094 = vmatprep.mubr.bf16.mxu1 %v3950_v6 }
  0x95   :  { %3473 = vmatmul.mubr.msk.bf16.gmra.mxu1 %vm518_vm0, %v4036_v27 }
  0x96   :  { %1104 = vmatprep.mubr.bf16.mxu1 %v3950_v6  ;;  %v100_v6 = vsub.s32 0, %v4295_v15 }
  0x9d   :  { %3474 = vmatmul.mubr.msk.bf16.gmra.mxu1 %vm518_vm0, %v4076_v45  ;;  %v4305_v45 = vld [vmem:[%s6267_s2] sm:$0xff] }
  0x9e   :  { %v4317_v25 = vrot.slane %v4305_v45, %v100_v6  ;;  %v4324_v30 = vrot.slane %v4305_v45, %v104_v18  ;;  %v4332_v34 = vrot.slane %v4305_v45, %v108_v21  ;;  %v4337_v35 = vrot.slane %v4305_v45, %v116_v22 }
  0x9f   :  { %v4345_v39 = vrot.slane %v4305_v45, %v112_v26  ;;  %v4350_v40 = vrot.slane %v4305_v45, %v120_v29 }
  0xd5   :  { %v4291_v12 = vpop.f32.mrf.mxu1  ;;  %v565_v13 = vpop.f32.mrf.mxu0 }
  0xd6   :  { %v566_v33 = vadd.f32 %v565_v13, %v4317_v25 }
  0xd7   :  { %v4293_v28 = vpop.f32.mrf.mxu1  ;;  %v567_v14 = vpop.f32.mrf.mxu0 }
  0xd8   :  { %v568_v36 = vadd.f32 %v567_v14, %v4324_v30  ;;  %v1115_v44 = vmax.f32 %v566_v33, 0.0 }
  0xd9   :  { %v4297_v46 = vpop.f32.mrf.mxu1  ;;  %v569_v16 = vpop.f32.mrf.mxu0 }
  0xda   :  { %v570_v41 = vadd.f32 %v569_v16, %v4317_v25  ;;  %v1116_v49 = vmax.f32 %v568_v36, 0.0 }
  0xdb   :  { %v4299_v17 = vpop.f32.mrf.mxu1  ;;  %v571_v27 = vpop.f32.mrf.mxu0 }
  0xdc   :  { %v572_v50 = vadd.f32 %v571_v27, %v4324_v30  ;;  %v1131_v57 = vmax.f32 %v570_v41, 0.0 }
  0xdd   :  { %v4308_v19 = vpop.f32.mrf.mxu1  ;;  %v575_v20 = vpop.f32.mrf.mxu0 }
  0xde   :  { %v576_v58 = vadd.f32 %v575_v20, %v4317_v25  ;;  %v1132_v1 = vmax.f32 %v572_v50, 0.0 }
  0xdf   :  { %v4312_v23 = vpop.f32.mrf.mxu1  ;;  %v577_v24 = vpop.f32.mrf.mxu0 }
  0xe0   :  { %v578_v2 = vadd.f32 %v577_v24, %v4324_v30  ;;  %v1147_v11 = vmax.f32 %v576_v58, 0.0 }
  0xe1   :  { %v4326_v31 = vpop.f32.mrf.mxu1  ;;  %v579_v32 = vpop.f32.mrf.mxu0 }
  0xe2   :  { %v580_v13 = vadd.f32 %v579_v32, %v4317_v25 }
  0xe3   :  { %v4340_v37 = vpop.f32.mrf.mxu1  ;;  %v581_v38 = vpop.f32.mrf.mxu0 }
  0xe5   :  { %v638_v42 = vpop.f32.mrf.mxu1  ;;  %v711_v43 = vpop.f32.mrf.mxu0 }
  0xe6   :  { %v639_v47 = vadd.f32 %v638_v42, %v4332_v34  ;;  %v712_v48 = vadd.f32 %v711_v43, %v4337_v35  ;;  %v1148_v42 = vmax.f32 %v578_v2, 0.0  ;;  %v582_v43 = vadd.f32 %v581_v38, %v4324_v30 }
  0xe7   :  { %v640_v51 = vpop.f32.mrf.mxu1  ;;  %v713_v52 = vpop.f32.mrf.mxu0 }
  0xe8   :  { %v1117_v53 = vmax.f32 %v639_v47, 0.0  ;;  %v641_v54 = vadd.f32 %v640_v51, %v4345_v39  ;;  %v1119_v55 = vmax.f32 %v712_v48, 0.0  ;;  %v714_v56 = vadd.f32 %v713_v52, %v4350_v40 }
  0xe9   :  { %v642_v59 = vpop.f32.mrf.mxu1  ;;  %v715_v60 = vpop.f32.mrf.mxu0 }
  0xea   :  { %v1243_v61 = vadd.f32 %v1117_v53, %v1115_v44  ;;  %v1118_v62 = vmax.f32 %v641_v54, 0.0  ;;  %v643_v63 = vadd.f32 %v642_v59, %v4332_v34  ;;  %v1120_v0 = vmax.f32 %v714_v56, 0.0 }
  0xeb   :  { %v644_v3 = vpop.f32.mrf.mxu1  ;;  %v716_v4 = vadd.f32 %v715_v60, %v4337_v35  ;;  %v717_v5 = vpop.f32.mrf.mxu0  ;;  %v1163_v53 = vmax.f32 %v580_v13, 0.0 }
  0xec   :  { %v1244_v7 = vadd.f32 %v1118_v62, %v1116_v49  ;;  %v4362_v8 = vadd.f32 %v1243_v61, %v1119_v55  ;;  %v1133_v9 = vmax.f32 %v643_v63, 0.0  ;;  %v645_v10 = vadd.f32 %v644_v3, %v4345_v39 }
  0xed   :  { %v1135_v14 = vmax.f32 %v716_v4, 0.0  ;;  %v648_v16 = vpop.f32.mrf.mxu1  ;;  %v718_v27 = vadd.f32 %v717_v5, %v4350_v40  ;;  %v721_v20 = vpop.f32.mrf.mxu0  ;;  %v586_v61 = vadd.f32 %v4291_v12, %v4317_v25  ;;  %v1164_v62 = vmax.f32 %v582_v43, 0.0 }
  0xee   :  { %v1245_v33 = vadd.f32 %v1133_v9, %v1131_v57  ;;  %v4367_v24 = vadd.f32 %v1244_v7, %v1120_v0  ;;  %v1134_v36 = vmax.f32 %v645_v10, 0.0  ;;  %v649_v41 = vadd.f32 %v648_v16, %v4332_v34 }
  0xef   :  { %v1136_v44 = vmax.f32 %v718_v27, 0.0  ;;  %v650_v47 = vpop.f32.mrf.mxu1  ;;  %v722_v48 = vadd.f32 %v721_v20, %v4337_v35  ;;  %v723_v49 = vpop.f32.mrf.mxu0  ;;  %v588_v9 = vadd.f32 %v4293_v28, %v4324_v30 }
  0xf0   :  { %v1246_v32 = vadd.f32 %v1134_v36, %v1132_v1  ;;  %v4372_v50 = vadd.f32 %v1245_v33, %v1135_v14  ;;  %v1149_v51 = vmax.f32 %v649_v41, 0.0  ;;  %v651_v52 = vadd.f32 %v650_v47, %v4345_v39 }
  0xf1   :  { %v1151_v54 = vmax.f32 %v722_v48, 0.0  ;;  %v652_v55 = vpop.f32.mrf.mxu1  ;;  %v724_v56 = vadd.f32 %v723_v49, %v4350_v40  ;;  %v725_v57 = vpop.f32.mrf.mxu0  ;;  %v1179_v33 = vmax.f32 %v586_v61, 0.0  ;;  %v590_v36 = vadd.f32 %v4297_v46, %v4317_v25 }
  0xf2   :  { %v1247_v58 = vadd.f32 %v1149_v51, %v1147_v11  ;;  %v4376_v59 = vadd.f32 %v1246_v32, %v1136_v44  ;;  %v1150_v38 = vmax.f32 %v651_v52, 0.0  ;;  %v653_v60 = vadd.f32 %v652_v55, %v4332_v34 }
  0xf3   :  { %v1152_v63 = vmax.f32 %v724_v56, 0.0  ;;  %v654_v0 = vpop.f32.mrf.mxu1  ;;  %v726_v1 = vadd.f32 %v725_v57, %v4337_v35  ;;  %v727_v2 = vpop.f32.mrf.mxu0  ;;  %v1180_v32 = vmax.f32 %v588_v9, 0.0  ;;  %v592_v51 = vadd.f32 %v4299_v17, %v4324_v30 }
  0xf4   :  { %v1248_v3 = vadd.f32 %v1150_v38, %v1148_v42  ;;  %v4382_v4 = vadd.f32 %v1247_v58, %v1151_v54  ;;  %v1165_v5 = vmax.f32 %v653_v60, 0.0  ;;  %v655_v7 = vadd.f32 %v654_v0, %v4345_v39 }
  0xf5   :  { %v1167_v10 = vmax.f32 %v726_v1, 0.0  ;;  %v658_v11 = vpop.f32.mrf.mxu1  ;;  %v728_v13 = vadd.f32 %v727_v2, %v4350_v40  ;;  %v731_v12 = vpop.f32.mrf.mxu0  ;;  %v1195_v38 = vmax.f32 %v590_v36, 0.0  ;;  %v596_v60 = vadd.f32 %v4308_v19, %v4317_v25 }
  0xf6   :  { %v1249_v14 = vadd.f32 %v1165_v5, %v1163_v53  ;;  %v4388_v16 = vadd.f32 %v1248_v3, %v1152_v63  ;;  %v1166_v27 = vmax.f32 %v655_v7, 0.0  ;;  %v659_v20 = vadd.f32 %v658_v11, %v4332_v34 }
  0xf7   :  { %v1168_v41 = vmax.f32 %v728_v13, 0.0  ;;  %v660_v42 = vpop.f32.mrf.mxu1  ;;  %v732_v43 = vadd.f32 %v731_v12, %v4337_v35  ;;  %v733_v28 = vpop.f32.mrf.mxu0  ;;  %v1196_v5 = vmax.f32 %v592_v51, 0.0  ;;  %v598_v7 = vadd.f32 %v4312_v23, %v4324_v30 }
  0xf8   :  { %v1250_v44 = vadd.f32 %v1166_v27, %v1164_v62  ;;  %v4394_v47 = vadd.f32 %v1249_v14, %v1167_v10  ;;  %v1181_v48 = vmax.f32 %v659_v20, 0.0  ;;  %v661_v49 = vadd.f32 %v660_v42, %v4345_v39 }
  0xf9   :  { %v1183_v52 = vmax.f32 %v732_v43, 0.0  ;;  %v662_v53 = vpop.f32.mrf.mxu1  ;;  %v734_v54 = vadd.f32 %v733_v28, %v4350_v40  ;;  %v735_v46 = vpop.f32.mrf.mxu0  ;;  %v124_v19 = vsub.s32 6, %v4295_v15  ;;  %v1211_v20 = vmax.f32 %v596_v60, 0.0 }
  0xfa   :  { %v1251_v55 = vadd.f32 %v1181_v48, %v1179_v33  ;;  %v4400_v56 = vadd.f32 %v1250_v44, %v1168_v41  ;;  %v1182_v57 = vmax.f32 %v661_v49, 0.0  ;;  %v663_v58 = vadd.f32 %v662_v53, %v4332_v34 }
  0xfb   :  { %v1184_v61 = vmax.f32 %v734_v54, 0.0  ;;  %v664_v62 = vpop.f32.mrf.mxu1  ;;  %v736_v63 = vadd.f32 %v735_v46, %v4337_v35  ;;  %v4406_v17 = vpop.f32.mrf.mxu0  ;;  %v600_v33 = vadd.f32 %v4326_v31, %v4317_v25  ;;  %v6271_v23 = vsub.s32 7, %v4295_v15 }
  0xfc   :  { %v1252_v0 = vadd.f32 %v1182_v57, %v1180_v32  ;;  %v4408_v1 = vadd.f32 %v1251_v55, %v1183_v52  ;;  %v1197_v2 = vmax.f32 %v663_v58, 0.0  ;;  %v665_v3 = vadd.f32 %v664_v62, %v4345_v39 }
  0xfd   :  { %v1199_v9 = vmax.f32 %v736_v63, 0.0  ;;  %v668_v10 = vpop.f32.mrf.mxu1  ;;  %v4413_v11 = vpop.f32.mrf.mxu0  ;;  %v1212_v48 = vmax.f32 %v598_v7, 0.0  ;;  %v4434_v25 = vrot.slane %v4305_v45, %v124_v19  ;;  %v602_v31 = vadd.f32 %v4340_v37, %v4324_v30 }
  0xfe   :  { %v1253_v13 = vadd.f32 %v1197_v2, %v1195_v38  ;;  %v4416_v12 = vadd.f32 %v1252_v0, %v1184_v61  ;;  %v1198_v14 = vmax.f32 %v665_v3, 0.0  ;;  %v669_v27 = vadd.f32 %v668_v10, %v4332_v34 }
  0xff   :  { %v670_v36 = vpop.f32.mrf.mxu1  ;;  %v4421_v41 = vpop.f32.mrf.mxu0  ;;  %v4446_v55 = vrot.slane %v4305_v45, %v6271_v23  ;;  %v1227_v57 = vmax.f32 %v600_v33, 0.0  ;;  %v1228_v61 = vmax.f32 %v602_v31, 0.0 }
 0x100   :  { %v4424_v42 = vadd.f32 %v1198_v14, %v1196_v5  ;;  %v4426_v43 = vadd.f32 %v1253_v13, %v1199_v9  ;;  %v1213_v28 = vmax.f32 %v669_v27, 0.0  ;;  %v671_v44 = vadd.f32 %v670_v36, %v4345_v39 }
 0x101   :  { %v672_v49 = vpop.f32.mrf.mxu1  ;;  %v4429_v32 = vpop.f32.mrf.mxu0 }
 0x102   :  { %v4438_v51 = vadd.f32 %v1213_v28, %v1211_v20  ;;  %v1214_v52 = vmax.f32 %v671_v44, 0.0  ;;  %v673_v53 = vadd.f32 %v672_v49, %v4332_v34 }
 0x103   :  { %v674_v54 = vpop.f32.mrf.mxu1  ;;  %v4441_v46 = vpop.f32.mrf.mxu0 }
 0x104   :  { %v4448_v58 = vadd.f32 %v1214_v52, %v1212_v48  ;;  %v1229_v38 = vmax.f32 %v673_v53, 0.0  ;;  %v675_v60 = vadd.f32 %v674_v54, %v4345_v39 }
 0x105   :  { %v784_v30 = vpop.f32.mrf.mxu1  ;;  %v4451_v37 = vpop.f32.mrf.mxu0 }
 0x106   :  { %v4453_v62 = vadd.f32 %v1229_v38, %v1227_v57  ;;  %v1230_v34 = vmax.f32 %v675_v60, 0.0  ;;  %v785_v63 = vadd.f32 %v784_v30, %v4434_v25 }
 0x107   :  { %v786_v0 = vpop.f32.mrf.mxu1  ;;  %v4456_v2 = vpop.f32.mrf.mxu0 }
 0x108   :  { %v4458_v45 = vadd.f32 %v1230_v34, %v1228_v61  ;;  %v1121_v3 = vmax.f32 %v785_v63, 0.0  ;;  %v787_v5 = vadd.f32 %v786_v0, %v4446_v55 }
 0x109   :  { %v788_v7 = vpop.f32.mrf.mxu1  ;;  %v4461_v9 = vpop.f32.mrf.mxu0 }
 0x10a   :  { %v4464_v39 = vadd.f32 %v4362_v8, %v1121_v3  ;;  %v1122_v10 = vmax.f32 %v787_v5, 0.0  ;;  %v789_v13 = vadd.f32 %v788_v7, %v4434_v25 }
 0x10b   :  { %v790_v14 = vpop.f32.mrf.mxu1  ;;  %v4467_v27 = vpop.f32.mrf.mxu0 }
 0x10c   :  { %v4470_v20 = vadd.f32 %v4367_v24, %v1122_v10  ;;  %v1137_v33 = vmax.f32 %v789_v13, 0.0  ;;  %v791_v36 = vadd.f32 %v790_v14, %v4446_v55 }
 0x10d   :  { %v794_v28 = vpop.f32.mrf.mxu1  ;;  %v4473_v44 = vpop.f32.mrf.mxu0 }
 0x10e   :  { %v4476_v48 = vadd.f32 %v4372_v50, %v1137_v33  ;;  %v1138_v8 = vmax.f32 %v791_v36, 0.0  ;;  %v795_v49 = vadd.f32 %v794_v28, %v4434_v25 }
 0x10f   :  { %v796_v31 = vpop.f32.mrf.mxu1  ;;  %v4479_v52 = vpop.f32.mrf.mxu0 }
 0x110   :  { %v4482_v53 = vadd.f32 %v4376_v59, %v1138_v8  ;;  %v1153_v24 = vmax.f32 %v795_v49, 0.0  ;;  %v797_v54 = vadd.f32 %v796_v31, %v4446_v55 }
 0x111   :  { %v798_v57 = vpop.f32.mrf.mxu1  ;;  %v4485_v38 = vpop.f32.mrf.mxu0 }
 0x112   :  { %v4488_v60 = vadd.f32 %v4382_v4, %v1153_v24  ;;  %v1154_v50 = vmax.f32 %v797_v54, 0.0  ;;  %v799_v30 = vadd.f32 %v798_v57, %v4434_v25 }
 0x113   :  { %v800_v61 = vpop.f32.mrf.mxu1  ;;  %v4491_v34 = vpop.f32.mrf.mxu0 }
 0x114   :  { %v4494_v63 = vadd.f32 %v4388_v16, %v1154_v50  ;;  %v1169_v59 = vmax.f32 %v799_v30, 0.0  ;;  %v801_v0 = vadd.f32 %v800_v61, %v4446_v55 }
 0x115   :  { %v804_v3 = vpop.f32.mrf.mxu1  ;;  %v4497_v5 = vpop.f32.mrf.mxu0 }
 0x116   :  { %v4500_v7 = vadd.f32 %v4394_v47, %v1169_v59  ;;  %v1170_v4 = vmax.f32 %v801_v0, 0.0  ;;  %v805_v10 = vadd.f32 %v804_v3, %v4434_v25  ;;  %v95_v47 = vld [vmem:[%s6267_s2 + $0x8] sm:$0xff] }
 0x117   :  { %v806_v13 = vpop.f32.mrf.mxu1  ;;  %v4503_v14 = vpop.f32.mrf.mxu0  ;;  %v4525_v30 = vrot.slane %v95_v47, %v100_v6  ;;  %v4533_v0 = vrot.slane %v95_v47, %v104_v18  ;;  %v744_v6 = vadd.f32 %v4421_v41, %v4350_v40  ;;  %v748_v18 = vadd.f32 %v4441_v46, %v4350_v40 }
 0x118   :  { %v4506_v33 = vadd.f32 %v4400_v56, %v1170_v4  ;;  %v1185_v16 = vmax.f32 %v805_v10, 0.0  ;;  %v807_v36 = vadd.f32 %v806_v13, %v4446_v55  ;;  %v742_v10 = vadd.f32 %v4413_v11, %v4337_v35 }
 0x119   :  { %v808_v28 = vpop.f32.mrf.mxu1  ;;  %v4509_v8 = vpop.f32.mrf.mxu0  ;;  %v4554_v11 = vrot.slane %v95_v47, %v108_v21  ;;  %v4558_v41 = vrot.slane %v95_v47, %v112_v26  ;;  %v862_v46 = vadd.f32 %v4461_v9, %v4525_v30  ;;  %v864_v21 = vadd.f32 %v4467_v27, %v4533_v0 }
 0x11a   :  { %v4515_v49 = vadd.f32 %v4408_v1, %v1185_v16  ;;  %v1186_v31 = vmax.f32 %v807_v36, 0.0  ;;  %v809_v24 = vadd.f32 %v808_v28, %v4434_v25  ;;  %v738_v1 = vadd.f32 %v4406_v17, %v4350_v40 }
 0x11b   :  { %v810_v54 = vpop.f32.mrf.mxu1  ;;  %v4518_v57 = vpop.f32.mrf.mxu0  ;;  %v746_v17 = vadd.f32 %v4429_v32, %v4337_v35  ;;  %v4562_v35 = vrot.slane %v95_v47, %v116_v22  ;;  %v860_v40 = vadd.f32 %v4456_v2, %v4533_v0  ;;  %v4574_v22 = vrot.slane %v95_v47, %v120_v29 }
 0x11c   :  { %v4521_v56 = vadd.f32 %v4416_v12, %v1186_v31  ;;  %v1201_v50 = vmax.f32 %v809_v24, 0.0  ;;  %v3951_v12 = vmov 1983009808   ;;  %v1200_v32 = vmax.f32 %v738_v1, 0.0 }
 0x11d   :  { %v814_v61 = vpop.f32.mrf.mxu1  ;;  %v4527_v59 = vpop.f32.mrf.mxu0  ;;  %v1374_v4 = vunpack.c.l.s4 %v3951_v12  ;;  %v1215_v31 = vmax.f32 %v742_v10, 0.0  ;;  %v1216_v24 = vmax.f32 %v744_v6, 0.0  ;;  %6318 = vst [vmem:[#allocation6_spill] sm:$0xff] %v4574_v22  ;;  %v1231_v1 = vmax.f32 %v746_v17, 0.0 }
 0x11e   :  { %v4536_v3 = vadd.f32 %v4426_v43, %v1201_v50  ;;  %v858_v43 = vadd.f32 %v4451_v37, %v4525_v30  ;;  %v1232_v12 = vmax.f32 %v748_v18, 0.0  ;;  %v868_v2 = vadd.f32 %v4473_v44, %v4525_v30 }
 0x11f   :  { %v816_v13 = vpop.f32.mrf.mxu1  ;;  %v4542_v16 = vpop.f32.mrf.mxu0  ;;  %v1375_v37 = vunpack.c.0.s8 %v1374_v4  ;;  %v870_v9 = vadd.f32 %v4479_v52, %v4533_v0  ;;  %v872_v10 = vadd.f32 %v4485_v38, %v4525_v30  ;;  %v4586_v23 = vrot.slane %v95_v47, %v124_v19 }
 0x120   :  { %6317 = vst [vmem:[#allocation5_spill] sm:$0xff] %v4536_v3  ;;  %v1123_v4 = vmax.f32 %v858_v43, 0.0  ;;  %v6321_v29 = vsub.s32 7, %v4295_v15  ;;  %v1270_v44 = vadd.f32 %v4424_v42, %v1200_v32  ;;  %v1124_v18 = vmax.f32 %v860_v40, 0.0 }
 0x121   :  { %v818_v36 = vpop.f32.mrf.mxu1  ;;  %v4550_v28 = vpop.f32.mrf.mxu0  ;;  %6320 = vst [vmem:[#allocation8_spill] sm:$0xff] %v4586_v23  ;;  %v1139_v22 = vmax.f32 %v862_v46, 0.0  ;;  %v4594_v52 = vsub.s32 %v1375_v37, %v4295_v15  ;;  %v1271_v38 = vadd.f32 %v4438_v51, %v1215_v31  ;;  %v1272_v43 = vadd.f32 %v4448_v58, %v1216_v24 }
 0x122   :  { %v4590_v17 = vrot.slane %v95_v47, %v6321_v29  ;;  %v1140_v3 = vmax.f32 %v864_v21, 0.0  ;;  %v874_v19 = vadd.f32 %v4491_v34, %v4533_v0  ;;  %v1273_v47 = vadd.f32 %v4453_v62, %v1231_v1 }
 0x123   :  { %v820_v50 = vpop.f32.mrf.mxu1  ;;  %v4570_v26 = vpop.f32.mrf.mxu0  ;;  %v1274_v42 = vadd.f32 %v4458_v45, %v1232_v12  ;;  %v1155_v32 = vmax.f32 %v868_v2, 0.0  ;;  %v1156_v40 = vmax.f32 %v870_v9, 0.0  ;;  %v4605_v15 = vadd.f32 %v4464_v39, %v1123_v4 }
 0x124   :  { %v1171_v46 = vmax.f32 %v872_v10, 0.0  ;;  %v878_v51 = vadd.f32 %v4497_v5, %v4525_v30  ;;  %v811_v58 = vadd.f32 %v810_v54, %v4446_v55  ;;  %v4613_v31 = vadd.f32 %v4470_v20, %v1124_v18 }
 0x125   :  { %v930_v27 = vpop.f32.mrf.mxu1  ;;  %v4582_v6 = vpop.f32.mrf.mxu0  ;;  %v4616_v62 = vadd.f32 %v4476_v48, %v1139_v22  ;;  %v815_v45 = vadd.f32 %v814_v61, %v4434_v25  ;;  %v817_v39 = vadd.f32 %v816_v13, %v4446_v55  ;;  %v4621_v24 = vadd.f32 %v4482_v53, %v1140_v3 }
 0x126   :  { %6319 = vst [vmem:[#allocation7_spill] sm:$0xff] %v4582_v6  ;;  %v1172_v21 = vmax.f32 %v874_v19, 0.0  ;;  %v880_v5 = vadd.f32 %v4503_v14, %v4533_v0  ;;  %v819_v54 = vadd.f32 %v818_v36, %v4434_v25  ;;  %v4629_v20 = vadd.f32 %v4488_v60, %v1155_v32 }
 0x127   :  { %v932_v23 = vpop.f32.mrf.mxu1  ;;  %v4600_v6 = vpop.f32.mrf.mxu0  ;;  %v4632_v48 = vadd.f32 %v4494_v63, %v1156_v40  ;;  %v882_v61 = vadd.f32 %v4509_v8, %v4525_v30  ;;  %v821_v53 = vadd.f32 %v820_v50, %v4446_v55  ;;  %v4638_v3 = vadd.f32 %v4500_v7, %v1171_v46 }
 0x128   :  { %v1187_v14 = vmax.f32 %v878_v51, 0.0  ;;  %v1202_v13 = vmax.f32 %v811_v58, 0.0  ;;  %v884_v25 = vadd.f32 %v4518_v57, %v4533_v0  ;;  %v1217_v60 = vmax.f32 %v815_v45, 0.0 }
 0x129   :  { %v934_v37 = vpop.f32.mrf.mxu1  ;;  %v4610_v34 = vpop.f32.mrf.mxu0  ;;  %v1218_v2 = vmax.f32 %v817_v39, 0.0  ;;  %v888_v63 = vadd.f32 %v4527_v59, %v4525_v30  ;;  %v890_v8 = vadd.f32 %v4542_v16, %v4533_v0  ;;  %v4649_v55 = vadd.f32 %v4506_v33, %v1172_v21 }
 0x12a   :  { %v1188_v7 = vmax.f32 %v880_v5, 0.0  ;;  %v1233_v50 = vmax.f32 %v819_v54, 0.0  ;;  %v892_v9 = vadd.f32 %v4550_v28, %v4525_v30  ;;  %v1203_v10 = vmax.f32 %v882_v61, 0.0 }
 0x12b   :  { %v936_v1 = vpop.f32.mrf.mxu1  ;;  %v4626_v12 = vpop.f32.mrf.mxu0  ;;  %v1234_v29 = vmax.f32 %v821_v53, 0.0  ;;  %v894_v18 = vadd.f32 %v4570_v26, %v4533_v0  ;;  %v931_v59 = vadd.f32 %v930_v27, %v4554_v11  ;;  %v4657_v19 = vadd.f32 %v4515_v49, %v1187_v14 }
 0x12c   :  { %v1286_v16 = vadd.f32 %v1270_v44, %v1202_v13  ;;  %v1204_v33 = vmax.f32 %v884_v25, 0.0  ;;  %v933_v32 = vadd.f32 %v932_v23, %v4558_v41  ;;  %v1287_v51 = vadd.f32 %v1271_v38, %v1217_v60  ;;  %v6323_v44 = vld [vmem:[#allocation5_spill] sm:$0xff] }
 0x12d   :  { %v940_v36 = vpop.f32.mrf.mxu1  ;;  %v4642_v22 = vpop.f32.mrf.mxu0  ;;  %v1288_v30 = vadd.f32 %v1272_v43, %v1218_v2  ;;  %v1219_v28 = vmax.f32 %v888_v63, 0.0  ;;  %v1220_v58 = vmax.f32 %v890_v8, 0.0  ;;  %v4661_v45 = vadd.f32 %v4521_v56, %v1188_v7  ;;  %v6322_v26 = vld [vmem:[#allocation7_spill] sm:$0xff]  ;;  %v6324_v56 = vld [vmem:[#allocation6_spill] sm:$0xff] }
 0x12e   :  { %v1289_v39 = vadd.f32 %v1273_v47, %v1233_v50  ;;  %v1235_v0 = vmax.f32 %v892_v9, 0.0  ;;  %v1004_v27 = vadd.f32 %v6322_v26, %v4562_v35  ;;  %v4666_v5 = vadd.f32 %v6323_v44, %v1203_v10 }
 0x12f   :  { %v942_v57 = vpop.f32.mrf.mxu1  ;;  %v1015_v4 = vpop.f32.mrf.mxu0  ;;  %v1290_v23 = vadd.f32 %v1274_v42, %v1234_v29  ;;  %v1236_v54 = vmax.f32 %v894_v18, 0.0  ;;  %v1125_v61 = vmax.f32 %v931_v59, 0.0  ;;  %v4668_v38 = vadd.f32 %v1286_v16, %v1204_v33 }
 0x130   :  { %v1126_v43 = vmax.f32 %v933_v32, 0.0  ;;  %v935_v53 = vadd.f32 %v934_v37, %v4554_v11  ;;  %v1006_v47 = vadd.f32 %v4600_v6, %v6324_v56  ;;  %v4673_v25 = vadd.f32 %v1287_v51, %v1219_v28 }
 0x131   :  { %v944_v40 = vpop.f32.mrf.mxu1  ;;  %v1017_v46 = vpop.f32.mrf.mxu0  ;;  %v4675_v60 = vadd.f32 %v1288_v30, %v1220_v58  ;;  %v937_v2 = vadd.f32 %v936_v1, %v4558_v41  ;;  %v941_v42 = vadd.f32 %v940_v36, %v4554_v11  ;;  %v4679_v63 = vadd.f32 %v1289_v39, %v1235_v0 }
 0x132   :  { %v1127_v8 = vmax.f32 %v1004_v27, 0.0  ;;  %v943_v7 = vadd.f32 %v942_v57, %v4558_v41  ;;  %v945_v37 = vadd.f32 %v944_v40, %v4554_v11  ;;  %v4683_v6 = vadd.f32 %v1290_v23, %v1236_v54 }
 0x133   :  { %v946_v49 = vpop.f32.mrf.mxu1  ;;  %v1019_v21 = vpop.f32.mrf.mxu0  ;;  %v1307_v10 = vadd.f32 %v4605_v15, %v1125_v61  ;;  %v1008_v29 = vadd.f32 %v4610_v34, %v4562_v35  ;;  %v1308_v36 = vadd.f32 %v4613_v31, %v1126_v43  ;;  %v1141_v18 = vmax.f32 %v935_v53, 0.0 }
 0x134   :  { %v947_v1 = vadd.f32 %v946_v49, %v4558_v41  ;;  %v1128_v59 = vmax.f32 %v1006_v47, 0.0  ;;  %v1142_v32 = vmax.f32 %v937_v2, 0.0  ;;  %v1157_v40 = vmax.f32 %v941_v42, 0.0 }
 0x135   :  { %v950_v14 = vpop.f32.mrf.mxu1  ;;  %v1023_v13 = vpop.f32.mrf.mxu0  ;;  %v1010_v51 = vadd.f32 %v4626_v12, %v6324_v56  ;;  %v1014_v15 = vadd.f32 %v4642_v22, %v4562_v35  ;;  %v1158_v30 = vmax.f32 %v943_v7, 0.0  ;;  %v1173_v34 = vmax.f32 %v945_v37, 0.0 }
 0x136   :  { %v951_v16 = vadd.f32 %v950_v14, %v4554_v11  ;;  %v1016_v28 = vadd.f32 %v1015_v4, %v6324_v56  ;;  %v1018_v31 = vadd.f32 %v1017_v46, %v4562_v35  ;;  %v4697_v0 = vadd.f32 %v1307_v10, %v1127_v8 }
 0x137   :  { %v952_v50 = vpop.f32.mrf.mxu1  ;;  %v1025_v9 = vpop.f32.mrf.mxu0  ;;  %v1143_v26 = vmax.f32 %v1008_v29, 0.0  ;;  %v1174_v27 = vmax.f32 %v947_v1, 0.0  ;;  %v1020_v49 = vadd.f32 %v1019_v21, %v6324_v56  ;;  %v1309_v44 = vadd.f32 %v4616_v62, %v1141_v18 }
 0x138   :  { %v1189_v12 = vmax.f32 %v951_v16, 0.0  ;;  %v953_v23 = vadd.f32 %v952_v50, %v4558_v41  ;;  %v1024_v22 = vadd.f32 %v1023_v13, %v4562_v35  ;;  %v1310_v4 = vadd.f32 %v4621_v24, %v1142_v32 }
 0x139   :  { %v954_v57 = vpop.f32.mrf.mxu1  ;;  %v1027_v33 = vpop.f32.mrf.mxu0  ;;  %v1311_v46 = vadd.f32 %v4629_v20, %v1157_v40  ;;  %v1144_v43 = vmax.f32 %v1010_v51, 0.0  ;;  %v1159_v53 = vmax.f32 %v1014_v15, 0.0  ;;  %v1312_v47 = vadd.f32 %v4632_v48, %v1158_v30 }
 0x13a   :  { %v1313_v14 = vadd.f32 %v4638_v3, %v1173_v34  ;;  %v1160_v21 = vmax.f32 %v1016_v28, 0.0  ;;  %v1175_v2 = vmax.f32 %v1018_v31, 0.0  ;;  %v1314_v8 = vadd.f32 %v4649_v55, %v1174_v27 }
 0x13b   :  { %v956_v58 = vpop.f32.mrf.mxu1  ;;  %v1029_v39 = vpop.f32.mrf.mxu0  ;;  %v1176_v7 = vmax.f32 %v1020_v49, 0.0  ;;  %v955_v13 = vadd.f32 %v954_v57, %v4554_v11  ;;  %v1026_v37 = vadd.f32 %v1025_v9, %v6324_v56  ;;  %v1324_v24 = vadd.f32 %v1308_v36, %v1128_v59  ;;  %v6325_v49 = vld [vmem:[#allocation8_spill] sm:$0xff] }
 0x13c   :  { %v1315_v20 = vadd.f32 %v4657_v19, %v1189_v12  ;;  %v1190_v50 = vmax.f32 %v953_v23, 0.0  ;;  %v1191_v10 = vmax.f32 %v1024_v22, 0.0  ;;  %v4711_v48 = vadd.f32 %v1309_v44, %v1143_v26 }
 0x13d   :  { %v960_v54 = vpop.f32.mrf.mxu1  ;;  %v1033_v61 = vpop.f32.mrf.mxu0  ;;  %v4713_v3 = vadd.f32 %v1310_v4, %v1144_v43  ;;  %v957_v1 = vadd.f32 %v956_v58, %v4558_v41  ;;  %v1028_v18 = vadd.f32 %v1027_v33, %v4562_v35  ;;  %v4717_v16 = vadd.f32 %v1311_v46, %v1159_v53 }
 0x13e   :  { %v4719_v57 = vadd.f32 %v1312_v47, %v1160_v21  ;;  %v961_v9 = vadd.f32 %v960_v54, %v4554_v11  ;;  %v4723_v59 = vadd.f32 %v1313_v14, %v1175_v2  ;;  %v4725_v32 = vadd.f32 %v1314_v8, %v1176_v7 }
 0x13f   :  { %v962_v62 = vpop.f32.mrf.mxu1  ;;  %v1035_v42 = vpop.f32.mrf.mxu0  ;;  %v1205_v40 = vmax.f32 %v955_v13, 0.0  ;;  %v1192_v51 = vmax.f32 %v1026_v37, 0.0  ;;  %v1316_v15 = vadd.f32 %v4661_v45, %v1190_v50  ;;  %v4728_v30 = vadd.f32 %v1315_v20, %v1191_v10 }
 0x140   :  { %v963_v19 = vadd.f32 %v962_v62, %v4558_v41  ;;  %v1206_v31 = vmax.f32 %v957_v1, 0.0  ;;  %v1207_v58 = vmax.f32 %v1028_v18, 0.0  ;;  %v1030_v26 = vadd.f32 %v1029_v39, %v6324_v56 }
 0x141   :  { %v964_v29 = vpop.f32.mrf.mxu1  ;;  %v1037_v55 = vpop.f32.mrf.mxu0  ;;  %v1221_v12 = vmax.f32 %v961_v9, 0.0  ;;  %v1034_v22 = vadd.f32 %v1033_v61, %v4562_v35  ;;  %v1036_v45 = vadd.f32 %v1035_v42, %v6324_v56  ;;  %v1317_v4 = vadd.f32 %v4666_v5, %v1205_v40 }
 0x142   :  { %v965_v33 = vadd.f32 %v964_v29, %v4554_v11  ;;  %v1222_v23 = vmax.f32 %v963_v19, 0.0  ;;  %v1038_v11 = vadd.f32 %v1037_v55, %v4562_v35  ;;  %v4739_v43 = vadd.f32 %v1316_v15, %v1192_v51 }
 0x143   :  { %v966_v36 = vpop.f32.mrf.mxu1  ;;  %v1039_v27 = vpop.f32.mrf.mxu0  ;;  %v1318_v21 = vadd.f32 %v4668_v38, %v1206_v31  ;;  %v1208_v61 = vmax.f32 %v1030_v26, 0.0  ;;  %v1319_v5 = vadd.f32 %v4673_v25, %v1221_v12  ;;  %v1223_v42 = vmax.f32 %v1034_v22, 0.0  ;;  %v2427_v26 = vld [vmem:[%s6268_s3 + $0xf8] sm:$0xff] }
 0x144   :  { %v967_v34 = vadd.f32 %v966_v36, %v4558_v41  ;;  %v1237_v39 = vmax.f32 %v965_v33, 0.0  ;;  %v1040_v47 = vadd.f32 %v1039_v27, %v6324_v56  ;;  %v1320_v35 = vadd.f32 %v4675_v60, %v1222_v23  ;;  %v3490_v33 = vld [vmem:[%s6268_s3 + $0x178] sm:$0xff]  ;;  %3703 = vmatprep.subr.mxu1 %v2427_v26 }
 0x145   :  { %v1076_v28 = vpop.f32.mrf.mxu1  ;;  %v1224_v8 = vmax.f32 %v1036_v45, 0.0  ;;  %v1239_v13 = vmax.f32 %v1038_v11, 0.0  ;;  %v4750_v18 = vadd.f32 %v1317_v4, %v1207_v58  ;;  %v4752_v9 = vadd.f32 %v1318_v21, %v1208_v61  ;;  %v2411_v22 = vld [vmem:[%s6268_s3 + $0x78] sm:$0xff]  ;;  %v2410_v21 = vld [vmem:[%s6268_s3 + $0x70] sm:$0xff] }
 0x146   :  { %v1077_v44 = vadd.f32 %v1076_v28, %v6325_v49  ;;  %v1238_v53 = vmax.f32 %v967_v34, 0.0  ;;  %v1321_v38 = vadd.f32 %v4679_v63, %v1237_v39  ;;  %v1240_v10 = vmax.f32 %v1040_v47, 0.0  ;;  %v3506_v63 = vld [vmem:[%s6268_s3 + $0x1f8] sm:$0xff]  ;;  %3704 = vmatpush3.msra.mxu1 %v2411_v22 }
 0x147   :  { %v1078_v54 = vpop.f32.mrf.mxu1  ;;  %v4754_v19 = vadd.f32 %v1319_v5, %v1223_v42  ;;  %3668 = vmatprep.subr.mxu0 %v3506_v63  ;;  %v2425_v42 = vld [vmem:[%s6268_s3 + $0xe8] sm:$0xff]  ;;  %v3486_v63 = vld [vmem:[%s6268_s3 + $0x158] sm:$0xff] }
 0x148   :  { %v1129_v41 = vmax.f32 %v1077_v44, 0.0  ;;  %v1079_v46 = vadd.f32 %v1078_v54, %v4590_v17  ;;  %v1322_v50 = vadd.f32 %v4683_v6, %v1238_v53  ;;  %v4771_v34 = vadd.f32 %v1321_v38, %v1239_v13  ;;  %3669 = vmatpush3.msra.mxu0 %v3490_v33 }
 0x149   :  { %v1080_v14 = vpop.f32.mrf.mxu1 }
 0x14a   :  { %v1130_v2 = vmax.f32 %v1079_v46, 0.0  ;;  %v1081_v62 = vadd.f32 %v1080_v14, %v6325_v49  ;;  %v1339_v37 = vadd.f32 %v4697_v0, %v1129_v41  ;;  %v4756_v0 = vadd.f32 %v1320_v35, %v1224_v8  ;;  %v3504_v41 = vld [vmem:[%s6268_s3 + $0x1e8] sm:$0xff]  ;;  %v2426_v46 = vld [vmem:[%s6268_s3 + $0xf0] sm:$0xff]  ;;  %v3503_v35 = vld [vmem:[%s6268_s3 + $0x1e0] sm:$0xff] }
 0x14b   :  { %v1082_v7 = vpop.f32.mrf.mxu1  ;;  %v4773_v28 = vadd.f32 %v1322_v50, %v1240_v10  ;;  %3705 = vmatprep.subr.mxu1 %v2426_v46  ;;  %v3500_v46 = vld [vmem:[%s6268_s3 + $0x1c8] sm:$0xff] }
 0x14c   :  { %v1340_v20 = vadd.f32 %v1324_v24, %v1130_v2  ;;  %v1083_v56 = vadd.f32 %v1082_v7, %v4590_v17  ;;  %v1145_v29 = vmax.f32 %v1081_v62, 0.0  ;;  %3706 = vmatpush3.msra.mxu1 %v2410_v21  ;;  %v3484_v21 = vld [vmem:[%s6268_s3 + $0x148] sm:$0xff] }
 0x14d   :  { %v1086_v1 = vpop.f32.mrf.mxu1  ;;  %3707 = vmatprep.subr.mxu1 %v2425_v42 }
 0x14e   :  { %v1371_v25 = vcombine.low %v1339_v37, %v1340_v20  ;;  %v1372_v60 = vcombine.high %v1339_v37, %v1340_v20  ;;  %v1146_v55 = vmax.f32 %v1083_v56, 0.0  ;;  %v1087_v24 = vadd.f32 %v1086_v1, %v6325_v49  ;;  %v3487_v20 = vld [vmem:[%s6268_s3 + $0x160] sm:$0xff]  ;;  %v2409_v56 = vld [vmem:[%s6268_s3 + $0x68] sm:$0xff]  ;;  %v3502_v1 = vld [vmem:[%s6268_s3 + $0x1d8] sm:$0xff] }
 0x14f   :  { %v1088_v36 = vpop.f32.mrf.mxu1  ;;  %v1341_v31 = vadd.f32 %v4711_v48, %v1145_v29  ;;  %v3489_v48 = vld [vmem:[%s6268_s3 + $0x170] sm:$0xff]  ;;  %3708 = vmatpush3.msra.mxu1 %v2409_v56 }
 0x150   :  { %v1379_v6 = vrot.slane %v1371_v25, %v4594_v52  ;;  %v1386_v40 = vrot.slane %v1372_v60, %v4594_v52  ;;  %v1342_v51 = vadd.f32 %v4713_v3, %v1146_v55  ;;  %v4766_v15 = vadd.f32 %v1088_v36, %v4590_v17  ;;  %v3505_v3 = vld [vmem:[%s6268_s3 + $0x1f0] sm:$0xff]  ;;  %v2424_v25 = vld [vmem:[%s6268_s3 + $0xe0] sm:$0xff] }
 0x151   :  { %v1161_v58 = vmax.f32 %v1087_v24, 0.0  ;;  %3670 = vmatprep.subr.mxu0 %v3505_v3  ;;  %3709 = vmatprep.subr.mxu1 %v2424_v25  ;;  %v2423_v3 = vld [vmem:[%s6268_s3 + $0xd8] sm:$0xff] }
 0x152   :  { %v1387_v27 = vcombine.high %v1379_v6, %v1379_v6  ;;  %v1388_v44 = vcombine.high %v1386_v40, %v1386_v40  ;;  %v1521_v12 = vrot.slane %v1379_v6, %v4594_v52  ;;  %v1537_v23 = vrot.slane %v1386_v40, %v4594_v52  ;;  %3671 = vmatpush3.msra.mxu0 %v3489_v48  ;;  %v2408_v6 = vld [vmem:[%s6268_s3 + $0x60] sm:$0xff]  ;;  %v2407_v48 = vld [vmem:[%s6268_s3 + $0x58] sm:$0xff] }
 0x153   :  { %v1389_v45 = vcombine.low %v1341_v31, %v1342_v51  ;;  %v1390_v54 = vcombine.high %v1341_v31, %v1342_v51  ;;  %v4791_v4 = vadd.f32 %v4717_v16, %v1161_v58  ;;  %v1162_v11 = vmax.f32 %v4766_v15, 0.0  ;;  %v3488_v16 = vld [vmem:[%s6268_s3 + $0x168] sm:$0xff]  ;;  %3672 = vmatprep.subr.mxu0 %v3504_v41  ;;  %v3501_v58 = vld [vmem:[%s6268_s3 + $0x1d0] sm:$0xff]  ;;  %3710 = vmatpush3.msra.mxu1 %v2408_v6 }
 0x154   :  { %v1522_v39 = vcombine.high %v1521_v12, %v1521_v12  ;;  %v1529_v53 = vrot.slane %v1387_v27, %v4594_v52  ;;  %v1538_v47 = vcombine.high %v1537_v23, %v1537_v23  ;;  %v1545_v14 = vrot.slane %v1388_v44, %v4594_v52  ;;  %3673 = vmatpush3.msra.mxu0 %v3488_v16 }
 0x155   :  { %v1836_v61 = vsel %vm1835_vm1, %v1521_v12, 0.0  ;;  %v1864_v2 = vsel %vm1835_vm1, %v1537_v23, 0.0  ;;  %v4811_v62 = vrot.slane %v1389_v45, %v4594_v52  ;;  %v4814_v5 = vrot.slane %v1390_v54, %v4594_v52  ;;  %3674 = vmatprep.subr.mxu0 %v3503_v35  ;;  %v3485_v23 = vld [vmem:[%s6268_s3 + $0x150] sm:$0xff]  ;;  %3711 = vmatprep.subr.mxu1 %v2423_v3 }
 0x156   :  { %v1530_v8 = vcombine.high %v1529_v53, %v1529_v53  ;;  %v1546_v7 = vcombine.high %v1545_v14, %v1545_v14  ;;  %v1837_v13 = vrot.slane %v1836_v61, 4  ;;  %v1843_v37 = vsel %vm1835_vm1, %v1522_v39, 0.0  ;;  %3675 = vmatpush3.msra.mxu0 %v3487_v20  ;;  %v2422_v39 = vld [vmem:[%s6268_s3 + $0xd0] sm:$0xff]  ;;  %3712 = vmatpush3.msra.mxu1 %v2407_v48 }
 0x157   :  { %v1844_v38 = vrot.slane %v1843_v37, 4  ;;  %v1850_v50 = vsel %vm1835_vm1, %v1529_v53, 0.0  ;;  %v1865_v10 = vrot.slane %v1864_v2, 4  ;;  %v1871_v29 = vsel %vm1835_vm1, %v1538_v47, 0.0  ;;  %3676 = vmatprep.subr.mxu0 %v3502_v1  ;;  %3713 = vmatprep.subr.mxu1 %v2422_v39 }
 0x158   :  { %v1838_v60 = vadd.f32 %v1837_v13, %v1836_v61  ;;  %v1851_v55 = vrot.slane %v1850_v50, 4  ;;  %v1857_v24 = vsel %vm1835_vm1, %v1530_v8, 0.0  ;;  %v1872_v36 = vrot.slane %v1871_v29, 4  ;;  %3677 = vmatpush3.msra.mxu0 %v3486_v63  ;;  %v2406_v61 = vld [vmem:[%s6268_s3 + $0x50] sm:$0xff]  ;;  %v2421_v13 = vld [vmem:[%s6268_s3 + $0xc8] sm:$0xff] }
 0x159   :  { %v1845_v40 = vadd.f32 %v1844_v38, %v1843_v37  ;;  %v1858_v51 = vrot.slane %v1857_v24, 4  ;;  %v1866_v33 = vadd.f32 %v1865_v10, %v1864_v2  ;;  %v1878_v31 = vsel %vm1835_vm1, %v1545_v14, 0.0  ;;  %3678 = vmatprep.subr.mxu0 %v3501_v58  ;;  %3714 = vmatpush3.msra.mxu1 %v2406_v61  ;;  %v2405_v10 = vld [vmem:[%s6268_s3 + $0x48] sm:$0xff] }
 0x15a   :  { %v1839_v26 = vrot.slane %v1838_v60, 2  ;;  %v1852_v27 = vadd.f32 %v1851_v55, %v1850_v50  ;;  %v1873_v44 = vadd.f32 %v1872_v36, %v1871_v29  ;;  %v1879_v12 = vrot.slane %v1878_v31, 4  ;;  %3679 = vmatpush3.msra.mxu0 %v3485_v23  ;;  %v3483_v50 = vld [vmem:[%s6268_s3 + $0x140] sm:$0xff]  ;;  %3715 = vmatprep.subr.mxu1 %v2421_v13  ;;  %v3498_v55 = vld [vmem:[%s6268_s3 + $0x1b8] sm:$0xff] }
 0x15b   :  { %v1846_v22 = vrot.slane %v1845_v40, 2  ;;  %v1859_v45 = vadd.f32 %v1858_v51, %v1857_v24  ;;  %v1867_v54 = vrot.slane %v1866_v33, 2  ;;  %v1885_v41 = vsel %vm1835_vm1, %v1546_v7, 0.0  ;;  %3680 = vmatprep.subr.mxu0 %v3500_v46  ;;  %v3499_v7 = vld [vmem:[%s6268_s3 + $0x1c0] sm:$0xff]  ;;  %3716 = vmatpush3.msra.mxu1 %v2405_v10  ;;  %v3482_v51 = vld [vmem:[%s6268_s3 + $0x138] sm:$0xff] }
 0x15c   :  { %v1840_v53 = vadd.f32 %v1839_v26, %v1838_v60  ;;  %v1853_v47 = vrot.slane %v1852_v27, 2  ;;  %v1874_v14 = vrot.slane %v1873_v44, 2  ;;  %v1880_v16 = vadd.f32 %v1879_v12, %v1878_v31  ;;  %3681 = vmatpush3.msra.mxu0 %v3484_v21  ;;  %v2420_v24 = vld [vmem:[%s6268_s3 + $0xc0] sm:$0xff] }
 0x15d   :  { %v1847_v2 = vadd.f32 %v1846_v22, %v1845_v40  ;;  %v1860_v35 = vrot.slane %v1859_v45, 2  ;;  %v1868_v42 = vadd.f32 %v1867_v54, %v1866_v33  ;;  %v1886_v8 = vrot.slane %v1885_v41, 4  ;;  %3682 = vmatprep.subr.mxu0 %v3499_v7  ;;  %v2404_v33 = vld [vmem:[%s6268_s3 + $0x40] sm:$0xff]  ;;  %3717 = vmatprep.subr.mxu1 %v2420_v24  ;;  %v2403_v54 = vld [vmem:[%s6268_s3 + $0x38] sm:$0xff]  ;;  %v2417_v7 = vld [vmem:[%s6268_s3 + $0xa8] sm:$0xff] }
 0x15e   :  { %v1841_v37 = vrot.slane %v1840_v53, 1  ;;  %v1854_v20 = vadd.f32 %v1853_v47, %v1852_v27  ;;  %v1875_v56 = vadd.f32 %v1874_v14, %v1873_v44  ;;  %v1881_v38 = vrot.slane %v1880_v16, 2  ;;  %3683 = vmatpush3.msra.mxu0 %v3483_v50  ;;  %v3497_v27 = vld [vmem:[%s6268_s3 + $0x1b0] sm:$0xff]  ;;  %v2419_v44 = vld [vmem:[%s6268_s3 + $0xb8] sm:$0xff]  ;;  %3718 = vmatpush3.msra.mxu1 %v2404_v33  ;;  %v3496_v47 = vld [vmem:[%s6268_s3 + $0x1a8] sm:$0xff] }
 0x15f   :  { %v1848_v29 = vrot.slane %v1847_v2, 1  ;;  %v1861_v1 = vadd.f32 %v1860_v35, %v1859_v45  ;;  %v1869_v25 = vrot.slane %v1868_v42, 1  ;;  %v1887_v60 = vadd.f32 %v1886_v8, %v1885_v41  ;;  %3684 = vmatprep.subr.mxu0 %v3498_v55  ;;  %v3481_v45 = vld [vmem:[%s6268_s3 + $0x130] sm:$0xff]  ;;  %3719 = vmatprep.subr.mxu1 %v2419_v44  ;;  %v3495_v8 = vld [vmem:[%s6268_s3 + $0x1a0] sm:$0xff]  ;;  %v2401_v50 = vld [vmem:[%s6268_s3 + $0x28] sm:$0xff] }
 0x160   :  { %v1842_v36 = vadd.f32 %v1841_v37, %v1840_v53  ;;  %v1855_v63 = vrot.slane %v1854_v20, 1  ;;  %v1876_v6 = vrot.slane %v1875_v56, 1  ;;  %v1882_v40 = vadd.f32 %v1881_v38, %v1880_v16  ;;  %3685 = vmatpush3.msra.mxu0 %v3482_v51  ;;  %v2418_v14 = vld [vmem:[%s6268_s3 + $0xb0] sm:$0xff]  ;;  %v3480_v16 = vld [vmem:[%s6268_s3 + $0x128] sm:$0xff]  ;;  %3720 = vmatpush3.msra.mxu1 %v2403_v54  ;;  %v3479_v38 = vld [vmem:[%s6268_s3 + $0x120] sm:$0xff] }
 0x161   :  { %v1849_v31 = vadd.f32 %v1848_v29, %v1847_v2  ;;  %v1862_v58 = vrot.slane %v1861_v1, 1  ;;  %v1870_v3 = vadd.f32 %v1869_v25, %v1868_v42  ;;  %v1888_v26 = vrot.slane %v1887_v60, 2  ;;  %3686 = vmatprep.subr.mxu0 %v3497_v27  ;;  %v2402_v42 = vld [vmem:[%s6268_s3 + $0x30] sm:$0xff]  ;;  %3721 = vmatprep.subr.mxu1 %v2418_v14  ;;  %v3494_v25 = vld [vmem:[%s6268_s3 + $0x198] sm:$0xff] }
 0x162   :  { %v1856_v12 = vadd.f32 %v1855_v63, %v1854_v20  ;;  %v1877_v23 = vadd.f32 %v1876_v6, %v1875_v56  ;;  %v1883_v48 = vrot.slane %v1882_v40, 1  ;;  %v4900_v22 = vmul.f32 0.0625, %v1842_v36  ;;  %3687 = vmatpush3.msra.mxu0 %v3481_v45  ;;  %3722 = vmatpush3.msra.mxu1 %v2402_v42  ;;  %v2400_v6 = vld [vmem:[%s6268_s3 + $0x20] sm:$0xff]  ;;  %v2414_v14 = vld [vmem:[%s6268_s3 + $0x90] sm:$0xff] }
 0x163   :  { %v1863_v41 = vadd.f32 %v1862_v58, %v1861_v1  ;;  %v1889_v46 = vadd.f32 %v1888_v26, %v1887_v60  ;;  %v4908_v39 = vmul.f32 0.0625, %v1849_v31  ;;  %v4910_v53 = vmul.f32 0.0625, %v1870_v3  ;;  %3688 = vmatprep.subr.mxu0 %v3496_v47  ;;  %v2416_v60 = vld [vmem:[%s6268_s3 + $0xa0] sm:$0xff]  ;;  %3723 = vmatprep.subr.mxu1 %v2417_v7  ;;  %v3493_v58 = vld [vmem:[%s6268_s3 + $0x190] sm:$0xff]  ;;  %v2415_v3 = vld [vmem:[%s6268_s3 + $0x98] sm:$0xff] }
 0x164   :  { %6326 = vst [vmem:[#allocation7_spill] sm:$0xff] %v4900_v22  ;;  %v1884_v21 = vadd.f32 %v1883_v48, %v1882_v40  ;;  %v4921_v61 = vmul.f32 0.0625, %v1856_v12  ;;  %v4923_v2 = vmul.f32 0.0625, %v1877_v23  ;;  %v1405_v35 = vcombine.high %v4811_v62, %v4811_v62  ;;  %3689 = vmatpush3.msra.mxu0 %v3480_v16  ;;  %3724 = vmatpush3.msra.mxu1 %v2401_v50  ;;  %v3477_v23 = vld [vmem:[%s6268_s3 + $0x110] sm:$0xff]  ;;  %v2399_v48 = vld [vmem:[%s6268_s3 + $0x18] sm:$0xff]  ;;  %v3492_v47 = vld [vmem:[%s6268_s3 + $0x188] sm:$0xff]  ;;  %v5012_v50 = vpop.f32.mrf.mxu1 }
 0x165   :  { %6327 = vst [vmem:[#allocation5_spill] sm:$0xff] %v4910_v53  ;;  %v1890_v13 = vrot.slane %v1889_v46, 1  ;;  %v4936_v37 = vmul.f32 0.0625, %v1863_v41  ;;  %v1406_v20 = vcombine.high %v4814_v5, %v4814_v5  ;;  %v1553_v56 = vrot.slane %v4811_v62, %v4594_v52  ;;  %3690 = vmatprep.subr.mxu0 %v3495_v8  ;;  %3725 = vmatprep.subr.mxu1 %v2416_v60  ;;  %v3476_v8 = vld [vmem:[%s6268_s3 + $0x108] sm:$0xff]  ;;  %v2398_v7 = vld [vmem:[%s6268_s3 + $0x10] sm:$0xff] }
 0x166   :  { %6328 = vst [vmem:[#allocation6_spill] sm:$0xff] %v4921_v61  ;;  %6329 = vst [vmem:[#allocation8_spill] sm:$0xff] %v4923_v2  ;;  %v4948_v10 = vmul.f32 0.0625, %v1884_v21  ;;  %v4952_v29 = vmax.f32 %v4900_v22, %v4921_v61  ;;  %v1561_v1 = vrot.slane %v1405_v35, %v4594_v52  ;;  %v1569_v62 = vrot.slane %v4814_v5, %v4594_v52  ;;  %v3478_v5 = vld [vmem:[%s6268_s3 + $0x118] sm:$0xff] }
 0x167   :  { %v1891_v55 = vadd.f32 %v1890_v13, %v1889_v46  ;;  %v1554_v24 = vcombine.high %v1553_v56, %v1553_v56  ;;  %v1577_v36 = vrot.slane %v1406_v20, %v4594_v52  ;;  %v1892_v63 = vsel %vm1835_vm1, %v1553_v56, 0.0  ;;  %3691 = vmatpush3.msra.mxu0 %v3479_v38  ;;  %3726 = vmatpush3.msra.mxu1 %v2400_v6 }
 0x168   :  { %6330 = vst [vmem:[#allocation9_spill] sm:$0xff] %v4948_v10  ;;  %v4973_v40 = vmax.f32 %v4910_v53, %v4948_v10  ;;  %v1562_v51 = vcombine.high %v1561_v1, %v1561_v1  ;;  %v1570_v33 = vcombine.high %v1569_v62, %v1569_v62  ;;  %v1893_v31 = vrot.slane %v1892_v63, 4  ;;  %3692 = vmatprep.subr.mxu0 %v3494_v25 }
 0x169   :  { %v4981_v26 = vmul.f32 0.0625, %v1891_v55  ;;  %v1578_v27 = vcombine.high %v1577_v36, %v1577_v36  ;;  %v1899_v44 = vsel %vm1835_vm1, %v1554_v24, 0.0  ;;  %v1906_v12 = vsel %vm1835_vm1, %v1561_v1, 0.0  ;;  %3693 = vmatpush3.msra.mxu0 %v3478_v5  ;;  %3727 = vmatprep.subr.mxu1 %v2415_v3  ;;  %v3491_v1 = vld [vmem:[%s6268_s3 + $0x180] sm:$0xff]  ;;  %v2397_v5 = vld [vmem:[%s6268_s3 + $0x8] sm:$0xff] }
 0x16a   :  { %6331 = vst [vmem:[#allocation10_spill] sm:$0xff] %v4973_v40  ;;  %v1894_v54 = vadd.f32 %v1893_v31, %v1892_v63  ;;  %v1900_v41 = vrot.slane %v1899_v44, 4  ;;  %v1907_v46 = vrot.slane %v1906_v12, 4  ;;  %v1913_v21 = vsel %vm1835_vm1, %v1562_v51, 0.0  ;;  %3694 = vmatprep.subr.mxu0 %v3493_v58  ;;  %3728 = vmatpush3.msra.mxu1 %v2399_v48  ;;  %v3475_v63 = vld [vmem:[%s6268_s3 + $0x100] sm:$0xff] }
 0x16b   :  { %6332 = vst [vmem:[#allocation11_spill] sm:$0xff] %v4981_v26  ;;  %v5001_v16 = vmax.f32 %v4923_v2, %v4981_v26  ;;  %v1920_v35 = vsel %vm1835_vm1, %v1569_v62, 0.0  ;;  %v1927_v42 = vsel %vm1835_vm1, %v1570_v33, 0.0  ;;  %v1914_v38 = vrot.slane %v1913_v21, 4  ;;  %3695 = vmatpush3.msra.mxu0 %v3477_v23  ;;  %v2413_v62 = vld [vmem:[%s6268_s3 + $0x88] sm:$0xff]  ;;  %3729 = vmatprep.subr.mxu1 %v2414_v14 }
 0x16c   :  { %v1895_v13 = vrot.slane %v1894_v54, 2  ;;  %v1901_v20 = vadd.f32 %v1900_v41, %v1899_v44  ;;  %v1908_v56 = vadd.f32 %v1907_v46, %v1906_v12  ;;  %v1921_v25 = vrot.slane %v1920_v35, 4  ;;  %3696 = vmatprep.subr.mxu0 %v3492_v47  ;;  %3730 = vmatpush3.msra.mxu1 %v2398_v7  ;;  %v1092_v41 = vpop.f32.mrf.mxu1 }
 0x16d   :  { %v1928_v60 = vrot.slane %v1927_v42, 4  ;;  %v1934_v55 = vsel %vm1835_vm1, %v1577_v36, 0.0  ;;  %v1941_v24 = vsel %vm1835_vm1, %v1578_v27, 0.0  ;;  %v1915_v31 = vadd.f32 %v1914_v38, %v1913_v21  ;;  %3697 = vmatpush3.msra.mxu0 %v3476_v8  ;;  %3731 = vmatprep.subr.mxu1 %v2413_v62 }
 0x16e   :  { %v1896_v6 = vadd.f32 %v1895_v13, %v1894_v54  ;;  %v1902_v51 = vrot.slane %v1901_v20, 2  ;;  %v1909_v33 = vrot.slane %v1908_v56, 2  ;;  %v1922_v58 = vadd.f32 %v1921_v25, %v1920_v35  ;;  %3698 = vmatprep.subr.mxu0 %v3491_v1  ;;  %3732 = vmatpush3.msra.mxu1 %v2397_v5 }
 0x16f   :  { %v1929_v36 = vadd.f32 %v1928_v60, %v1927_v42  ;;  %v1935_v3 = vrot.slane %v1934_v55, 4  ;;  %v1942_v27 = vrot.slane %v1941_v24, 4  ;;  %v1916_v48 = vrot.slane %v1915_v31, 2  ;;  %3699 = vmatpush3.msra.mxu0 %v3475_v63  ;;  %v1096_v60 = vpop.f32.mrf.mxu1 }
 0x170   :  { %v1897_v44 = vrot.slane %v1896_v6, 1  ;;  %v1903_v12 = vadd.f32 %v1902_v51, %v1901_v20  ;;  %v1910_v23 = vadd.f32 %v1909_v33, %v1908_v56  ;;  %v1923_v46 = vrot.slane %v1922_v58, 2 }
 0x171   :  { %v1930_v54 = vrot.slane %v1929_v36, 2  ;;  %v1936_v47 = vadd.f32 %v1935_v3, %v1934_v55  ;;  %v1943_v14 = vadd.f32 %v1942_v27, %v1941_v24  ;;  %v1917_v35 = vadd.f32 %v1916_v48, %v1915_v31  ;;  %v2412_v55 = vld [vmem:[%s6268_s3 + $0x80] sm:$0xff]  ;;  %v3538_v24 = vld [vmem:[%s6268_s3 + $0x2f8] sm:$0xff] }
 0x172   :  { %v1898_v21 = vadd.f32 %v1897_v44, %v1896_v6  ;;  %v1904_v8 = vrot.slane %v1903_v12, 1  ;;  %v1911_v7 = vrot.slane %v1910_v23, 1  ;;  %v1924_v42 = vadd.f32 %v1923_v46, %v1922_v58  ;;  %3733 = vmatprep.subr.mxu1 %v2412_v55  ;;  %3738 = vmatprep.subr.mxu0 %v3538_v24 }
 0x173   :  { %v1931_v13 = vadd.f32 %v1930_v54, %v1929_v36  ;;  %v1937_v38 = vrot.slane %v1936_v47, 2  ;;  %v1944_v1 = vrot.slane %v1943_v14, 2  ;;  %v1918_v20 = vrot.slane %v1917_v35, 1 }
 0x174   :  { %v1905_v62 = vadd.f32 %v1904_v8, %v1903_v12  ;;  %v1912_v25 = vadd.f32 %v1911_v7, %v1910_v23  ;;  %v5028_v56 = vmul.f32 0.0625, %v1898_v21  ;;  %v1925_v63 = vrot.slane %v1924_v42, 1 }
 0x175   :  { %v1932_v5 = vrot.slane %v1931_v13, 1  ;;  %v1938_v51 = vadd.f32 %v1937_v38, %v1936_v47  ;;  %v1945_v33 = vadd.f32 %v1944_v1, %v1943_v14  ;;  %v1919_v6 = vadd.f32 %v1918_v20, %v1917_v35  ;;  %v1098_v47 = vpop.f32.mrf.mxu1 }
 0x176   :  { %6333 = vst [vmem:[#allocation12_spill] sm:$0xff] %v5028_v56  ;;  %v5036_v31 = vmul.f32 0.0625, %v1905_v62  ;;  %v5038_v58 = vmul.f32 0.0625, %v1912_v25  ;;  %v1344_v36 = vadd.f32 %v4719_v57, %v1162_v11  ;;  %v1926_v3 = vadd.f32 %v1925_v63, %v1924_v42 }
 0x177   :  { %v1933_v27 = vadd.f32 %v1932_v5, %v1931_v13  ;;  %v1939_v44 = vrot.slane %v1938_v51, 1  ;;  %v1946_v12 = vrot.slane %v1945_v33, 1  ;;  %v5043_v23 = vmul.f32 0.0625, %v1919_v6 }
 0x178   :  { %6334 = vst [vmem:[#allocation13_spill] sm:$0xff] %v5038_v58  ;;  %v5047_v48 = vmax.f32 %v5028_v56, %v5038_v58  ;;  %v1407_v46 = vcombine.low %v4791_v4, %v1344_v36  ;;  %v1408_v54 = vcombine.high %v4791_v4, %v1344_v36  ;;  %v5051_v57 = vmul.f32 0.0625, %v1926_v3  ;;  %v2396_v4 = vld [vmem:[%s6268_s3] sm:$0xff] }
 0x179   :  { %v1940_v15 = vadd.f32 %v1939_v44, %v1938_v51  ;;  %v1947_v14 = vadd.f32 %v1946_v12, %v1945_v33  ;;  %v5053_v11 = vmul.f32 0.0625, %v1933_v27  ;;  %v1091_v7 = vadd.f32 %v5012_v50, %v6325_v49  ;;  %3734 = vmatpush3.msra.mxu1 %v2396_v4 }
 0x17a   :  { %6335 = vst [vmem:[#allocation14_spill] sm:$0xff] %v5051_v57  ;;  %v1415_v21 = vrot.slane %v1407_v46, %v4594_v52  ;;  %v1422_v8 = vrot.slane %v1408_v54, %v4594_v52  ;;  %v5060_v35 = vadd.f32 %v1092_v41, %v4590_v17  ;;  %v5070_v38 = vadd.f32 %v1096_v60, %v6325_v49 }
 0x17b   :  { %6336 = vst [vmem:[#allocation15_spill] sm:$0xff] %v5053_v11  ;;  %v5065_v42 = vmul.f32 0.0625, %v1940_v15  ;;  %v5067_v13 = vmul.f32 0.0625, %v1947_v14  ;;  %v5073_v1 = vadd.f32 %v1098_v47, %v4590_v17  ;;  %v1177_v60 = vmax.f32 %v1091_v7, 0.0 }
 0x17c   :  { %v1423_v62 = vcombine.high %v1415_v21, %v1415_v21  ;;  %v1424_v50 = vcombine.high %v1422_v8, %v1422_v8  ;;  %v1585_v41 = vrot.slane %v1415_v21, %v4594_v52  ;;  %v1601_v25 = vrot.slane %v1422_v8, %v4594_v52 }
 0x17d   :  { %6337 = vst [vmem:[#allocation16_spill] sm:$0xff] %v5065_v42  ;;  %6338 = vst [vmem:[#allocation17_spill] sm:$0xff] %v5067_v13  ;;  %v5079_v20 = vmax.f32 %v5051_v57, %v5065_v42  ;;  %v5083_v63 = vmax.f32 %v5053_v11, %v5067_v13  ;;  %v5093_v27 = vadd.f32 %v4723_v59, %v1177_v60 }
 0x17e   :  { %v1586_v51 = vcombine.high %v1585_v41, %v1585_v41  ;;  %v1593_v33 = vrot.slane %v1423_v62, %v4594_v52  ;;  %v1602_v55 = vcombine.high %v1601_v25, %v1601_v25  ;;  %v1609_v24 = vrot.slane %v1424_v50, %v4594_v52 }
 0x17f   :  { %6339 = vst [vmem:[#allocation18_spill] sm:$0xff] %v5079_v20  ;;  %v1948_v36 = vsel %vm1835_vm1, %v1585_v41, 0.0  ;;  %v1976_v3 = vsel %vm1835_vm1, %v1601_v25, 0.0 }
 0x180   :  { %v1594_v44 = vcombine.high %v1593_v33, %v1593_v33  ;;  %v1610_v12 = vcombine.high %v1609_v24, %v1609_v24  ;;  %v1949_v46 = vrot.slane %v1948_v36, 4  ;;  %v1955_v54 = vsel %vm1835_vm1, %v1586_v51, 0.0 }
 0x181   :  { %v1956_v47 = vrot.slane %v1955_v54, 4  ;;  %v1962_v15 = vsel %vm1835_vm1, %v1593_v33, 0.0  ;;  %v1977_v14 = vrot.slane %v1976_v3, 4  ;;  %v1983_v21 = vsel %vm1835_vm1, %v1602_v55, 0.0 }
 0x182   :  { %v1950_v8 = vadd.f32 %v1949_v46, %v1948_v36  ;;  %v1963_v7 = vrot.slane %v1962_v15, 4  ;;  %v1969_v4 = vsel %vm1835_vm1, %v1594_v44, 0.0  ;;  %v1984_v62 = vrot.slane %v1983_v21, 4 }
 0x183   :  { %v1957_v50 = vadd.f32 %v1956_v47, %v1955_v54  ;;  %v1970_v41 = vrot.slane %v1969_v4, 4  ;;  %v1978_v59 = vadd.f32 %v1977_v14, %v1976_v3  ;;  %v1990_v25 = vsel %vm1835_vm1, %v1609_v24, 0.0  ;;  %v1100_v3 = vpop.f32.mrf.mxu1 }
 0x184   :  { %v1951_v60 = vrot.slane %v1950_v8, 2  ;;  %v1964_v6 = vadd.f32 %v1963_v7, %v1962_v15  ;;  %v1985_v45 = vadd.f32 %v1984_v62, %v1983_v21  ;;  %v1991_v51 = vrot.slane %v1990_v25, 4 }
 0x185   :  { %v1958_v5 = vrot.slane %v1957_v50, 2  ;;  %v1971_v42 = vadd.f32 %v1970_v41, %v1969_v4  ;;  %v1979_v33 = vrot.slane %v1978_v59, 2  ;;  %v1997_v10 = vsel %vm1835_vm1, %v1610_v12, 0.0 }
 0x186   :  { %v1952_v55 = vadd.f32 %v1951_v60, %v1950_v8  ;;  %v1965_v36 = vrot.slane %v1964_v6, 2  ;;  %v1986_v46 = vrot.slane %v1985_v45, 2  ;;  %v1992_v57 = vadd.f32 %v1991_v51, %v1990_v25 }
 0x187   :  { %v1959_v44 = vadd.f32 %v1958_v5, %v1957_v50  ;;  %v1972_v53 = vrot.slane %v1971_v42, 2  ;;  %v1980_v54 = vadd.f32 %v1979_v33, %v1978_v59  ;;  %v1998_v47 = vrot.slane %v1997_v10, 4  ;;  %v3570_v5 = vld [vmem:[%s6268_s3 + $0x3f8] sm:$0xff] }
 0x188   :  { %v1953_v14 = vrot.slane %v1952_v55, 1  ;;  %v1966_v24 = vadd.f32 %v1965_v36, %v1964_v6  ;;  %v1987_v13 = vadd.f32 %v1986_v46, %v1985_v45  ;;  %v1993_v15 = vrot.slane %v1992_v57, 2  ;;  %v1102_v45 = vpop.f32.mrf.mxu1  ;;  %3773 = vmatprep.subr.mxu1 %v3570_v5 }
 0x189   :  { %v1960_v21 = vrot.slane %v1959_v44, 1  ;;  %v5101_v7 = vadd.f32 %v1972_v53, %v1971_v42  ;;  %v1981_v4 = vrot.slane %v1980_v54, 1  ;;  %v1999_v62 = vadd.f32 %v1998_v47, %v1997_v10 }
 0x18a   :  { %v1954_v41 = vadd.f32 %v1953_v14, %v1952_v55  ;;  %v1967_v12 = vrot.slane %v1966_v24, 1  ;;  %v1988_v8 = vrot.slane %v1987_v13, 1  ;;  %v1994_v60 = vadd.f32 %v1993_v15, %v1992_v57 }
 0x18b   :  { %v1961_v50 = vadd.f32 %v1960_v21, %v1959_v44  ;;  %v1982_v25 = vadd.f32 %v1981_v4, %v1980_v54  ;;  %v2000_v6 = vrot.slane %v1999_v62, 2  ;;  %v6342_v36 = vmax.f32 %v5060_v35, 0.0  ;;  %v1106_v4 = vpop.f32.mrf.mxu1 }
 0x18c   :  { %v1968_v51 = vadd.f32 %v1967_v12, %v1966_v24  ;;  %v1989_v53 = vadd.f32 %v1988_v8, %v1987_v13  ;;  %v1995_v42 = vrot.slane %v1994_v60, 1  ;;  %v5107_v33 = vmul.f32 0.0625, %v1954_v41 }
 0x18d   :  { %v2001_v10 = vadd.f32 %v2000_v6, %v1999_v62  ;;  %v5109_v55 = vmul.f32 0.0625, %v1961_v50  ;;  %v5111_v57 = vmul.f32 0.0625, %v1982_v25  ;;  %v1346_v46 = vadd.f32 %v4725_v32, %v6342_v36 }
 0x18e   :  { %6340 = vst [vmem:[#allocation19_spill] sm:$0xff] %v5107_v33  ;;  %v1996_v44 = vadd.f32 %v1995_v42, %v1994_v60  ;;  %v5116_v47 = vmul.f32 0.0625, %v1968_v51  ;;  %v5118_v54 = vmul.f32 0.0625, %v1989_v53  ;;  %v1193_v14 = vmax.f32 %v5070_v38, 0.0 }
 0x18f   :  { %6341 = vst [vmem:[#allocation20_spill] sm:$0xff] %v5111_v57  ;;  %v2002_v13 = vrot.slane %v2001_v10, 1  ;;  %v1425_v24 = vcombine.low %v5093_v27, %v1346_v46  ;;  %v1426_v15 = vcombine.high %v5093_v27, %v1346_v46  ;;  %v1194_v21 = vmax.f32 %v5073_v1, 0.0 }
 0x190   :  { %6343 = vst [vmem:[#allocation21_spill] sm:$0xff] %v5116_v47  ;;  %v5124_v62 = vmul.f32 0.0625, %v1996_v44  ;;  %v5128_v32 = vmax.f32 %v5107_v33, %v5116_v47  ;;  %v5131_v35 = vadd.f32 %v4728_v30, %v1193_v14  ;;  %v5134_v41 = vadd.f32 %v1100_v3, %v6325_v49 }
 0x191   :  { %v2003_v38 = vadd.f32 %v2002_v13, %v2001_v10  ;;  %v1433_v12 = vrot.slane %v1425_v24, %v4594_v52  ;;  %v1440_v27 = vrot.slane %v1426_v15, %v4594_v52  ;;  %v5139_v1 = vadd.f32 %v4739_v43, %v1194_v21 }
 0x192   :  { %6344 = vst [vmem:[#allocation22_spill] sm:$0xff] %v5124_v62  ;;  %v5143_v8 = vmax.f32 %v5111_v57, %v5124_v62  ;;  %v5147_v30 = vadd.f32 %v1102_v45, %v4590_v17  ;;  %v5150_v3 = vadd.f32 %v1106_v4, %v6325_v49 }
 0x193   :  { %v5152_v5 = vmul.f32 0.0625, %v2003_v38  ;;  %v1441_v50 = vcombine.high %v1433_v12, %v1433_v12  ;;  %v1442_v25 = vcombine.high %v1440_v27, %v1440_v27  ;;  %v1617_v6 = vrot.slane %v1433_v12, %v4594_v52 }
 0x194   :  { %6345 = vst [vmem:[#allocation23_spill] sm:$0xff] %v5143_v8  ;;  %v1633_v51 = vrot.slane %v1440_v27, %v4594_v52  ;;  %v1443_v53 = vcombine.low %v5131_v35, %v5139_v1  ;;  %v1444_v45 = vcombine.high %v5131_v35, %v5139_v1 }
 0x195   :  { %v1618_v42 = vcombine.high %v1617_v6, %v1617_v6  ;;  %v1625_v10 = vrot.slane %v1441_v50, %v4594_v52  ;;  %v1641_v36 = vrot.slane %v1442_v25, %v4594_v52  ;;  %v2004_v46 = vsel %vm1835_vm1, %v1617_v6, 0.0 }
 0x196   :  { %v1634_v44 = vcombine.high %v1633_v51, %v1633_v51  ;;  %v2005_v14 = vrot.slane %v2004_v46, 4  ;;  %v2032_v13 = vsel %vm1835_vm1, %v1633_v51, 0.0  ;;  %v1451_v24 = vrot.slane %v1443_v53, %v4594_v52 }
 0x197   :  { %v1626_v15 = vcombine.high %v1625_v10, %v1625_v10  ;;  %v1642_v21 = vcombine.high %v1641_v36, %v1641_v36  ;;  %v2011_v4 = vsel %vm1835_vm1, %v1618_v42, 0.0  ;;  %v2018_v38 = vsel %vm1835_vm1, %v1625_v10, 0.0 }
 0x198   :  { %v2006_v35 = vadd.f32 %v2005_v14, %v2004_v46  ;;  %v2012_v12 = vrot.slane %v2011_v4, 4  ;;  %v2019_v27 = vrot.slane %v2018_v38, 4  ;;  %v2033_v1 = vrot.slane %v2032_v13, 4 }
 0x199   :  { %v2025_v50 = vsel %vm1835_vm1, %v1626_v15, 0.0  ;;  %v2039_v25 = vsel %vm1835_vm1, %v1634_v44, 0.0  ;;  %v2046_v6 = vsel %vm1835_vm1, %v1641_v36, 0.0  ;;  %v2053_v51 = vsel %vm1835_vm1, %v1642_v21, 0.0 }
 0x19a   :  { %v2007_v43 = vrot.slane %v2006_v35, 2  ;;  %v2013_v53 = vadd.f32 %v2012_v12, %v2011_v4  ;;  %v2020_v59 = vadd.f32 %v2019_v27, %v2018_v38  ;;  %v2026_v60 = vrot.slane %v2025_v50, 4 }
 0x19b   :  { %v2034_v62 = vadd.f32 %v2033_v1, %v2032_v13  ;;  %v2040_v42 = vrot.slane %v2039_v25, 4  ;;  %v2047_v57 = vrot.slane %v2046_v6, 4  ;;  %v2054_v10 = vrot.slane %v2053_v51, 4 }
 0x19c   :  { %v2008_v46 = vadd.f32 %v2007_v43, %v2006_v35  ;;  %v2014_v14 = vrot.slane %v2013_v53, 2  ;;  %v2021_v26 = vrot.slane %v2020_v59, 2  ;;  %v2027_v47 = vadd.f32 %v2026_v60, %v2025_v50 }
 0x19d   :  { %v2035_v58 = vrot.slane %v2034_v62, 2  ;;  %v2041_v15 = vadd.f32 %v2040_v42, %v2039_v25  ;;  %v2048_v61 = vadd.f32 %v2047_v57, %v2046_v6  ;;  %v2055_v44 = vadd.f32 %v2054_v10, %v2053_v51 }
 0x19e   :  { %v2009_v11 = vrot.slane %v2008_v46, 1  ;;  %v5173_v36 = vadd.f32 %v2014_v14, %v2013_v53  ;;  %v2022_v21 = vadd.f32 %v2021_v26, %v2020_v59  ;;  %v2028_v2 = vrot.slane %v2027_v47, 2 }
 0x19f   :  { %v2036_v4 = vadd.f32 %v2035_v58, %v2034_v62  ;;  %v2042_v38 = vrot.slane %v2041_v15, 2  ;;  %v2049_v12 = vrot.slane %v2048_v61, 2  ;;  %v2056_v13 = vrot.slane %v2055_v44, 2 }
 0x1a0   :  { %v2010_v27 = vadd.f32 %v2009_v11, %v2008_v46  ;;  %v2023_v43 = vrot.slane %v2022_v21, 1  ;;  %v5176_v35 = vadd.f32 %v2028_v2, %v2027_v47  ;;  %v1458_v26 = vrot.slane %v1444_v45, %v4594_v52  ;;  %v1108_v11 = vpop.f32.mrf.mxu1 }
 0x1a1   :  { %v2037_v60 = vrot.slane %v2036_v4, 1  ;;  %v2043_v50 = vadd.f32 %v2042_v38, %v2041_v15  ;;  %v2050_v25 = vadd.f32 %v2049_v12, %v2048_v61  ;;  %v5178_v57 = vadd.f32 %v2056_v13, %v2055_v44 }
 0x1a2   :  { %v2024_v6 = vadd.f32 %v2023_v43, %v2022_v21  ;;  %v5180_v51 = vmul.f32 0.0625, %v2010_v27  ;;  %v1459_v58 = vcombine.high %v1451_v24, %v1451_v24  ;;  %v1460_v2 = vcombine.high %v1458_v26, %v1458_v26 }
 0x1a3   :  { %v2038_v59 = vadd.f32 %v2037_v60, %v2036_v4  ;;  %v2044_v62 = vrot.slane %v2043_v50, 1  ;;  %v2051_v53 = vrot.slane %v2050_v25, 1  ;;  %v1649_v47 = vrot.slane %v1451_v24, %v4594_v52 }
 0x1a4   :  { %6346 = vst [vmem:[#allocation24_spill] sm:$0xff] %v5180_v51  ;;  %v5184_v42 = vmul.f32 0.0625, %v2024_v6  ;;  %v1657_v61 = vrot.slane %v1459_v58, %v4594_v52  ;;  %v1665_v15 = vrot.slane %v1458_v26, %v4594_v52  ;;  %v1673_v4 = vrot.slane %v1460_v2, %v4594_v52 }
 0x1a5   :  { %v2045_v10 = vadd.f32 %v2044_v62, %v2043_v50  ;;  %v2052_v46 = vadd.f32 %v2051_v53, %v2050_v25  ;;  %v5188_v14 = vmul.f32 0.0625, %v2038_v59  ;;  %v1650_v44 = vcombine.high %v1649_v47, %v1649_v47 }
 0x1a6   :  { %6347 = vst [vmem:[#allocation25_spill] sm:$0xff] %v5184_v42  ;;  %v5193_v45 = vmax.f32 %v5180_v51, %v5184_v42  ;;  %v1658_v21 = vcombine.high %v1657_v61, %v1657_v61  ;;  %v1666_v24 = vcombine.high %v1665_v15, %v1665_v15  ;;  %v2060_v13 = vsel %vm1835_vm1, %v1649_v47, 0.0 }
 0x1a7   :  { %6348 = vst [vmem:[#allocation26_spill] sm:$0xff] %v5188_v14  ;;  %v5196_v38 = vmul.f32 0.0625, %v2045_v10  ;;  %v5198_v12 = vmul.f32 0.0625, %v2052_v46  ;;  %v1674_v27 = vcombine.high %v1673_v4, %v1673_v4  ;;  %v2061_v43 = vrot.slane %v2060_v13, 4 }
 0x1a8   :  { %v2067_v60 = vsel %vm1835_vm1, %v1650_v44, 0.0  ;;  %v2074_v50 = vsel %vm1835_vm1, %v1657_v61, 0.0  ;;  %v2081_v58 = vsel %vm1835_vm1, %v1658_v21, 0.0  ;;  %v2088_v53 = vsel %vm1835_vm1, %v1665_v15, 0.0 }
 0x1a9   :  { %6349 = vst [vmem:[#allocation27_spill] sm:$0xff] %v5198_v12  ;;  %v5205_v25 = vmax.f32 %v5188_v14, %v5198_v12  ;;  %v2068_v6 = vrot.slane %v2067_v60, 4  ;;  %v2075_v26 = vrot.slane %v2074_v50, 4  ;;  %v2062_v59 = vadd.f32 %v2061_v43, %v2060_v13 }
 0x1aa   :  { %v2082_v62 = vrot.slane %v2081_v58, 4  ;;  %v2095_v2 = vsel %vm1835_vm1, %v1666_v24, 0.0  ;;  %v2089_v46 = vrot.slane %v2088_v53, 4  ;;  %v2102_v12 = vsel %vm1835_vm1, %v1673_v4, 0.0 }
 0x1ab   :  { %6350 = vst [vmem:[#allocation28_spill] sm:$0xff] %v5205_v25  ;;  %v2069_v47 = vadd.f32 %v2068_v6, %v2067_v60  ;;  %v2076_v10 = vadd.f32 %v2075_v26, %v2074_v50  ;;  %v2096_v44 = vrot.slane %v2095_v2, 4  ;;  %v2063_v61 = vrot.slane %v2062_v59, 2 }
 0x1ac   :  { %v5210_v1 = vadd.f32 %v2082_v62, %v2081_v58  ;;  %v2109_v14 = vsel %vm1835_vm1, %v1674_v27, 0.0  ;;  %v2090_v13 = vadd.f32 %v2089_v46, %v2088_v53  ;;  %v2103_v24 = vrot.slane %v2102_v12, 4  ;;  %v1110_v58 = vpop.f32.mrf.mxu1 }
 0x1ad   :  { %v2070_v42 = vrot.slane %v2069_v47, 2  ;;  %v2077_v21 = vrot.slane %v2076_v10, 2  ;;  %v2097_v43 = vadd.f32 %v2096_v44, %v2095_v2  ;;  %v2064_v51 = vadd.f32 %v2063_v61, %v2062_v59 }
 0x1ae   :  { %v2110_v60 = vrot.slane %v2109_v14, 4  ;;  %v2091_v26 = vrot.slane %v2090_v13, 2  ;;  %v2104_v56 = vadd.f32 %v2103_v24, %v2102_v12  ;;  %v6351_v27 = vmax.f32 %v5134_v41, 0.0  ;;  %v1112_v41 = vpop.f32.mrf.mxu1 }
 0x1af   :  { %v5215_v50 = vadd.f32 %v2070_v42, %v2069_v47  ;;  %v2078_v6 = vadd.f32 %v2077_v21, %v2076_v10  ;;  %v2098_v33 = vrot.slane %v2097_v43, 2  ;;  %v2065_v62 = vrot.slane %v2064_v51, 1 }
 0x1b0   :  { %v2111_v4 = vadd.f32 %v2110_v60, %v2109_v14  ;;  %v1349_v22 = vadd.f32 %v4750_v18, %v6351_v27  ;;  %v2092_v2 = vadd.f32 %v2091_v26, %v2090_v13  ;;  %v1210_v46 = vmax.f32 %v5147_v30, 0.0 }
 0x1b1   :  { %v2079_v53 = vrot.slane %v2078_v6, 1  ;;  %v5220_v59 = vadd.f32 %v2098_v33, %v2097_v43  ;;  %v2066_v44 = vadd.f32 %v2065_v62, %v2064_v51  ;;  %v2105_v42 = vrot.slane %v2104_v56, 2 }
 0x1b2   :  { %v2112_v47 = vrot.slane %v2111_v4, 2  ;;  %v1225_v10 = vmax.f32 %v5150_v3, 0.0  ;;  %v2093_v21 = vrot.slane %v2092_v2, 1  ;;  %v1350_v14 = vadd.f32 %v4752_v9, %v1210_v46 }
 0x1b3   :  { %v2080_v61 = vadd.f32 %v2079_v53, %v2078_v6  ;;  %v2106_v24 = vadd.f32 %v2105_v42, %v2104_v56  ;;  %v5228_v13 = vmul.f32 0.0625, %v2066_v44  ;;  %v1109_v6 = vadd.f32 %v1108_v11, %v4590_v17 }
 0x1b4   :  { %v5226_v18 = vadd.f32 %v2112_v47, %v2111_v4  ;;  %v5231_v33 = vadd.f32 %v4754_v19, %v1225_v10  ;;  %v2094_v30 = vadd.f32 %v2093_v21, %v2092_v2  ;;  %v1461_v43 = vcombine.low %v1349_v22, %v1350_v14 }
 0x1b5   :  { %v5233_v51 = vmul.f32 0.0625, %v2080_v61  ;;  %v1462_v3 = vcombine.high %v1349_v22, %v1350_v14  ;;  %v2107_v60 = vrot.slane %v2106_v24, 1  ;;  %v1111_v26 = vadd.f32 %v1110_v58, %v6325_v49 }
 0x1b6   :  { %v1113_v9 = vadd.f32 %v1112_v41, %v4590_v17  ;;  %v5238_v56 = vmul.f32 0.0625, %v2094_v30  ;;  %v1469_v62 = vrot.slane %v1461_v43, %v4594_v52  ;;  %v6354_v19 = vrot.slane %v5101_v7, 1 }
 0x1b7   :  { %6352 = vst [vmem:[#allocation29_spill] sm:$0xff] %v5233_v51  ;;  %v1476_v4 = vrot.slane %v1462_v3, %v4594_v52  ;;  %v2108_v53 = vadd.f32 %v2107_v60, %v2106_v24  ;;  %v1226_v22 = vmax.f32 %v1109_v6, 0.0  ;;  %v1241_v2 = vmax.f32 %v1111_v26, 0.0 }
 0x1b8   :  { %6353 = vst [vmem:[#allocation30_spill] sm:$0xff] %v5238_v56  ;;  %v5245_v27 = vadd.f32 %v6354_v19, %v5101_v7  ;;  %v1242_v46 = vmax.f32 %v1113_v9, 0.0  ;;  %v1477_v11 = vcombine.high %v1469_v62, %v1469_v62  ;;  %v1681_v49 = vrot.slane %v1469_v62, %v4594_v52 }
 0x1b9   :  { %v1478_v44 = vcombine.high %v1476_v4, %v1476_v4  ;;  %v1697_v17 = vrot.slane %v1476_v4, %v4594_v52  ;;  %v5249_v58 = vmul.f32 0.0625, %v2108_v53  ;;  %v1352_v42 = vadd.f32 %v4756_v0, %v1226_v22 }
 0x1ba   :  { %v5253_v47 = vadd.f32 %v4771_v34, %v1241_v2  ;;  %v5256_v7 = vadd.f32 %v4773_v28, %v1242_v46  ;;  %v1682_v10 = vcombine.high %v1681_v49, %v1681_v49  ;;  %v1689_v61 = vrot.slane %v1477_v11, %v4594_v52 }
 0x1bb   :  { %6355 = vst [vmem:[#allocation31_spill] sm:$0xff] %v5249_v58  ;;  %v1698_v21 = vcombine.high %v1697_v17, %v1697_v17  ;;  %v1705_v14 = vrot.slane %v1478_v44, %v4594_v52  ;;  %v5262_v41 = vmax.f32 %v5238_v56, %v5249_v58  ;;  %v2116_v24 = vsel %vm1835_vm1, %v1681_v49, 0.0 }
 0x1bc   :  { %v2144_v0 = vsel %vm1835_vm1, %v1697_v17, 0.0  ;;  %v1479_v34 = vcombine.low %v5231_v33, %v1352_v42  ;;  %v1690_v30 = vcombine.high %v1689_v61, %v1689_v61  ;;  %v2117_v28 = vrot.slane %v2116_v24, 4 }
 0x1bd   :  { %6356 = vst [vmem:[#allocation32_spill] sm:$0xff] %v5262_v41  ;;  %v1706_v43 = vcombine.high %v1705_v14, %v1705_v14  ;;  %v2123_v3 = vsel %vm1835_vm1, %v1682_v10, 0.0  ;;  %v2130_v6 = vsel %vm1835_vm1, %v1689_v61, 0.0  ;;  %v2145_v26 = vrot.slane %v2144_v0, 4 }
 0x1be   :  { %v2124_v60 = vrot.slane %v2123_v3, 4  ;;  %v2151_v9 = vsel %vm1835_vm1, %v1698_v21, 0.0  ;;  %v2118_v62 = vadd.f32 %v2117_v28, %v2116_v24  ;;  %v2131_v4 = vrot.slane %v2130_v6, 4 }
 0x1bf   :  { %v2137_v19 = vsel %vm1835_vm1, %v1690_v30, 0.0  ;;  %v2152_v53 = vrot.slane %v2151_v9, 4  ;;  %v2146_v46 = vadd.f32 %v2145_v26, %v2144_v0  ;;  %v2158_v11 = vsel %vm1835_vm1, %v1705_v14, 0.0 }
 0x1c0   :  { %v5271_v22 = vadd.f32 %v2124_v60, %v2123_v3  ;;  %v2138_v2 = vrot.slane %v2137_v19, 4  ;;  %v2119_v44 = vrot.slane %v2118_v62, 2  ;;  %v2132_v49 = vadd.f32 %v2131_v4, %v2130_v6 }
 0x1c1   :  { %v2153_v17 = vadd.f32 %v2152_v53, %v2151_v9  ;;  %v2159_v10 = vrot.slane %v2158_v11, 4  ;;  %v2147_v21 = vrot.slane %v2146_v46, 2  ;;  %v2165_v24 = vsel %vm1835_vm1, %v1706_v43, 0.0 }
 0x1c2   :  { %v5275_v12 = vadd.f32 %v2138_v2, %v2137_v19  ;;  %v2120_v28 = vadd.f32 %v2119_v44, %v2118_v62  ;;  %v2133_v30 = vrot.slane %v2132_v49, 2  ;;  %v2166_v58 = vrot.slane %v2165_v24, 4 }
 0x1c3   :  { %v2154_v15 = vrot.slane %v2153_v17, 2  ;;  %v2160_v3 = vadd.f32 %v2159_v10, %v2158_v11  ;;  %v2148_v60 = vadd.f32 %v2147_v21, %v2146_v46  ;;  %v1480_v0 = vcombine.high %v5231_v33, %v1352_v42 }
 0x1c4   :  { %v1487_v14 = vrot.slane %v1479_v34, %v4594_v52  ;;  %v2121_v6 = vrot.slane %v2120_v28, 1  ;;  %v5280_v26 = vadd.f32 %v2133_v30, %v2132_v49  ;;  %v5284_v53 = vadd.f32 %v2166_v58, %v2165_v24 }
 0x1c5   :  { %v5282_v9 = vadd.f32 %v2154_v15, %v2153_v17  ;;  %v2161_v4 = vrot.slane %v2160_v3, 2  ;;  %v2149_v19 = vrot.slane %v2148_v60, 1  ;;  %v1494_v43 = vrot.slane %v1480_v0, %v4594_v52 }
 0x1c6   :  { %v1495_v62 = vcombine.high %v1487_v14, %v1487_v14  ;;  %v2122_v2 = vadd.f32 %v2121_v6, %v2120_v28  ;;  %v1713_v33 = vrot.slane %v1487_v14, %v4594_v52 }
 0x1c7   :  { %v2162_v11 = vadd.f32 %v2161_v4, %v2160_v3  ;;  %v2150_v42 = vadd.f32 %v2149_v19, %v2148_v60  ;;  %v1496_v44 = vcombine.high %v1494_v43, %v1494_v43  ;;  %v1729_v10 = vrot.slane %v1494_v43, %v4594_v52 }
 0x1c8   :  { %v1721_v15 = vrot.slane %v1495_v62, %v4594_v52  ;;  %v5291_v17 = vmul.f32 0.0625, %v2122_v2  ;;  %v1714_v58 = vcombine.high %v1713_v33, %v1713_v33  ;;  %v2172_v30 = vsel %vm1835_vm1, %v1713_v33, 0.0 }
 0x1c9   :  { %v2163_v49 = vrot.slane %v2162_v11, 1  ;;  %v5294_v21 = vmul.f32 0.0625, %v2150_v42  ;;  %v1737_v28 = vrot.slane %v1496_v44, %v4594_v52  ;;  %v1730_v60 = vcombine.high %v1729_v10, %v1729_v10 }
 0x1ca   :  { %6357 = vst [vmem:[#allocation33_spill] sm:$0xff] %v5291_v17  ;;  %v1722_v24 = vcombine.high %v1721_v15, %v1721_v15  ;;  %v2173_v0 = vrot.slane %v2172_v30, 4  ;;  %v2179_v14 = vsel %vm1835_vm1, %v1714_v58, 0.0  ;;  %v2186_v19 = vsel %vm1835_vm1, %v1721_v15, 0.0 }
 0x1cb   :  { %6358 = vst [vmem:[#allocation34_spill] sm:$0xff] %v5294_v21  ;;  %v2164_v3 = vadd.f32 %v2163_v49, %v2162_v11  ;;  %v1738_v6 = vcombine.high %v1737_v28, %v1737_v28  ;;  %v2180_v4 = vrot.slane %v2179_v14, 4  ;;  %v2187_v42 = vrot.slane %v2186_v19, 4 }
 0x1cc   :  { %v5301_v62 = vsel %vm1835_vm1, %v1722_v24, 0.0  ;;  %v2174_v2 = vadd.f32 %v2173_v0, %v2172_v30  ;;  %v2200_v11 = vsel %vm1835_vm1, %v1729_v10, 0.0  ;;  %v2207_v33 = vsel %vm1835_vm1, %v1730_v60, 0.0 }
 0x1cd   :  { %v5303_v43 = vmul.f32 0.0625, %v2164_v3  ;;  %v5306_v34 = vadd.f32 %v2180_v4, %v2179_v14  ;;  %v2214_v49 = vsel %vm1835_vm1, %v1737_v28, 0.0  ;;  %v2188_v46 = vadd.f32 %v2187_v42, %v2186_v19 }
 0x1ce   :  { %v2175_v58 = vrot.slane %v2174_v2, 2  ;;  %v2201_v15 = vrot.slane %v2200_v11, 4  ;;  %v2208_v61 = vrot.slane %v2207_v33, 4  ;;  %v2215_v24 = vrot.slane %v2214_v49, 4 }
 0x1cf   :  { %6359 = vst [vmem:[#allocation35_spill] sm:$0xff] %v5303_v43  ;;  %v2221_v3 = vsel %vm1835_vm1, %v1738_v6, 0.0  ;;  %v1497_v30 = vcombine.low %v5253_v47, %v5256_v7  ;;  %v1498_v0 = vcombine.high %v5253_v47, %v5256_v7  ;;  %v2189_v10 = vrot.slane %v2188_v46, 2 }
 0x1d0   :  { %v5316_v14 = vadd.f32 %v2175_v58, %v2174_v2  ;;  %v2202_v4 = vadd.f32 %v2201_v15, %v2200_v11  ;;  %v5318_v60 = vadd.f32 %v2208_v61, %v2207_v33  ;;  %v2216_v28 = vadd.f32 %v2215_v24, %v2214_v49 }
 0x1d1   :  { %v2222_v44 = vrot.slane %v2221_v3, 4  ;;  %v1505_v19 = vrot.slane %v1497_v30, %v4594_v52  ;;  %v1512_v42 = vrot.slane %v1498_v0, %v4594_v52  ;;  %v5323_v56 = vadd.f32 %v2189_v10, %v2188_v46 }
 0x1d2   :  { %v2203_v8 = vrot.slane %v2202_v4, 2  ;;  %v2217_v47 = vrot.slane %v2216_v28, 2  ;;  %v6360_v58 = vrot.slane %v5173_v36, 1  ;;  %v2140_v43 = vrot.slane %v5275_v12, 2 }
 0x1d3   :  { %v5326_v7 = vadd.f32 %v2222_v44, %v2221_v3  ;;  %v1513_v2 = vcombine.high %v1505_v19, %v1505_v19  ;;  %v1514_v11 = vcombine.high %v1512_v42, %v1512_v42  ;;  %v1745_v33 = vrot.slane %v1505_v19, %v4594_v52 }
 0x1d4   :  { %v2204_v61 = vadd.f32 %v2203_v8, %v2202_v4  ;;  %v1761_v49 = vrot.slane %v1512_v42, %v4594_v52  ;;  %v2017_v15 = vadd.f32 %v6360_v58, %v5173_v36  ;;  %v5333_v24 = vadd.f32 %v2217_v47, %v2216_v28 }
 0x1d5   :  { %v1753_v46 = vrot.slane %v1513_v2, %v4594_v52  ;;  %v1769_v30 = vrot.slane %v1514_v11, %v4594_v52  ;;  %v2030_v44 = vrot.slane %v5176_v35, 1  ;;  %v1746_v0 = vcombine.high %v1745_v33, %v1745_v33 }
 0x1d6   :  { %6361 = vst [vmem:[#allocation36_spill] sm:$0xff] %v5333_v24  ;;  %v2205_v3 = vrot.slane %v2204_v61, 1  ;;  %v1762_v10 = vcombine.high %v1761_v49, %v1761_v49  ;;  %v2228_v8 = vsel %vm1835_vm1, %v1745_v33, 0.0  ;;  %v2256_v52 = vsel %vm1835_vm1, %v1761_v49, 0.0 }
 0x1d7   :  { %v1754_v19 = vcombine.high %v1753_v46, %v1753_v46  ;;  %v1770_v42 = vcombine.high %v1769_v30, %v1769_v30  ;;  %v2229_v20 = vrot.slane %v2228_v8, 4  ;;  %v2235_v36 = vsel %vm1835_vm1, %v1746_v0, 0.0 }
 0x1d8   :  { %v5340_v6 = vadd.f32 %v2205_v3, %v2204_v61  ;;  %v2242_v28 = vsel %vm1835_vm1, %v1753_v46, 0.0  ;;  %v2236_v2 = vrot.slane %v2235_v36, 4  ;;  %v2257_v58 = vrot.slane %v2256_v52, 4 }
 0x1d9   :  { %v2230_v47 = vadd.f32 %v2229_v20, %v2228_v8  ;;  %v2243_v11 = vrot.slane %v2242_v28, 4  ;;  %v2263_v40 = vsel %vm1835_vm1, %v1762_v10, 0.0  ;;  %v2270_v33 = vsel %vm1835_vm1, %v1769_v30, 0.0 }
 0x1da   :  { %6362 = vst [vmem:[#allocation37_spill] sm:$0xff] %v5340_v6  ;;  %v5348_v4 = vsel %vm1835_vm1, %v1770_v42, 0.0  ;;  %v2031_v61 = vadd.f32 %v2030_v44, %v5176_v35  ;;  %v2258_v0 = vadd.f32 %v2257_v58, %v2256_v52  ;;  %v2264_v46 = vrot.slane %v2263_v40, 4 }
 0x1db   :  { %v2231_v3 = vrot.slane %v2230_v47, 2  ;;  %v5351_v41 = vadd.f32 %v2243_v11, %v2242_v28  ;;  %v2271_v25 = vrot.slane %v2270_v33, 4  ;;  %v2072_v49 = vrot.slane %v5215_v50, 1 }
 0x1dc   :  { %v6363_v10 = vrot.slane %v5210_v1, 2  ;;  %v2259_v21 = vrot.slane %v2258_v0, 2  ;;  %v5361_v35 = vadd.f32 %v2264_v46, %v2263_v40  ;;  %v6364_v11 = vrot.slane %v5271_v22, 2 }
 0x1dd   :  { %v5358_v30 = vadd.f32 %v2231_v3, %v2230_v47  ;;  %v2272_v44 = vadd.f32 %v2271_v25, %v2270_v33  ;;  %v2073_v28 = vadd.f32 %v2072_v49, %v5215_v50  ;;  %v6365_v47 = vrot.slane %v5301_v62, 4 }
 0x1de   :  { %v2085_v8 = vadd.f32 %v6363_v10, %v5210_v1  ;;  %v2127_v58 = vadd.f32 %v6364_v11, %v5271_v22  ;;  %v5367_v20 = vadd.f32 %v2259_v21, %v2258_v0  ;;  %v2182_v1 = vrot.slane %v5306_v34, 2 }
 0x1df   :  { %v2195_v3 = vadd.f32 %v6365_v47, %v5301_v62  ;;  %v2273_v40 = vrot.slane %v2272_v44, 2  ;;  %v2237_v33 = vadd.f32 %v2236_v2, %v2235_v36  ;;  %v2141_v49 = vadd.f32 %v2140_v43, %v5275_v12 }
 0x1e0   :  { %v2086_v52 = vrot.slane %v2085_v8, 1  ;;  %v2128_v25 = vrot.slane %v2127_v58, 1  ;;  %v2183_v22 = vadd.f32 %v2182_v1, %v5306_v34  ;;  %v2249_v42 = vsel %vm1835_vm1, %v1754_v19, 0.0 }
 0x1e1   :  { %v2196_v21 = vrot.slane %v2195_v3, 2  ;;  %v5377_v0 = vadd.f32 %v2273_v40, %v2272_v44  ;;  %v2238_v11 = vrot.slane %v2237_v33, 2  ;;  %v2142_v6 = vrot.slane %v2141_v49, 1 }
 0x1e2   :  { %v2087_v46 = vadd.f32 %v2086_v52, %v2085_v8  ;;  %v2129_v10 = vadd.f32 %v2128_v25, %v2127_v58  ;;  %v2184_v24 = vrot.slane %v2183_v22, 1  ;;  %v2250_v47 = vrot.slane %v2249_v42, 4 }
 0x1e3   :  { %v2197_v62 = vadd.f32 %v2196_v21, %v2195_v3  ;;  %v2239_v8 = vadd.f32 %v2238_v11, %v2237_v33  ;;  %v5381_v36 = vmul.f32 0.0625, %v5245_v27  ;;  %v5383_v2 = vmul.f32 0.0625, %v2017_v15 }
 0x1e4   :  { %v5385_v12 = vmul.f32 0.0625, %v2031_v61  ;;  %v2143_v34 = vadd.f32 %v2142_v6, %v2141_v49  ;;  %v2185_v43 = vadd.f32 %v2184_v24, %v2183_v22  ;;  %v2251_v52 = vadd.f32 %v2250_v47, %v2249_v42 }
 0x1e5   :  { %v2198_v44 = vrot.slane %v2197_v62, 1  ;;  %v2240_v58 = vrot.slane %v2239_v8, 1  ;;  %v5387_v1 = vmul.f32 0.0625, %v2073_v28  ;;  %v5389_v19 = vmul.f32 0.0625, %v2087_v46 }
 0x1e6   :  { %v5391_v40 = vmul.f32 0.0625, %v2129_v10  ;;  %v2252_v25 = vrot.slane %v2251_v52, 2  ;;  %v5393_v33 = vmul.f32 0.0625, %v2143_v34  ;;  %v5395_v27 = vmul.f32 0.0625, %v2185_v43 }
 0x1e7   :  { %v2199_v3 = vadd.f32 %v2198_v44, %v2197_v62  ;;  %v2241_v15 = vadd.f32 %v2240_v58, %v2239_v8  ;;  %v5399_v6 = vmax.f32 %v4908_v39, %v4936_v37  ;;  %v5403_v24 = vmax.f32 %v5036_v31, %v5043_v23 }
 0x1e8   :  { %v5407_v61 = vmax.f32 %v5109_v55, %v5381_v36  ;;  %v2253_v42 = vadd.f32 %v2252_v25, %v2251_v52  ;;  %v5413_v46 = vmax.f32 %v5383_v2, %v5385_v12  ;;  %v5417_v49 = vmax.f32 %v5387_v1, %v5389_v19 }
 0x1e9   :  { %v5409_v28 = vmul.f32 0.0625, %v2199_v3  ;;  %v5419_v22 = vmul.f32 0.0625, %v2241_v15  ;;  %v5423_v21 = vmax.f32 %v5391_v40, %v5393_v33  ;;  %v2491_v62 = vsel %vm2477_vm2, %v5403_v24, %v5399_v6 }
 0x1ea   :  { %v2254_v10 = vrot.slane %v2253_v42, 1  ;;  %v2492_v8 = vsel %vm2479_vm3, %v5407_v61, %v2491_v62  ;;  %v6366_v34 = vrot.slane %v5280_v26, 1  ;;  %v6367_v44 = vrot.slane %v5316_v14, 1 }
 0x1eb   :  { %v5427_v11 = vmax.f32 %v5395_v27, %v5409_v28  ;;  %v2493_v58 = vsel %vm2481_vm4, %v5413_v46, %v2492_v8  ;;  %v2191_v3 = vrot.slane %v5323_v56, 1  ;;  %v2233_v25 = vrot.slane %v5358_v30, 1 }
 0x1ec   :  { %v2255_v47 = vadd.f32 %v2254_v10, %v2253_v42  ;;  %v2136_v43 = vadd.f32 %v6366_v34, %v5280_v26  ;;  %v2178_v52 = vadd.f32 %v6367_v44, %v5316_v14  ;;  %v6368_v15 = vrot.slane %v5351_v41, 2 }
 0x1ed   :  { %v2494_v26 = vsel %vm2483_vm5, %v5417_v49, %v2493_v58  ;;  %v2192_v8 = vadd.f32 %v2191_v3, %v5323_v56  ;;  %v2234_v44 = vadd.f32 %v2233_v25, %v5358_v30  ;;  %v2478_v3 = vsel %vm2477_vm2, %v5047_v48, %v4952_v29 }
 0x1ee   :  { %v2246_v42 = vadd.f32 %v6368_v15, %v5351_v41  ;;  %v5447_v10 = vmul.f32 0.0625, %v2255_v47  ;;  %v5451_v62 = vmul.f32 0.0625, %v2136_v43  ;;  %v5453_v34 = vmul.f32 0.0625, %v2178_v52 }
 0x1ef   :  { %v2495_v14 = vsel %vm2485_vm6, %v5423_v21, %v2494_v26  ;;  %v5467_v43 = vmax.f32 %v5228_v13, %v5233_v51  ;;  %v5473_v56 = vmul.f32 0.0625, %v2192_v8  ;;  %v5475_v30 = vmul.f32 0.0625, %v2234_v44 }
 0x1f0   :  { %6369 = vst [vmem:[#allocation38_spill] sm:$0xff] %v5451_v62  ;;  %6370 = vst [vmem:[#allocation39_spill] sm:$0xff] %v5453_v34  ;;  %v2247_v50 = vrot.slane %v2246_v42, 1  ;;  %v5461_v41 = vmax.f32 %v5419_v22, %v5447_v10  ;;  %v2496_v47 = vsel %vm2487_vm7, %v5427_v11, %v2495_v14  ;;  %v5471_v52 = vmax.f32 %v5291_v17, %v5451_v62 }
 0x1f1   :  { %6371 = vst [vmem:[#allocation40_spill] sm:$0xff] %v5473_v56  ;;  %6372 = vst [vmem:[#allocation41_spill] sm:$0xff] %v5475_v30  ;;  %v2480_v15 = vsel %vm2479_vm3, %v5128_v32, %v2478_v3  ;;  %v6373_v26 = vrot.slane %v5178_v57, 1  ;;  %v5494_v44 = vmax.f32 %v5453_v34, %v5473_v56  ;;  %v2114_v3 = vrot.slane %v5226_v18, 1 }
 0x1f2   :  { %v2248_v58 = vadd.f32 %v2247_v50, %v2246_v42  ;;  %v2497_v25 = vsel %vm2489_vm8, %v5461_v41, %v2496_v47  ;;  %v6374_v50 = vrot.slane %v5220_v59, 1  ;;  %v2482_v47 = vsel %vm2481_vm4, %v5193_v45, %v2480_v15 }
 0x1f3   :  { %v2059_v14 = vadd.f32 %v6373_v26, %v5178_v57  ;;  %2564 = vmatprep.mubr.f32.mxu0 %v2497_v25  ;;  %v2484_v62 = vsel %vm2483_vm5, %v5467_v43, %v2482_v47  ;;  %v2156_v57 = vrot.slane %v5282_v9, 1  ;;  %v2115_v56 = vadd.f32 %v2114_v3, %v5226_v18 }
 0x1f4   :  { %v2101_v42 = vadd.f32 %v6374_v50, %v5220_v59  ;;  %v5490_v8 = vmul.f32 0.0625, %v2248_v58  ;;  %v6376_v59 = vrot.slane %v5284_v53, 2  ;;  %v6377_v58 = vrot.slane %v5318_v60, 2 }
 0x1f5   :  { %v2486_v15 = vsel %vm2485_vm6, %v5471_v52, %v2484_v62  ;;  %v2224_v47 = vrot.slane %v5326_v7, 2  ;;  %v2266_v18 = vrot.slane %v5361_v35, 2  ;;  %v6378_v3 = vrot.slane %v5348_v4, 4 }
 0x1f6   :  { %6375 = vst [vmem:[#allocation42_spill] sm:$0xff] %v5490_v8  ;;  %v2169_v25 = vadd.f32 %v6376_v59, %v5284_v53  ;;  %v2211_v26 = vadd.f32 %v6377_v58, %v5318_v60  ;;  %v5510_v50 = vmax.f32 %v5475_v30, %v5490_v8  ;;  %v2488_v51 = vsel %vm2487_vm7, %v5494_v44, %v2486_v15  ;;  %v3522_v53 = vld [vmem:[%s6268_s3 + $0x278] sm:$0xff]  ;;  %v3537_v15 = vld [vmem:[%s6268_s3 + $0x2f0] sm:$0xff] }
 0x1f7   :  { %v2157_v60 = vadd.f32 %v2156_v57, %v5282_v9  ;;  %v2225_v62 = vadd.f32 %v2224_v47, %v5326_v7  ;;  %v2279_v30 = vadd.f32 %v6378_v3, %v5348_v4  ;;  %v5532_v57 = vmul.f32 0.0625, %v2059_v14 }
 0x1f8   :  { %v2170_v59 = vrot.slane %v2169_v25, 1  ;;  %v2212_v58 = vrot.slane %v2211_v26, 1  ;;  %v2490_v8 = vsel %vm2489_vm8, %v5510_v50, %v2488_v51  ;;  %v5534_v17 = vmul.f32 0.0625, %v2101_v42  ;;  %v3521_v51 = vld [vmem:[%s6268_s3 + $0x270] sm:$0xff] }
 0x1f9   :  { %2565 = vmatmul.mubr.f32.vlgmr.msra.gmra.mxu0 %v2490_v8  ;;  %v2226_v7 = vrot.slane %v2225_v62, 1  ;;  %v2267_v47 = vadd.f32 %v2266_v18, %v5361_v35  ;;  %v2280_v4 = vrot.slane %v2279_v30, 2  ;;  %v5540_v3 = vmul.f32 0.0625, %v2115_v56  ;;  %v3536_v8 = vld [vmem:[%s6268_s3 + $0x2e8] sm:$0xff] }
 0x1fa   :  { %v2171_v34 = vadd.f32 %v2170_v59, %v2169_v25  ;;  %v2213_v9 = vadd.f32 %v2212_v58, %v2211_v26  ;;  %3739 = vmatpush3.msra.mxu0 %v3522_v53  ;;  %v5545_v25 = vmul.f32 0.0625, %v2157_v60  ;;  %v2369_v26 = vmax.f32 %v5118_v54, %v5152_v5  ;;  %v3520_v35 = vld [vmem:[%s6268_s3 + $0x268] sm:$0xff] }
 0x1fb   :  { %6379 = vst [vmem:[#allocation43_spill] sm:$0xff] %v5540_v3  ;;  %3740 = vmatprep.subr.mxu0 %v3537_v15  ;;  %v2227_v56 = vadd.f32 %v2226_v7, %v2225_v62  ;;  %v2268_v53 = vrot.slane %v2267_v47, 1  ;;  %v2281_v59 = vadd.f32 %v2280_v4, %v2279_v30  ;;  %v2371_v58 = vmax.f32 %v5196_v38, %v5532_v57  ;;  %v3519_v62 = vld [vmem:[%s6268_s3 + $0x260] sm:$0xff] }
 0x1fc   :  { %v5547_v14 = vmul.f32 0.0625, %v2171_v34  ;;  %v5549_v42 = vmul.f32 0.0625, %v2213_v9  ;;  %3741 = vmatpush3.msra.mxu0 %v3521_v51  ;;  %v3535_v34 = vld [vmem:[%s6268_s3 + $0x2e0] sm:$0xff]  ;;  %v2373_v60 = vmax.f32 %v5534_v17, %v5540_v3  ;;  %v2381_v15 = vmax.f32 %v5399_v6, %v5001_v16 }
 0x1fd   :  { %v2383_v30 = vmax.f32 %v5403_v24, %v5083_v63  ;;  %3742 = vmatprep.subr.mxu0 %v3536_v8  ;;  %v2269_v9 = vadd.f32 %v2268_v53, %v2267_v47  ;;  %v2282_v51 = vrot.slane %v2281_v59, 1  ;;  %v5572_v7 = vmul.f32 0.0625, %v2227_v56  ;;  %v3518_v47 = vld [vmem:[%s6268_s3 + $0x258] sm:$0xff] }
 0x1fe   :  { %6380 = vst [vmem:[#allocation44_spill] sm:$0xff] %v5547_v14  ;;  %v2375_v18 = vmax.f32 %v5545_v25, %v5547_v14  ;;  %v2385_v4 = vmax.f32 %v5407_v61, %v2369_v26  ;;  %3743 = vmatpush3.msra.mxu0 %v3520_v35  ;;  %v3534_v14 = vld [vmem:[%s6268_s3 + $0x2d8] sm:$0xff]  ;;  %v2387_v6 = vmax.f32 %v5413_v46, %v2371_v58  ;;  %v3533_v46 = vld [vmem:[%s6268_s3 + $0x2d0] sm:$0xff] }
 0x1ff   :  { %v2389_v24 = vmax.f32 %v5417_v49, %v2373_v60  ;;  %v2593_v3 = vsel %vm2477_vm2, %v2383_v30, %v2381_v15  ;;  %3744 = vmatprep.subr.mxu0 %v3535_v34  ;;  %v2283_v56 = vadd.f32 %v2282_v51, %v2281_v59  ;;  %v5585_v61 = vmul.f32 0.0625, %v2269_v9  ;;  %v6381_v34 = vld [vmem:[#allocation36_spill] sm:$0xff] }
 0x200   :  { %v2391_v8 = vmax.f32 %v5423_v21, %v2375_v18  ;;  %v2377_v35 = vmax.f32 %v5549_v42, %v5572_v7  ;;  %v2594_v53 = vsel %vm2479_vm3, %v2385_v4, %v2593_v3  ;;  %3745 = vmatpush3.msra.mxu0 %v3519_v62  ;;  %v2728_v21 = vsel %vm2477_vm2, %v5083_v63, %v5001_v16  ;;  %v3517_v3 = vld [vmem:[%s6268_s3 + $0x250] sm:$0xff]  ;;  %v3532_v63 = vld [vmem:[%s6268_s3 + $0x2c8] sm:$0xff] }
 0x201   :  { %v2595_v49 = vsel %vm2481_vm4, %v2387_v6, %v2594_v53  ;;  %v6382_v59 = vrot.slane %v6381_v34, 1  ;;  %v6383_v30 = vrot.slane %v5367_v20, 1  ;;  %3746 = vmatprep.subr.mxu0 %v3534_v14  ;;  %v5606_v62 = vmul.f32 0.0625, %v2283_v56  ;;  %v6384_v53 = vld [vmem:[#allocation37_spill] sm:$0xff] }
 0x202   :  { %v2393_v51 = vmax.f32 %v5427_v11, %v2377_v35  ;;  %v2596_v4 = vsel %vm2483_vm5, %v2389_v24, %v2595_v49  ;;  %v2729_v16 = vsel %vm2479_vm3, %v2369_v26, %v2728_v21  ;;  %3747 = vmatpush3.msra.mxu0 %v3518_v47  ;;  %v2275_v6 = vrot.slane %v5377_v0, 1  ;;  %v3516_v11 = vld [vmem:[%s6268_s3 + $0x248] sm:$0xff] }
 0x203   :  { %v2220_v15 = vadd.f32 %v6382_v59, %v6381_v34  ;;  %v2262_v9 = vadd.f32 %v6383_v30, %v5367_v20  ;;  %v2597_v20 = vsel %vm2485_vm6, %v2391_v8, %v2596_v4  ;;  %v2730_v14 = vsel %vm2481_vm4, %v2371_v58, %v2729_v16  ;;  %3748 = vmatprep.subr.mxu0 %v3533_v46  ;;  %v3531_v58 = vld [vmem:[%s6268_s3 + $0x2c0] sm:$0xff]  ;;  %v6385_v34 = vld [vmem:[#allocation35_spill] sm:$0xff]  ;;  %v6386_v59 = vld [vmem:[#allocation34_spill] sm:$0xff] }
 0x204   :  { %v5618_v56 = vmul.f32 0.0625, %v6384_v53  ;;  %v2379_v26 = vmax.f32 %v5585_v61, %v5606_v62  ;;  %v2598_v24 = vsel %vm2487_vm7, %v2393_v51, %v2597_v20  ;;  %v2731_v47 = vsel %vm2483_vm5, %v2373_v60, %v2730_v14  ;;  %3749 = vmatpush3.msra.mxu0 %v3517_v3  ;;  %v6387_v3 = vld [vmem:[#allocation28_spill] sm:$0xff]  ;;  %v6389_v14 = vld [vmem:[#allocation10_spill] sm:$0xff] }
 0x205   :  { %v5627_v8 = vmul.f32 0.0625, %v2220_v15  ;;  %v2732_v46 = vsel %vm2485_vm6, %v2375_v18, %v2731_v47  ;;  %v2276_v49 = vadd.f32 %v2275_v6, %v5377_v0  ;;  %v5634_v21 = vmul.f32 0.0625, %v2262_v9  ;;  %3750 = vmatprep.subr.mxu0 %v3532_v63  ;;  %v3515_v0 = vld [vmem:[%s6268_s3 + $0x240] sm:$0xff]  ;;  %v3530_v63 = vld [vmem:[%s6268_s3 + $0x2b8] sm:$0xff]  ;;  %v6391_v53 = vld [vmem:[#allocation18_spill] sm:$0xff] }
 0x206   :  { %v2374_v30 = vmax.f32 %v6386_v59, %v6385_v34  ;;  %v2395_v51 = vmax.f32 %v5461_v41, %v2379_v26  ;;  %v2733_v60 = vsel %vm2487_vm7, %v2377_v35, %v2732_v46  ;;  %v2386_v4 = vmax.f32 %v5193_v45, %v6387_v3  ;;  %3751 = vmatpush3.msra.mxu0 %v3516_v11  ;;  %v6388_v16 = vld [vmem:[#allocation32_spill] sm:$0xff] }
 0x207   :  { %v2376_v15 = vmax.f32 %v5618_v56, %v5627_v8  ;;  %v2734_v18 = vsel %vm2489_vm8, %v2379_v26, %v2733_v60  ;;  %v5648_v9 = vmul.f32 0.0625, %v2276_v49  ;;  %v2388_v41 = vmax.f32 %v5467_v43, %v6388_v16  ;;  %3752 = vmatprep.subr.mxu0 %v3531_v58  ;;  %v3514_v26 = vld [vmem:[%s6268_s3 + $0x238] sm:$0xff]  ;;  %v3528_v60 = vld [vmem:[%s6268_s3 + $0x2a8] sm:$0xff] }
 0x208   :  { %v2390_v35 = vmax.f32 %v5471_v52, %v2374_v30  ;;  %v2599_v45 = vsel %vm2489_vm8, %v2395_v51, %v2598_v24  ;;  %2801 = vmatprep.mubr.f32.mxu0 %v2734_v18  ;;  %v6390_v6 = vmax.f32 %v4952_v29, %v6389_v14  ;;  %v6392_v11 = vmax.f32 %v5047_v48, %v6391_v53  ;;  %v6393_v24 = vld [vmem:[#allocation23_spill] sm:$0xff] }
 0x209   :  { %v2392_v20 = vmax.f32 %v5494_v44, %v2376_v15  ;;  %v2864_v52 = vsel %vm2477_vm2, %v5036_v31, %v4908_v39  ;;  %2666 = vmatprep.mubr.f32.mxu1 %v2599_v45  ;;  %v2378_v44 = vmax.f32 %v5634_v21, %v5648_v9  ;;  %v6394_v29 = vmax.f32 %v5128_v32, %v6393_v24  ;;  %v3529_v39 = vld [vmem:[%s6268_s3 + $0x2b0] sm:$0xff] }
 0x20a   :  { %v2586_v43 = vsel %vm2477_vm2, %v6392_v11, %v6390_v6  ;;  %v2865_v48 = vsel %vm2479_vm3, %v5109_v55, %v2864_v52  ;;  %3753 = vmatpush3.msra.mxu0 %v3515_v0  ;;  %v3513_v32 = vld [vmem:[%s6268_s3 + $0x230] sm:$0xff]  ;;  %v2721_v46 = vsel %vm2477_vm2, %v6391_v53, %v6389_v14  ;;  %v3000_v55 = vsel %vm2477_vm2, %v5043_v23, %v4936_v37  ;;  %v3512_v23 = vld [vmem:[%s6268_s3 + $0x228] sm:$0xff]  ;;  %v6395_v53 = vld [vmem:[#allocation7_spill] sm:$0xff] }
 0x20b   :  { %v2587_v47 = vsel %vm2479_vm3, %v6394_v29, %v2586_v43  ;;  %v2866_v58 = vsel %vm2481_vm4, %v5383_v2, %v2865_v48  ;;  %3754 = vmatprep.subr.mxu0 %v3530_v63  ;;  %v2394_v49 = vmax.f32 %v5510_v50, %v2378_v44  ;;  %v3001_v50 = vsel %vm2479_vm3, %v5381_v36, %v3000_v55  ;;  %v3569_v36 = vld [vmem:[%s6268_s3 + $0x3f0] sm:$0xff]  ;;  %v3526_v43 = vld [vmem:[%s6268_s3 + $0x298] sm:$0xff]  ;;  %v6399_v48 = vld [vmem:[#allocation8_spill] sm:$0xff] }
 0x20c   :  { %v2588_v31 = vsel %vm2481_vm4, %v2386_v4, %v2587_v47  ;;  %v2867_v2 = vsel %vm2483_vm5, %v5387_v1, %v2866_v58  ;;  %3755 = vmatpush3.msra.mxu0 %v3514_v26  ;;  %v2722_v4 = vsel %vm2479_vm3, %v6393_v24, %v2721_v46  ;;  %v3002_v63 = vsel %vm2481_vm4, %v5385_v12, %v3001_v50  ;;  %v3553_v12 = vld [vmem:[%s6268_s3 + $0x370] sm:$0xff]  ;;  %v3552_v24 = vld [vmem:[%s6268_s3 + $0x368] sm:$0xff]  ;;  %v3510_v29 = vld [vmem:[%s6268_s3 + $0x218] sm:$0xff] }
 0x20d   :  { %v2589_v51 = vsel %vm2483_vm5, %v2388_v41, %v2588_v31  ;;  %v2868_v37 = vsel %vm2485_vm6, %v5391_v40, %v2867_v2  ;;  %3756 = vmatprep.subr.mxu0 %v3529_v39  ;;  %v2723_v1 = vsel %vm2481_vm4, %v6387_v3, %v2722_v4  ;;  %v3554_v41 = vld [vmem:[%s6268_s3 + $0x378] sm:$0xff]  ;;  %v6398_v47 = vld [vmem:[#allocation24_spill] sm:$0xff]  ;;  %v6401_v55 = vld [vmem:[#allocation6_spill] sm:$0xff] }
 0x20e   :  { %v2590_v0 = vsel %vm2485_vm6, %v2390_v35, %v2589_v51  ;;  %v2869_v40 = vsel %vm2487_vm7, %v5395_v27, %v2868_v37  ;;  %3757 = vmatpush3.msra.mxu0 %v3513_v32  ;;  %v2724_v35 = vsel %vm2483_vm5, %v6388_v16, %v2723_v1  ;;  %v3527_v27 = vld [vmem:[%s6268_s3 + $0x2a0] sm:$0xff]  ;;  %v3003_v16 = vsel %vm2483_vm5, %v5389_v19, %v3002_v63  ;;  %v3568_v19 = vld [vmem:[%s6268_s3 + $0x3e8] sm:$0xff]  ;;  %v6400_v39 = vld [vmem:[#allocation15_spill] sm:$0xff] }
 0x20f   :  { %v2591_v18 = vsel %vm2487_vm7, %v2392_v20, %v2590_v0  ;;  %v2870_v45 = vsel %vm2489_vm8, %v5419_v22, %v2869_v40  ;;  %3758 = vmatprep.subr.mxu0 %v3528_v60  ;;  %v2725_v20 = vsel %vm2485_vm6, %v2374_v30, %v2724_v35  ;;  %v3511_v22 = vld [vmem:[%s6268_s3 + $0x220] sm:$0xff]  ;;  %v3004_v6 = vsel %vm2485_vm6, %v5393_v33, %v3003_v16  ;;  %v3525_v32 = vld [vmem:[%s6268_s3 + $0x290] sm:$0xff]  ;;  %v6403_v4 = vld [vmem:[#allocation33_spill] sm:$0xff] }
 0x210   :  { %v2592_v3 = vsel %vm2489_vm8, %v2394_v49, %v2591_v18  ;;  %3759 = vmatpush3.msra.mxu0 %v3512_v23  ;;  %v2726_v14 = vsel %vm2487_vm7, %v2376_v15, %v2725_v20  ;;  %v6396_v30 = vld [vmem:[#allocation12_spill] sm:$0xff]  ;;  %v3005_v33 = vsel %vm2487_vm7, %v5409_v28, %v3004_v6  ;;  %v6397_v15 = vld [vmem:[#allocation19_spill] sm:$0xff]  ;;  %v3136_v31 = vsel %vm2477_vm2, %v6400_v39, %v6399_v48  ;;  %v6402_v49 = vld [vmem:[#allocation13_spill] sm:$0xff] }
 0x211   :  { %2667 = vmatmul.mubr.f32.vlgmr.msra.gmra.mxu1 %v2592_v3  ;;  %v2857_v11 = vsel %vm2477_vm2, %v6396_v30, %v6395_v53  ;;  %v5754_v52 = vsel %vm2489_vm8, %v2378_v44, %v2726_v14  ;;  %3760 = vmatprep.subr.mxu0 %v3527_v27  ;;  %v5768_v44 = vsel %vm2489_vm8, %v5447_v10, %v3005_v33  ;;  %v3567_v58 = vld [vmem:[%s6268_s3 + $0x3e0] sm:$0xff]  ;;  %v3509_v60 = vld [vmem:[%s6268_s3 + $0x210] sm:$0xff]  ;;  %v6404_v0 = vld [vmem:[#allocation21_spill] sm:$0xff] }
 0x212   :  { %3774 = vmatpush3.msra.mxu1 %v3554_v41  ;;  %2937 = vmatprep.mubr.f32.mxu1 %v2870_v45  ;;  %v2858_v26 = vsel %vm2479_vm3, %v6397_v15, %v2857_v11  ;;  %v3137_v46 = vsel %vm2479_vm3, %v5118_v54, %v3136_v31  ;;  %v2993_v51 = vsel %vm2477_vm2, %v6402_v49, %v6401_v55  ;;  %v3551_v2 = vld [vmem:[%s6268_s3 + $0x360] sm:$0xff]  ;;  %v3566_v23 = vld [vmem:[%s6268_s3 + $0x3d8] sm:$0xff]  ;;  %v3524_v1 = vld [vmem:[%s6268_s3 + $0x288] sm:$0xff] }
 0x213   :  { %3775 = vmatprep.subr.mxu1 %v3569_v36  ;;  %v2859_v28 = vsel %vm2481_vm4, %v6398_v47, %v2858_v26  ;;  %3761 = vmatpush3.msra.mxu0 %v3511_v22  ;;  %v3138_v54 = vsel %vm2481_vm4, %v5196_v38, %v3137_v46  ;;  %v2994_v37 = vsel %vm2479_vm3, %v6404_v0, %v2993_v51  ;;  %v6405_v50 = vld [vmem:[#allocation39_spill] sm:$0xff]  ;;  %v6406_v38 = vld [vmem:[#allocation25_spill] sm:$0xff]  ;;  %v3565_v20 = vld [vmem:[%s6268_s3 + $0x3d0] sm:$0xff] }
 0x214   :  { %3776 = vmatpush3.msra.mxu1 %v3553_v12  ;;  %v2860_v10 = vsel %vm2483_vm5, %v5228_v13, %v2859_v28  ;;  %3762 = vmatprep.subr.mxu0 %v3526_v43  ;;  %v3139_v41 = vsel %vm2483_vm5, %v5534_v17, %v3138_v54  ;;  %v2995_v40 = vsel %vm2481_vm4, %v6406_v38, %v2994_v37  ;;  %v3550_v35 = vld [vmem:[%s6268_s3 + $0x358] sm:$0xff]  ;;  %v3508_v63 = vld [vmem:[%s6268_s3 + $0x208] sm:$0xff]  ;;  %v3523_v16 = vld [vmem:[%s6268_s3 + $0x280] sm:$0xff] }
 0x215   :  { %3777 = vmatprep.subr.mxu1 %v3568_v19  ;;  %v2861_v13 = vsel %vm2485_vm6, %v6403_v4, %v2860_v10  ;;  %3763 = vmatpush3.msra.mxu0 %v3510_v29  ;;  %v6407_v3 = vld [vmem:[#allocation41_spill] sm:$0xff]  ;;  %v3140_v17 = vsel %vm2485_vm6, %v5545_v25, %v3139_v41  ;;  %v6409_v22 = vld [vmem:[#allocation38_spill] sm:$0xff]  ;;  %v6410_v25 = vld [vmem:[#allocation11_spill] sm:$0xff] }
 0x216   :  { %3778 = vmatpush3.msra.mxu1 %v3552_v24  ;;  %v2862_v18 = vsel %vm2487_vm7, %v6405_v50, %v2861_v13  ;;  %3764 = vmatprep.subr.mxu0 %v3525_v32  ;;  %v6408_v45 = vld [vmem:[#allocation29_spill] sm:$0xff]  ;;  %v3141_v12 = vsel %vm2487_vm7, %v5549_v42, %v3140_v17  ;;  %v3549_v30 = vld [vmem:[%s6268_s3 + $0x350] sm:$0xff]  ;;  %v3507_v11 = vld [vmem:[%s6268_s3 + $0x200] sm:$0xff] }
 0x217   :  { %3779 = vmatprep.subr.mxu1 %v3567_v58  ;;  %v5820_v36 = vsel %vm2489_vm8, %v6407_v3, %v2862_v18  ;;  %v2996_v27 = vsel %vm2483_vm5, %v6408_v45, %v2995_v40  ;;  %3765 = vmatpush3.msra.mxu0 %v3509_v60  ;;  %v6411_v6 = vld [vmem:[#allocation17_spill] sm:$0xff]  ;;  %v5847_v42 = vsel %vm2489_vm8, %v5585_v61, %v3141_v12  ;;  %v6412_v19 = vld [vmem:[#allocation40_spill] sm:$0xff]  ;;  %v6413_v26 = vld [vmem:[#allocation42_spill] sm:$0xff] }
 0x218   :  { %3780 = vmatpush3.msra.mxu1 %v3551_v2  ;;  %v2997_v14 = vsel %vm2485_vm6, %v6409_v22, %v2996_v27  ;;  %v3272_v53 = vsel %vm2477_vm2, %v6411_v6, %v6410_v25  ;;  %3766 = vmatprep.subr.mxu0 %v3524_v1  ;;  %v3564_v15 = vld [vmem:[%s6268_s3 + $0x3c8] sm:$0xff]  ;;  %v6415_v47 = vld [vmem:[#allocation14_spill] sm:$0xff]  ;;  %v3602_v48 = vld [vmem:[%s6268_s3 + $0x4f8] sm:$0xff] }
 0x219   :  { %3781 = vmatprep.subr.mxu1 %v3566_v23  ;;  %v2998_v43 = vsel %vm2487_vm7, %v6412_v19, %v2997_v14  ;;  %v3273_v33 = vsel %vm2479_vm3, %v5152_v5, %v3272_v53  ;;  %3767 = vmatpush3.msra.mxu0 %v3508_v63  ;;  %v6414_v29 = vld [vmem:[#allocation5_spill] sm:$0xff]  ;;  %v6416_v39 = vld [vmem:[#allocation43_spill] sm:$0xff]  ;;  %v6417_v58 = vld [vmem:[#allocation20_spill] sm:$0xff] }
 0x21a   :  { %3782 = vmatpush3.msra.mxu1 %v3550_v35  ;;  %v5858_v24 = vsel %vm2489_vm8, %v6413_v26, %v2998_v43  ;;  %v3274_v61 = vsel %vm2481_vm4, %v5532_v57, %v3273_v33  ;;  %v3129_v28 = vsel %vm2477_vm2, %v6415_v47, %v6414_v29  ;;  %v3548_v5 = vld [vmem:[%s6268_s3 + $0x348] sm:$0xff]  ;;  %3768 = vmatprep.subr.mxu0 %v3523_v16  ;;  %v6419_v10 = vld [vmem:[#allocation16_spill] sm:$0xff]  ;;  %v3586_v49 = vld [vmem:[%s6268_s3 + $0x478] sm:$0xff] }
 0x21b   :  { %3783 = vmatprep.subr.mxu1 %v3565_v20  ;;  %v3275_v31 = vsel %vm2483_vm5, %v6416_v39, %v3274_v61  ;;  %v3130_v57 = vsel %vm2479_vm3, %v6417_v58, %v3129_v28  ;;  %v6418_v32 = vld [vmem:[#allocation9_spill] sm:$0xff]  ;;  %v3563_v55 = vld [vmem:[%s6268_s3 + $0x3c0] sm:$0xff]  ;;  %3769 = vmatpush3.msra.mxu0 %v3507_v11  ;;  %v6421_v60 = vld [vmem:[#allocation26_spill] sm:$0xff] }
 0x21c   :  { %v3265_v46 = vsel %vm2477_vm2, %v6419_v10, %v6418_v32  ;;  %3784 = vmatpush3.msra.mxu1 %v3549_v30  ;;  %v6420_v51 = vld [vmem:[#allocation44_spill] sm:$0xff]  ;;  %v3131_v4 = vsel %vm2481_vm4, %v6421_v60, %v3130_v57  ;;  %v6422_v13 = vld [vmem:[#allocation22_spill] sm:$0xff]  ;;  %2802 = vmatmul.mubr.f32.vlgmr.msra.gmra.mxu0 %v5754_v52  ;;  %v6424_v50 = vld [vmem:[#allocation27_spill] sm:$0xff] }
 0x21d   :  { %v3276_v2 = vsel %vm2485_vm6, %v6420_v51, %v3275_v31  ;;  %v3266_v54 = vsel %vm2479_vm3, %v6422_v13, %v3265_v46  ;;  %3785 = vmatprep.subr.mxu1 %v3564_v15  ;;  %v3547_v0 = vld [vmem:[%s6268_s3 + $0x340] sm:$0xff]  ;;  %v6423_v23 = vld [vmem:[#allocation30_spill] sm:$0xff]  ;;  %v3562_v41 = vld [vmem:[%s6268_s3 + $0x3b8] sm:$0xff]  ;;  %3808 = vmatprep.subr.mxu0 %v3602_v48 }
 0x21e   :  { %v3277_v37 = vsel %vm2487_vm7, %v5572_v7, %v3276_v2  ;;  %v3132_v1 = vsel %vm2483_vm5, %v6423_v23, %v3131_v4  ;;  %v3267_v18 = vsel %vm2481_vm4, %v6424_v50, %v3266_v54  ;;  %3786 = vmatpush3.msra.mxu1 %v3548_v5  ;;  %v3601_v38 = vld [vmem:[%s6268_s3 + $0x4f0] sm:$0xff]  ;;  %v6425_v40 = vld [vmem:[#allocation31_spill] sm:$0xff]  ;;  %3809 = vmatpush3.msra.mxu0 %v3586_v49  ;;  %v3600_v45 = vld [vmem:[%s6268_s3 + $0x4e8] sm:$0xff] }
 0x21f   :  { %v5908_v52 = vsel %vm2489_vm8, %v5606_v62, %v3277_v37  ;;  %v3133_v7 = vsel %vm2485_vm6, %v6386_v59, %v3132_v1  ;;  %v3268_v35 = vsel %vm2483_vm5, %v6425_v40, %v3267_v18  ;;  %3787 = vmatprep.subr.mxu1 %v3563_v55  ;;  %v3546_v63 = vld [vmem:[%s6268_s3 + $0x338] sm:$0xff]  ;;  %v3585_v3 = vld [vmem:[%s6268_s3 + $0x470] sm:$0xff]  ;;  %3073 = vmatprep.mubr.f32.mxu0 %v5768_v44  ;;  %v3584_v44 = vld [vmem:[%s6268_s3 + $0x468] sm:$0xff] }
 0x220   :  { %v3134_v62 = vsel %vm2487_vm7, %v5618_v56, %v3133_v7  ;;  %v3269_v17 = vsel %vm2485_vm6, %v6385_v34, %v3268_v35  ;;  %3788 = vmatpush3.msra.mxu1 %v3547_v0  ;;  %v3561_v59 = vld [vmem:[%s6268_s3 + $0x3b0] sm:$0xff]  ;;  %3810 = vmatprep.subr.mxu0 %v3601_v38  ;;  %v3544_v16 = vld [vmem:[%s6268_s3 + $0x328] sm:$0xff]  ;;  %v3559_v12 = vld [vmem:[%s6268_s3 + $0x3a0] sm:$0xff] }
 0x221   :  { %v5933_v27 = vsel %vm2489_vm8, %v5634_v21, %v3134_v62  ;;  %v3270_v56 = vsel %vm2487_vm7, %v5627_v8, %v3269_v17  ;;  %3789 = vmatprep.subr.mxu1 %v3562_v41  ;;  %v3545_v34 = vld [vmem:[%s6268_s3 + $0x330] sm:$0xff]  ;;  %v3560_v21 = vld [vmem:[%s6268_s3 + $0x3a8] sm:$0xff]  ;;  %3811 = vmatpush3.msra.mxu0 %v3585_v3  ;;  %v3599_v8 = vld [vmem:[%s6268_s3 + $0x4e0] sm:$0xff] }
 0x222   :  { %v5945_v20 = vsel %vm2489_vm8, %v5648_v9, %v3270_v56  ;;  %3790 = vmatpush3.msra.mxu1 %v3546_v63  ;;  %3812 = vmatprep.subr.mxu0 %v3600_v45  ;;  %v3583_v9 = vld [vmem:[%s6268_s3 + $0x460] sm:$0xff]  ;;  %v3598_v22 = vld [vmem:[%s6268_s3 + $0x4d8] sm:$0xff]  ;;  %v3597_v53 = vld [vmem:[%s6268_s3 + $0x4d0] sm:$0xff] }
 0x223   :  { %3791 = vmatprep.subr.mxu1 %v3561_v59  ;;  %3813 = vmatpush3.msra.mxu0 %v3584_v44  ;;  %v3543_v14 = vld [vmem:[%s6268_s3 + $0x320] sm:$0xff]  ;;  %v3582_v25 = vld [vmem:[%s6268_s3 + $0x458] sm:$0xff]  ;;  %v3581_v11 = vld [vmem:[%s6268_s3 + $0x450] sm:$0xff] }
 0x224   :  { %3792 = vmatpush3.msra.mxu1 %v3545_v34  ;;  %3814 = vmatprep.subr.mxu0 %v3599_v8  ;;  %v3558_v6 = vld [vmem:[%s6268_s3 + $0x398] sm:$0xff]  ;;  %v3557_v19 = vld [vmem:[%s6268_s3 + $0x390] sm:$0xff]  ;;  %v3596_v43 = vld [vmem:[%s6268_s3 + $0x4c8] sm:$0xff] }
 0x225   :  { %3793 = vmatprep.subr.mxu1 %v3560_v21  ;;  %3815 = vmatpush3.msra.mxu0 %v3583_v9  ;;  %v3542_v30 = vld [vmem:[%s6268_s3 + $0x318] sm:$0xff]  ;;  %v3541_v33 = vld [vmem:[%s6268_s3 + $0x310] sm:$0xff]  ;;  %v3580_v15 = vld [vmem:[%s6268_s3 + $0x448] sm:$0xff] }
 0x226   :  { %3794 = vmatpush3.msra.mxu1 %v3544_v16  ;;  %3816 = vmatprep.subr.mxu0 %v3598_v22  ;;  %v3556_v26 = vld [vmem:[%s6268_s3 + $0x388] sm:$0xff]  ;;  %v3595_v61 = vld [vmem:[%s6268_s3 + $0x4c0] sm:$0xff]  ;;  %v3594_v5 = vld [vmem:[%s6268_s3 + $0x4b8] sm:$0xff] }
 0x227   :  { %3795 = vmatprep.subr.mxu1 %v3559_v12  ;;  %3817 = vmatpush3.msra.mxu0 %v3582_v25  ;;  %v3540_v29 = vld [vmem:[%s6268_s3 + $0x308] sm:$0xff]  ;;  %v3579_v47 = vld [vmem:[%s6268_s3 + $0x440] sm:$0xff]  ;;  %v3578_v39 = vld [vmem:[%s6268_s3 + $0x438] sm:$0xff] }
 0x228   :  { %3796 = vmatpush3.msra.mxu1 %v3543_v14  ;;  %3818 = vmatprep.subr.mxu0 %v3597_v53  ;;  %v3555_v28 = vld [vmem:[%s6268_s3 + $0x380] sm:$0xff]  ;;  %v3634_v31 = vld [vmem:[%s6268_s3 + $0x5f8] sm:$0xff]  ;;  %v3633_v57 = vld [vmem:[%s6268_s3 + $0x5f0] sm:$0xff] }
 0x229   :  { %3797 = vmatprep.subr.mxu1 %v3558_v6  ;;  %3819 = vmatpush3.msra.mxu0 %v3581_v11  ;;  %v3539_v48 = vld [vmem:[%s6268_s3 + $0x300] sm:$0xff]  ;;  %v3618_v58 = vld [vmem:[%s6268_s3 + $0x578] sm:$0xff]  ;;  %v3593_v32 = vld [vmem:[%s6268_s3 + $0x4b0] sm:$0xff] }
 0x22a   :  { %3798 = vmatpush3.msra.mxu1 %v3542_v30  ;;  %3820 = vmatprep.subr.mxu0 %v3596_v43  ;;  %v3617_v10 = vld [vmem:[%s6268_s3 + $0x570] sm:$0xff]  ;;  %v3632_v55 = vld [vmem:[%s6268_s3 + $0x5e8] sm:$0xff]  ;;  %v3591_v2 = vld [vmem:[%s6268_s3 + $0x4a0] sm:$0xff] }
 0x22b   :  { %3799 = vmatprep.subr.mxu1 %v3557_v19  ;;  %3821 = vmatpush3.msra.mxu0 %v3580_v15  ;;  %v3577_v46 = vld [vmem:[%s6268_s3 + $0x430] sm:$0xff]  ;;  %v3616_v49 = vld [vmem:[%s6268_s3 + $0x568] sm:$0xff]  ;;  %v3615_v60 = vld [vmem:[%s6268_s3 + $0x560] sm:$0xff] }
 0x22c   :  { %3800 = vmatpush3.msra.mxu1 %v3541_v33  ;;  %3822 = vmatprep.subr.mxu0 %v3595_v61  ;;  %v3576_v51 = vld [vmem:[%s6268_s3 + $0x428] sm:$0xff]  ;;  %v3575_v4 = vld [vmem:[%s6268_s3 + $0x420] sm:$0xff]  ;;  %v3630_v13 = vld [vmem:[%s6268_s3 + $0x5d8] sm:$0xff] }
 0x22d   :  { %3801 = vmatprep.subr.mxu1 %v3556_v26  ;;  %3823 = vmatpush3.msra.mxu0 %v3579_v47  ;;  %v3590_v54 = vld [vmem:[%s6268_s3 + $0x498] sm:$0xff]  ;;  %v3629_v23 = vld [vmem:[%s6268_s3 + $0x5d0] sm:$0xff]  ;;  %v3628_v41 = vld [vmem:[%s6268_s3 + $0x5c8] sm:$0xff] }
 0x22e   :  { %3802 = vmatpush3.msra.mxu1 %v3540_v29  ;;  %3824 = vmatprep.subr.mxu0 %v3594_v5  ;;  %v3614_v0 = vld [vmem:[%s6268_s3 + $0x558] sm:$0xff]  ;;  %v3589_v1 = vld [vmem:[%s6268_s3 + $0x490] sm:$0xff]  ;;  %v3588_v38 = vld [vmem:[%s6268_s3 + $0x488] sm:$0xff] }
 0x22f   :  { %3803 = vmatprep.subr.mxu1 %v3555_v28  ;;  %3825 = vmatpush3.msra.mxu0 %v3578_v39  ;;  %v3574_v37 = vld [vmem:[%s6268_s3 + $0x418] sm:$0xff]  ;;  %v3613_v50 = vld [vmem:[%s6268_s3 + $0x550] sm:$0xff]  ;;  %v3612_v7 = vld [vmem:[%s6268_s3 + $0x548] sm:$0xff] }
 0x230   :  { %3804 = vmatpush3.msra.mxu1 %v3539_v48  ;;  %3826 = vmatprep.subr.mxu0 %v3593_v32  ;;  %v3573_v18 = vld [vmem:[%s6268_s3 + $0x410] sm:$0xff]  ;;  %v3572_v40 = vld [vmem:[%s6268_s3 + $0x408] sm:$0xff]  ;;  %v3627_v35 = vld [vmem:[%s6268_s3 + $0x5c0] sm:$0xff] }
 0x231   :  { %2938 = vmatmul.mubr.f32.vlgmr.msra.gmra.mxu1 %v5820_v36  ;;  %3843 = vmatprep.subr.mxu1 %v3634_v31  ;;  %v3592_v36 = vld [vmem:[%s6268_s3 + $0x4a8] sm:$0xff]  ;;  %v3587_v63 = vld [vmem:[%s6268_s3 + $0x480] sm:$0xff]  ;;  %v3626_v17 = vld [vmem:[%s6268_s3 + $0x5b8] sm:$0xff] }
 0x232   :  { %3844 = vmatpush3.msra.mxu1 %v3618_v58  ;;  %3209 = vmatprep.mubr.f32.mxu1 %v5847_v42  ;;  %v3631_v42 = vld [vmem:[%s6268_s3 + $0x5e0] sm:$0xff]  ;;  %v3610_v59 = vld [vmem:[%s6268_s3 + $0x538] sm:$0xff]  ;;  %v3625_v56 = vld [vmem:[%s6268_s3 + $0x5b0] sm:$0xff] }
 0x233   :  { %3845 = vmatprep.subr.mxu1 %v3633_v57  ;;  %3827 = vmatpush3.msra.mxu0 %v3577_v46  ;;  %v3611_v3 = vld [vmem:[%s6268_s3 + $0x540] sm:$0xff]  ;;  %v3666_v45 = vld [vmem:[%s6268_s3 + $0x6f8] sm:$0xff]  ;;  %v3609_v44 = vld [vmem:[%s6268_s3 + $0x530] sm:$0xff] }
 0x234   :  { %3846 = vmatpush3.msra.mxu1 %v3617_v10  ;;  %3828 = vmatprep.subr.mxu0 %v3592_v36  ;;  %v3571_v62 = vld [vmem:[%s6268_s3 + $0x400] sm:$0xff]  ;;  %v3650_v34 = vld [vmem:[%s6268_s3 + $0x678] sm:$0xff]  ;;  %v3624_v21 = vld [vmem:[%s6268_s3 + $0x5a8] sm:$0xff] }
 0x235   :  { %3847 = vmatprep.subr.mxu1 %v3632_v55  ;;  %3829 = vmatpush3.msra.mxu0 %v3576_v51  ;;  %v3665_v8 = vld [vmem:[%s6268_s3 + $0x6f0] sm:$0xff]  ;;  %v3608_v16 = vld [vmem:[%s6268_s3 + $0x528] sm:$0xff]  ;;  %v3623_v9 = vld [vmem:[%s6268_s3 + $0x5a0] sm:$0xff] }
 0x236   :  { %3848 = vmatpush3.msra.mxu1 %v3616_v49  ;;  %3830 = vmatprep.subr.mxu0 %v3591_v2  ;;  %v3664_v12 = vld [vmem:[%s6268_s3 + $0x6e8] sm:$0xff]  ;;  %v3607_v22 = vld [vmem:[%s6268_s3 + $0x520] sm:$0xff]  ;;  %v3622_v25 = vld [vmem:[%s6268_s3 + $0x598] sm:$0xff] }
 0x237   :  { %3849 = vmatprep.subr.mxu1 %v3631_v42  ;;  %3831 = vmatpush3.msra.mxu0 %v3575_v4  ;;  %v3648_v14 = vld [vmem:[%s6268_s3 + $0x668] sm:$0xff]  ;;  %v3606_v6 = vld [vmem:[%s6268_s3 + $0x518] sm:$0xff]  ;;  %v3647_v53 = vld [vmem:[%s6268_s3 + $0x660] sm:$0xff] }
 0x238   :  { %3850 = vmatpush3.msra.mxu1 %v3615_v60  ;;  %3832 = vmatprep.subr.mxu0 %v3590_v54  ;;  %v3621_v30 = vld [vmem:[%s6268_s3 + $0x590] sm:$0xff]  ;;  %v3662_v11 = vld [vmem:[%s6268_s3 + $0x6d8] sm:$0xff]  ;;  %v3620_v33 = vld [vmem:[%s6268_s3 + $0x588] sm:$0xff] }
 0x239   :  { %3851 = vmatprep.subr.mxu1 %v3630_v13  ;;  %3833 = vmatpush3.msra.mxu0 %v3574_v37  ;;  %v3605_v19 = vld [vmem:[%s6268_s3 + $0x510] sm:$0xff]  ;;  %v3646_v43 = vld [vmem:[%s6268_s3 + $0x658] sm:$0xff]  ;;  %v3604_v26 = vld [vmem:[%s6268_s3 + $0x508] sm:$0xff] }
 0x23a   :  { %3852 = vmatpush3.msra.mxu1 %v3614_v0  ;;  %3834 = vmatprep.subr.mxu0 %v3589_v1  ;;  %v3661_v15 = vld [vmem:[%s6268_s3 + $0x6d0] sm:$0xff]  ;;  %v3619_v29 = vld [vmem:[%s6268_s3 + $0x580] sm:$0xff]  ;;  %v3660_v47 = vld [vmem:[%s6268_s3 + $0x6c8] sm:$0xff] }
 0x23b   :  { %3853 = vmatprep.subr.mxu1 %v3629_v23  ;;  %3835 = vmatpush3.msra.mxu0 %v3573_v18  ;;  %v3645_v61 = vld [vmem:[%s6268_s3 + $0x650] sm:$0xff]  ;;  %v3603_v28 = vld [vmem:[%s6268_s3 + $0x500] sm:$0xff]  ;;  %v3644_v5 = vld [vmem:[%s6268_s3 + $0x648] sm:$0xff] }
 0x23c   :  { %3854 = vmatpush3.msra.mxu1 %v3613_v50  ;;  %3836 = vmatprep.subr.mxu0 %v3588_v38  ;;  %v3659_v48 = vld [vmem:[%s6268_s3 + $0x6c0] sm:$0xff]  ;;  %v3658_v31 = vld [vmem:[%s6268_s3 + $0x6b8] sm:$0xff]  ;;  %v3657_v57 = vld [vmem:[%s6268_s3 + $0x6b0] sm:$0xff] }
 0x23d   :  { %3855 = vmatprep.subr.mxu1 %v3628_v41  ;;  %3837 = vmatpush3.msra.mxu0 %v3572_v40  ;;  %v3643_v39 = vld [vmem:[%s6268_s3 + $0x640] sm:$0xff]  ;;  %v3642_v58 = vld [vmem:[%s6268_s3 + $0x638] sm:$0xff]  ;;  %v3641_v32 = vld [vmem:[%s6268_s3 + $0x630] sm:$0xff] }
 0x23e   :  { %3856 = vmatpush3.msra.mxu1 %v3612_v7  ;;  %3838 = vmatprep.subr.mxu0 %v3587_v63  ;;  %v3640_v10 = vld [vmem:[%s6268_s3 + $0x628] sm:$0xff]  ;;  %v3655_v46 = vld [vmem:[%s6268_s3 + $0x6a0] sm:$0xff]  ;;  %v3654_v36 = vld [vmem:[%s6268_s3 + $0x698] sm:$0xff] }
 0x23f   :  { %3857 = vmatprep.subr.mxu1 %v3627_v35  ;;  %3839 = vmatpush3.msra.mxu0 %v3571_v62  ;;  %v3639_v55 = vld [vmem:[%s6268_s3 + $0x620] sm:$0xff]  ;;  %v3638_v49 = vld [vmem:[%s6268_s3 + $0x618] sm:$0xff]  ;;  %v3653_v51 = vld [vmem:[%s6268_s3 + $0x690] sm:$0xff] }
 0x240   :  { %3858 = vmatpush3.msra.mxu1 %v3611_v3  ;;  %3074 = vmatmul.mubr.f32.vlgmr.msra.gmra.mxu0 %v5858_v24  ;;  %v3649_v24 = vld [vmem:[%s6268_s3 + $0x670] sm:$0xff]  ;;  %v3652_v2 = vld [vmem:[%s6268_s3 + $0x688] sm:$0xff]  ;;  %v3651_v4 = vld [vmem:[%s6268_s3 + $0x680] sm:$0xff] }
 0x241   :  { %3859 = vmatprep.subr.mxu1 %v3626_v17  ;;  %3878 = vmatprep.subr.mxu0 %v3666_v45  ;;  %v3637_v42 = vld [vmem:[%s6268_s3 + $0x610] sm:$0xff]  ;;  %v3636_v60 = vld [vmem:[%s6268_s3 + $0x608] sm:$0xff]  ;;  %v3635_v13 = vld [vmem:[%s6268_s3 + $0x600] sm:$0xff] }
 0x242   :  { %3860 = vmatpush3.msra.mxu1 %v3610_v59  ;;  %3879 = vmatpush3.msra.mxu0 %v3650_v34 }
 0x243   :  { %3861 = vmatprep.subr.mxu1 %v3625_v56  ;;  %3345 = vmatprep.mubr.f32.mxu0 %v5908_v52  ;;  %v3663_v52 = vld [vmem:[%s6268_s3 + $0x6e0] sm:$0xff] }
 0x244   :  { %3862 = vmatpush3.msra.mxu1 %v3609_v44  ;;  %3880 = vmatprep.subr.mxu0 %v3665_v8 }
 0x245   :  { %3863 = vmatprep.subr.mxu1 %v3624_v21  ;;  %3881 = vmatpush3.msra.mxu0 %v3649_v24 }
 0x246   :  { %3864 = vmatpush3.msra.mxu1 %v3608_v16  ;;  %3882 = vmatprep.subr.mxu0 %v3664_v12 }
 0x247   :  { %3865 = vmatprep.subr.mxu1 %v3623_v9  ;;  %3883 = vmatpush3.msra.mxu0 %v3648_v14  ;;  %v3667_v9 = vld [vmem:[%s6269_s4] ss:$0 sm:$0xff] }
 0x248   :  { %3866 = vmatpush3.msra.mxu1 %v3607_v22  ;;  %3884 = vmatprep.subr.mxu0 %v3663_v52 }
 0x249   :  { %3867 = vmatprep.subr.mxu1 %v3622_v25  ;;  %3885 = vmatpush3.msra.mxu0 %v3647_v53 }
 0x24a   :  { %3868 = vmatpush3.msra.mxu1 %v3606_v6  ;;  %3886 = vmatprep.subr.mxu0 %v3662_v11 }
 0x24b   :  { %3869 = vmatprep.subr.mxu1 %v3621_v30  ;;  %3887 = vmatpush3.msra.mxu0 %v3646_v43 }
 0x24c   :  { %3870 = vmatpush3.msra.mxu1 %v3605_v19  ;;  %3888 = vmatprep.subr.mxu0 %v3661_v15 }
 0x24d   :  { %3871 = vmatprep.subr.mxu1 %v3620_v33  ;;  %3889 = vmatpush3.msra.mxu0 %v3645_v61 }
 0x24e   :  { %3872 = vmatpush3.msra.mxu1 %v3604_v26  ;;  %3890 = vmatprep.subr.mxu0 %v3660_v47 }
 0x24f   :  { %3873 = vmatprep.subr.mxu1 %v3619_v29  ;;  %3891 = vmatpush3.msra.mxu0 %v3644_v5 }
 0x250   :  { %3874 = vmatpush3.msra.mxu1 %v3603_v28  ;;  %3892 = vmatprep.subr.mxu0 %v3659_v48 }
 0x251   :  { %3210 = vmatmul.mubr.f32.vlgmr.msra.gmra.mxu1 %v5933_v27  ;;  %3893 = vmatpush3.msra.mxu0 %v3643_v39  ;;  %v3656_v27 = vld [vmem:[%s6268_s3 + $0x6a8] sm:$0xff] }
 0x252   :  { %3894 = vmatprep.subr.mxu0 %v3658_v31 }
 0x253   :  { %3895 = vmatpush3.msra.mxu0 %v3642_v58 }
 0x254   :  { %3896 = vmatprep.subr.mxu0 %v3657_v57 }
 0x255   :  { %3897 = vmatpush3.msra.mxu0 %v3641_v32 }
 0x256   :  { %3898 = vmatprep.subr.mxu0 %v3656_v27 }
 0x257   :  { %3899 = vmatpush3.msra.mxu0 %v3640_v10 }
 0x258   :  { %3900 = vmatprep.subr.mxu0 %v3655_v46 }
 0x259   :  { %3901 = vmatpush3.msra.mxu0 %v3639_v55 }
 0x25a   :  { %3902 = vmatprep.subr.mxu0 %v3654_v36 }
 0x25b   :  { %3903 = vmatpush3.msra.mxu0 %v3638_v49 }
 0x25c   :  { %3904 = vmatprep.subr.mxu0 %v3653_v51 }
 0x25d   :  { %3905 = vmatpush3.msra.mxu0 %v3637_v42 }
 0x25e   :  { %3906 = vmatprep.subr.mxu0 %v3652_v2 }
 0x25f   :  { %3907 = vmatpush3.msra.mxu0 %v3636_v60 }
 0x260   :  { %3908 = vmatprep.subr.mxu0 %v3651_v4 }
 0x261   :  { %3909 = vmatpush3.msra.mxu0 %v3635_v13 }
 0x262   :  { %3346 = vmatmul.mubr.f32.vlgmr.msra.gmra.mxu0 %v5945_v20 }
 0x2b9   :  { %v3700_v54 = vpop.f32.mrf.mxu0 }
 0x2bb   :  { %v3701_v0 = vpop.f32.mrf.mxu0 }
 0x2bc   :  { %v3702_v7 = vadd.f32 %v3701_v0, %v3700_v54 }
 0x2d1   :  { %v3735_v37 = vpop.f32.mrf.mxu1 }
 0x2d3   :  { %v3736_v1 = vpop.f32.mrf.mxu1 }
 0x2d4   :  { %v3737_v41 = vadd.f32 %v3736_v1, %v3735_v37 }
 0x2d6   :  { %v2669_v63 = vadd.f32 %v3737_v41, %v3702_v7 }
 0x2dc   :  { %v3770_v23 = vpop.f32.mrf.mxu0 }
 0x2de   :  { %v3771_v50 = vpop.f32.mrf.mxu0 }
 0x2df   :  { %v3772_v40 = vadd.f32 %v3771_v50, %v3770_v23 }
 0x2e1   :  { %v2807_v17 = vadd.f32 %v3772_v40, %v2669_v63 }
 0x2f1   :  { %v3805_v18 = vpop.f32.mrf.mxu1 }
 0x2f3   :  { %v3806_v35 = vpop.f32.mrf.mxu1 }
 0x2f4   :  { %v3807_v59 = vadd.f32 %v3806_v35, %v3805_v18 }
 0x2f6   :  { %v2943_v20 = vadd.f32 %v3807_v59, %v2807_v17 }
 0x300   :  { %v3840_v38 = vpop.f32.mrf.mxu0 }
 0x302   :  { %v3841_v3 = vpop.f32.mrf.mxu0 }
 0x303   :  { %v3842_v45 = vadd.f32 %v3841_v3, %v3840_v38 }
 0x305   :  { %v3079_v34 = vadd.f32 %v3842_v45, %v2943_v20 }
 0x311   :  { %v3875_v62 = vpop.f32.mrf.mxu1 }
 0x313   :  { %v3876_v56 = vpop.f32.mrf.mxu1 }
 0x314   :  { %v3877_v44 = vadd.f32 %v3876_v56, %v3875_v62 }
 0x316   :  { %v3215_v16 = vadd.f32 %v3877_v44, %v3079_v34 }
 0x322   :  { %v3910_v21 = vpop.f32.mrf.mxu0 }
 0x324   :  { %v3911_v8 = vpop.f32.mrf.mxu0 }
 0x325   :  { %v3912_v24 = vadd.f32 %v3911_v8, %v3910_v21 }
 0x327   :  { %v3351_v12 = vadd.f32 %v3912_v24, %v3215_v16 }
 0x329   :  { %v3359_v22 = vadd.f32 %v3667_v9, %v3351_v12 }
 0x32b   :  { %3360 = vst [vmem:[#allocation2] sm:$0xff] %v3359_v22 }
 0x32c   :  { %3939 = shalt.err (!%p3936_p4)
}
 0x32d   :  { %3370 = dma.vmem_to_hbm [thread:$0]  %s3368_s29, 128, %s6270_s5, [#allocation3]  }
 0x32e   :  { %3948 = dma.done.wait [#allocation3], 128  }
 0x32f   :  { %3949 = vsyncadd [#allocation3], 4294967168 }
 0x330   :  { %3374 = vsyncpa [#allocation3], 1 }

</bundles_post_ra>
